<compile_context>
chip_gen: v7x
topology: tpu7x:2x2x1
jax: 0.10.0
libtpu: 0.0.40
codegen_flags: <defaults>
</compile_context>

<pallas_src>
import functools
import math

import jax
import jax.numpy as jnp
from jax.experimental import pallas as pl
from jax.experimental.pallas import tpu as pltpu

IN_DIM = 3 * 32 * 32   # 3072
H1 = 512
H2 = 256
OUT_DIM = 10
OUT_PAD = 128          # lane-dense padded logits width

ROW_CAP = 1024         # max batch-tile rows (fits v7x's 64 MiB VMEM, see footprint)


def _round_up(x, m):
    return ((x + m - 1) // m) * m


def _tpu_vmem_info():
    """(vmem_capacity_bytes, likely_multi_tensorcore). Conservative fallback."""
    try:
        cap = int(pltpu.get_tpu_info().vmem_capacity_bytes)
        # v7x has 64 MiB per TensorCore and 2 TCs/chip; v5e/v6e have 128 MiB, 1 TC.
        return cap, cap < (96 << 20)
    except Exception:
        return 64 << 20, False


def mlp_kernel(x_ref, w1_ref, b1_ref, w2_ref, b2_ref, w3_ref, b3_ref, o_ref):
    # fc1: cast the f32 x tile to bf16 in-VMEM, MXU matmul with f32 accumulate,
    # then f32 VPU bias + ReLU.
    x = x_ref[...].astype(jnp.bfloat16)
    h1 = jnp.dot(x, w1_ref[...], preferred_element_type=jnp.float32)
    h1 = jnp.maximum(h1 + b1_ref[...], 0.0).astype(jnp.bfloat16)
    # fc2 + bias + ReLU
    h2 = jnp.dot(h1, w2_ref[...], preferred_element_type=jnp.float32)
    h2 = jnp.maximum(h2 + b2_ref[...], 0.0).astype(jnp.bfloat16)
    # fc3 (logits, padded to 128 lanes -> unmasked lane-dense stores)
    o_ref[...] = (
        jnp.dot(h2, w3_ref[...], preferred_element_type=jnp.float32) + b3_ref[...]
    ).astype(o_ref.dtype)


def _vmem_footprint(block_b):
    """VMEM bytes for one grid step with f32 x tiles (double-buffered I/O)."""
    return (
        2 * block_b * IN_DIM * 4                              # x tile, 2 bufs, f32
        + 2 * block_b * OUT_PAD * 4                           # out tile, 2 bufs, f32
        + 2 * (IN_DIM * H1 + H1 * H2 + H2 * OUT_PAD) * 2      # bf16 weights, 2 bufs
        + 2 * (H1 + H2 + OUT_PAD) * 4                         # f32 biases, 2 bufs
        + block_b * IN_DIM * 2                                # in-kernel bf16 x copy
        + block_b * (H1 + H2) * (4 + 2)                       # f32+bf16 activations
    )


@functools.partial(jax.jit, static_argnames=("block_b", "vmem_limit"))
def _forward(x_nchw, params, block_b, vmem_limit):
    w1, b1, w2, b2, w3, b3 = params
    B = x_nchw.shape[0]

    # Glue (plain JAX): NCHW -> (B, 3072). No dtype cast here; the kernel casts.
    x = x_nchw.reshape(B, -1)

    # Pad only the (tiny) remainder so the batch tiles evenly; block_b is chosen
    # so this never creates a mostly-padding tile.
    B_pad = _round_up(B, block_b)
    if B_pad != B:
        x = jnp.pad(x, ((0, B_pad - B), (0, 0)))

    grid = (B_pad // block_b,)

    def const_spec(shape):
        # Block index never changes across the grid: the pipeliner skips re-DMA
        # after step 0; default double-buffering is fine (weights are ~3.3 MiB).
        return pl.BlockSpec(shape, lambda i: (0, 0))

    in_specs = [
        pl.BlockSpec((block_b, IN_DIM), lambda i: (i, 0)),   # x tile (f32)
        const_spec((IN_DIM, H1)),                            # w1 (bf16)
        const_spec((1, H1)),                                 # b1 (f32)
        const_spec((H1, H2)),                                # w2 (bf16)
        const_spec((1, H2)),                                 # b2 (f32)
        const_spec((H2, OUT_PAD)),                           # w3 padded (bf16)
        const_spec((1, OUT_PAD)),                            # b3 padded (f32)
    ]
    out_spec = pl.BlockSpec((block_b, OUT_PAD), lambda i: (i, 0))

    out = pl.pallas_call(
        mlp_kernel,
        out_shape=jax.ShapeDtypeStruct((B_pad, OUT_PAD), jnp.float32),
        grid_spec=pltpu.PrefetchScalarGridSpec(
            num_scalar_prefetch=0,
            grid=grid,
            in_specs=in_specs,
            out_specs=out_spec,
        ),
        compiler_params=pltpu.CompilerParams(
            dimension_semantics=("parallel",),
            vmem_limit_bytes=vmem_limit,
        ),
    )(x, w1, b1, w2, b2, w3, b3)

    return out[:B, :OUT_DIM]


def simple_mlp_forward(x_nchw, params, block_b=None):
    B = x_nchw.shape[0]
    vmem_cap, multi_tc = _tpu_vmem_info()

    if block_b is None:
        B8 = _round_up(max(B, 1), 8)
        # Number of batch tiles: as few as the row cap allows (amortizes the
        # ~0.35 us/step pipeline overhead on single-TC v5e/v6e), but keep >=2
        # tiles on multi-TC (v7x-class) chips so both TensorCores get work.
        n_tiles = max(1, math.ceil(B8 / ROW_CAP))
        if multi_tc and B8 >= 16:
            n_tiles = max(n_tiles, 2)
        # Balanced tiles sized to the actual batch -> never a mostly-padding tile.
        block_b = _round_up(math.ceil(B8 / n_tiles), 8)

    # Tight, generation-aware VMEM cap: footprint + small headroom, bounded by
    # the chip's real VMEM capacity (64 MiB per TC on v7x, 128 MiB on v5e/v6e).
    vmem_limit = int(min(_vmem_footprint(block_b) + (4 << 20), vmem_cap))

    return _forward(x_nchw, params, block_b=block_b, vmem_limit=vmem_limit)


def init_params(key):
    """torch.nn.Linear-style init: U(-1/sqrt(fan_in), +); weights stored (in, out)."""
    def linear_init(k, fan_in, fan_out):
        kw, kb = jax.random.split(k)
        bound = 1.0 / math.sqrt(fan_in)
        w = jax.random.uniform(kw, (fan_in, fan_out), jnp.float32, -bound, bound)
        b = jax.random.uniform(kb, (1, fan_out), jnp.float32, -bound, bound)
        return w, b

    k1, k2, k3 = jax.random.split(key, 3)
    w1, b1 = linear_init(k1, IN_DIM, H1)
    w2, b2 = linear_init(k2, H1, H2)
    w3, b3 = linear_init(k3, H2, OUT_DIM)
    return (w1, b1, w2, b2, w3, b3)


def prepare_params(params):
    """One-time prep: bf16 weights (half the weight HBM traffic, 2x MXU rate),
    f32 biases, fc3 padded to a lane-dense 128-wide output."""
    w1, b1, w2, b2, w3, b3 = params
    w3p = jnp.pad(w3, ((0, 0), (0, OUT_PAD - OUT_DIM)))
    b3p = jnp.pad(b3, ((0, 0), (0, OUT_PAD - OUT_DIM)))
    return (
        w1.astype(jnp.bfloat16), b1.astype(jnp.float32),
        w2.astype(jnp.bfloat16), b2.astype(jnp.float32),
        w3p.astype(jnp.bfloat16), b3p.astype(jnp.float32),
    )


def reference_forward(x_nchw, prepared_params):
    """Pure-JAX reference with matching numerics (bf16 operands, f32 accumulate)."""
    w1, b1, w2, b2, w3, b3 = prepared_params
    x = x_nchw.reshape(x_nchw.shape[0], -1).astype(jnp.bfloat16)
    h1 = jnp.maximum(jnp.dot(x, w1, preferred_element_type=jnp.float32) + b1, 0.0)
    h1 = h1.astype(jnp.bfloat16)
    h2 = jnp.maximum(jnp.dot(h1, w2, preferred_element_type=jnp.float32) + b2, 0.0)
    h2 = h2.astype(jnp.bfloat16)
    logits = jnp.dot(h2, w3, preferred_element_type=jnp.float32) + b3
    return logits[:, :OUT_DIM]


if __name__ == "__main__":
    key = jax.random.PRNGKey(0)
    kx, kp = jax.random.split(key)

    B = 16  # small batch; one (or two, on multi-TC chips) 8-aligned MXU batch tiles
    x = jax.random.normal(kx, (B, 3, 32, 32), dtype=jnp.float32)
    params = prepare_params(init_params(kp))

    out = simple_mlp_forward(x, params)
    out = jax.block_until_ready(out)

    ref = reference_forward(x, params)
    assert out.shape == (B, OUT_DIM), out.shape
    assert jnp.allclose(out, ref, atol=2e-2, rtol=2e-2), "mismatch vs reference"

    print("KERNEL_OK")
</pallas_src>

<mosaic_0001>
module attributes {stable_mosaic.version = 11 : i64} {
  func.func @mlp_kernel(%arg0: i32, %arg1: memref<16x3072xf32, #tpu.memory_space<vmem>>, %arg2: memref<3072x512xbf16, #tpu.memory_space<vmem>>, %arg3: memref<1x512xf32, #tpu.memory_space<vmem>>, %arg4: memref<512x256xbf16, #tpu.memory_space<vmem>>, %arg5: memref<1x256xf32, #tpu.memory_space<vmem>>, %arg6: memref<256x128xbf16, #tpu.memory_space<vmem>>, %arg7: memref<1x128xf32, #tpu.memory_space<vmem>>, %arg8: memref<16x128xf32, #tpu.memory_space<vmem>>) attributes {dimension_semantics = [#tpu.dimension_semantics<parallel>], iteration_bounds = array<i64: 1>, scalar_prefetch = 0 : i64, scratch_operands = 0 : i64, tpu.core_type = #tpu.core_type<tc>, window_params = [{transform_indices = @transform_0, window_bounds = array<i64: 16, 3072>}, {pipeline_mode = #tpu.pipeline_mode<synchronous>, transform_indices = @transform_1, window_bounds = array<i64: 3072, 512>}, {pipeline_mode = #tpu.pipeline_mode<synchronous>, transform_indices = @transform_2, window_bounds = array<i64: 1, 512>}, {pipeline_mode = #tpu.pipeline_mode<synchronous>, transform_indices = @transform_3, window_bounds = array<i64: 512, 256>}, {pipeline_mode = #tpu.pipeline_mode<synchronous>, transform_indices = @transform_4, window_bounds = array<i64: 1, 256>}, {pipeline_mode = #tpu.pipeline_mode<synchronous>, transform_indices = @transform_5, window_bounds = array<i64: 256, 128>}, {pipeline_mode = #tpu.pipeline_mode<synchronous>, transform_indices = @transform_6, window_bounds = array<i64: 1, 128>}, {transform_indices = @transform_7, window_bounds = array<i64: 16, 128>}]} {
    %c0 = arith.constant 0 : index
    %c0_0 = arith.constant 0 : index
    %0 = vector.load %arg1[%c0, %c0_0] : memref<16x3072xf32, #tpu.memory_space<vmem>>, vector<16x3072xf32>
    %1 = arith.truncf %0 : vector<16x3072xf32> to vector<16x3072xbf16>
    %c0_1 = arith.constant 0 : index
    %c0_2 = arith.constant 0 : index
    %2 = vector.load %arg2[%c0_1, %c0_2] : memref<3072x512xbf16, #tpu.memory_space<vmem>>, vector<3072x512xbf16>
    %cst = arith.constant dense<0.000000e+00> : vector<16x512xf32>
    %3 = tpu.matmul %1, %2, %cst {dimension_numbers = #tpu.dot_dimension_numbers<[1], [0], [0], [1], [0, 0, 1, 1], [], []>} : vector<16x3072xbf16>, vector<3072x512xbf16>, vector<16x512xf32> -> vector<16x512xf32>
    %c0_3 = arith.constant 0 : index
    %c0_4 = arith.constant 0 : index
    %4 = vector.load %arg3[%c0_3, %c0_4] : memref<1x512xf32, #tpu.memory_space<vmem>>, vector<1x512xf32>
    %5 = vector.broadcast %4 : vector<1x512xf32> to vector<16x512xf32>
    %6 = arith.addf %3, %5 : vector<16x512xf32>
    %cst_5 = arith.constant 0.000000e+00 : f32
    %7 = vector.broadcast %cst_5 : f32 to vector<16x512xf32>
    %8 = arith.maximumf %6, %7 : vector<16x512xf32>
    %9 = arith.truncf %8 : vector<16x512xf32> to vector<16x512xbf16>
    %c0_6 = arith.constant 0 : index
    %c0_7 = arith.constant 0 : index
    %10 = vector.load %arg4[%c0_6, %c0_7] : memref<512x256xbf16, #tpu.memory_space<vmem>>, vector<512x256xbf16>
    %cst_8 = arith.constant dense<0.000000e+00> : vector<16x256xf32>
    %11 = tpu.matmul %9, %10, %cst_8 {dimension_numbers = #tpu.dot_dimension_numbers<[1], [0], [0], [1], [0, 0, 1, 1], [], []>} : vector<16x512xbf16>, vector<512x256xbf16>, vector<16x256xf32> -> vector<16x256xf32>
    %c0_9 = arith.constant 0 : index
    %c0_10 = arith.constant 0 : index
    %12 = vector.load %arg5[%c0_9, %c0_10] : memref<1x256xf32, #tpu.memory_space<vmem>>, vector<1x256xf32>
    %13 = vector.broadcast %12 : vector<1x256xf32> to vector<16x256xf32>
    %14 = arith.addf %11, %13 : vector<16x256xf32>
    %cst_11 = arith.constant 0.000000e+00 : f32
    %15 = vector.broadcast %cst_11 : f32 to vector<16x256xf32>
    %16 = arith.maximumf %14, %15 : vector<16x256xf32>
    %17 = arith.truncf %16 : vector<16x256xf32> to vector<16x256xbf16>
    %c0_12 = arith.constant 0 : index
    %c0_13 = arith.constant 0 : index
    %18 = vector.load %arg6[%c0_12, %c0_13] : memref<256x128xbf16, #tpu.memory_space<vmem>>, vector<256x128xbf16>
    %cst_14 = arith.constant dense<0.000000e+00> : vector<16x128xf32>
    %19 = tpu.matmul %17, %18, %cst_14 {dimension_numbers = #tpu.dot_dimension_numbers<[1], [0], [0], [1], [0, 0, 1, 1], [], []>} : vector<16x256xbf16>, vector<256x128xbf16>, vector<16x128xf32> -> vector<16x128xf32>
    %c0_15 = arith.constant 0 : index
    %c0_16 = arith.constant 0 : index
    %20 = vector.load %arg7[%c0_15, %c0_16] : memref<1x128xf32, #tpu.memory_space<vmem>>, vector<1x128xf32>
    %21 = vector.broadcast %20 : vector<1x128xf32> to vector<16x128xf32>
    %22 = arith.addf %19, %21 : vector<16x128xf32>
    %c0_17 = arith.constant 0 : index
    %c0_18 = arith.constant 0 : index
    %23 = vector.load %arg8[%c0_17, %c0_18] : memref<16x128xf32, #tpu.memory_space<vmem>>, vector<16x128xf32>
    tpu.vector_store %arg8[%c0_17, %c0_18], %22 {strides = array<i32>} : memref<16x128xf32, #tpu.memory_space<vmem>>, vector<16x128xf32>,
    return
  }
  func.func @transform_0(%arg0: i32) -> (i32, i32) {
    %c0_i32 = arith.constant 0 : i32
    %c0_i32_0 = arith.constant 0 : i32
    return %arg0, %c0_i32 : i32, i32
  }
  func.func @transform_1(%arg0: i32) -> (i32, i32) {
    %c0_i32 = arith.constant 0 : i32
    %c0_i32_0 = arith.constant 0 : i32
    %c0_i32_1 = arith.constant 0 : i32
    return %c0_i32, %c0_i32_0 : i32, i32
  }
  func.func @transform_2(%arg0: i32) -> (i32, i32) {
    %c0_i32 = arith.constant 0 : i32
    %c0_i32_0 = arith.constant 0 : i32
    %c0_i32_1 = arith.constant 0 : i32
    return %c0_i32, %c0_i32_0 : i32, i32
  }
  func.func @transform_3(%arg0: i32) -> (i32, i32) {
    %c0_i32 = arith.constant 0 : i32
    %c0_i32_0 = arith.constant 0 : i32
    %c0_i32_1 = arith.constant 0 : i32
    return %c0_i32, %c0_i32_0 : i32, i32
  }
  func.func @transform_4(%arg0: i32) -> (i32, i32) {
    %c0_i32 = arith.constant 0 : i32
    %c0_i32_0 = arith.constant 0 : i32
    %c0_i32_1 = arith.constant 0 : i32
    return %c0_i32, %c0_i32_0 : i32, i32
  }
  func.func @transform_5(%arg0: i32) -> (i32, i32) {
    %c0_i32 = arith.constant 0 : i32
    %c0_i32_0 = arith.constant 0 : i32
    %c0_i32_1 = arith.constant 0 : i32
    return %c0_i32, %c0_i32_0 : i32, i32
  }
  func.func @transform_6(%arg0: i32) -> (i32, i32) {
    %c0_i32 = arith.constant 0 : i32
    %c0_i32_0 = arith.constant 0 : i32
    %c0_i32_1 = arith.constant 0 : i32
    return %c0_i32, %c0_i32_0 : i32, i32
  }
  func.func @transform_7(%arg0: i32) -> (i32, i32) {
    %c0_i32 = arith.constant 0 : i32
    %c0_i32_0 = arith.constant 0 : i32
    return %arg0, %c0_i32 : i32, i32
  }
}

</mosaic_0001>

<bundles_post_ra>
// kernel: _forward.1
= control target key start
LH: loop header
LB: loop body
LE: loop exit
PB: predicated region body
PF: predicated region fallthrough
CT: control target
= control target key end

     0   :  { %12 = vsyncpa [#allocation3], 0  ;;  %s9367_s0 = inlined_call_operand.vmem [shape: f32[16,3072], index: 0, kind: input, shape index: {}]   ;;  %s9368_s1 = inlined_call_operand.hbm [shape: bf16[3072,512], index: 1, kind: input, shape index: {}]   ;;  %s9369_s2 = inlined_call_operand.hbm [shape: f32[1,512], index: 2, kind: input, shape index: {}]   ;;  %s9370_s3 = inlined_call_operand.hbm [shape: bf16[512,256], index: 3, kind: input, shape index: {}]   ;;  %s9371_s4 = inlined_call_operand.hbm [shape: f32[1,256], index: 4, kind: input, shape index: {}]   ;;  %s9372_s5 = inlined_call_operand.hbm [shape: bf16[256,128], index: 5, kind: input, shape index: {}]   ;;  %s9373_s6 = inlined_call_operand.hbm [shape: f32[1,128], index: 6, kind: input, shape index: {}]   ;;  %s9374_s7 = inlined_call_operand.hbm [shape: f32[16,128], index: 7, kind: output, shape index: {}]  }
   0x1   :  { %13 = vsyncpa [#allocation6], 0 }
   0x2   :  { %14 = vsyncpa [#allocation9], 0 }
   0x3   :  { %15 = vsyncpa [#allocation12], 0 }
   0x4   :  { %16 = vsyncpa [#allocation4], 0  ;;  %s8952_s24 = smov [#allocation5]   ;;  %s8953_s26 = smov [#allocation8]  }
   0x5   :  { %s37_s25 = sshll.u32 %s8952_s24, 4  ;;  %s59_s27 = sshll.u32 %s8953_s26, 4  ;;  %s38_s25 = int_to_ptr.vmem [resolvable:$true] %s37_s25  ;;  %s60_s27 = int_to_ptr.vmem [resolvable:$true] %s59_s27 }
   0x6   :  { %s8788_s30 = scalar_lea.hbm %s9369_s2, 64 }
   0x7   :  { %p8789_p0 = scmp.ne.s32.totalorder %s9369_s2, %s8788_s30  ;;  %p8792_p1 = scmp.lt.u32.totalorder %s8788_s30, %s9369_s2 }
   0x9   :  { %p8794_p2 = pnand %p8792_p1, %p8789_p0 }
   0xb   :  { %8797 = shalt.err (!%p8794_p2)
}
   0xc   :  { %s8798_s12 = scalar_lea.vmem %s38_s25, 64  ;;  %p8803_p4 = scmp.lt.s32.totalorder %s38_s25, %s38_s25 }
   0xd   :  { %p8799_p3 = scmp.ne.s32.totalorder %s38_s25, %s8798_s12  ;;  %p8804_p5 = scmp.lt.s32.totalorder %s8798_s12, %s8798_s12 }
   0xf   :  { %p8805_p6 = por %p8804_p5, %p8803_p4 }
  0x11   :  { %p8806_p7 = pnand %p8805_p6, %p8799_p3 }
  0x13   :  { %8809 = shalt.err (!%p8806_p7)
}
  0x14   :  { %40 = dma.hbm_to_vmem [thread:$0]  %s9369_s2, 64, %s38_s25, [#allocation6]  }
  0x15   :  { %s8810_s17 = scalar_lea.hbm %s9371_s4, 32 }
  0x16   :  { %p8811_p8 = scmp.ne.s32.totalorder %s9371_s4, %s8810_s17  ;;  %p8814_p9 = scmp.lt.u32.totalorder %s8810_s17, %s9371_s4 }
  0x18   :  { %p8816_p10 = pnand %p8814_p9, %p8811_p8 }
  0x1a   :  { %8819 = shalt.err (!%p8816_p10)
}
  0x1b   :  { %s8820_s22 = scalar_lea.vmem %s60_s27, 32  ;;  %p8825_p12 = scmp.lt.s32.totalorder %s60_s27, %s60_s27 }
  0x1c   :  { %p8821_p11 = scmp.ne.s32.totalorder %s60_s27, %s8820_s22  ;;  %p8826_p13 = scmp.lt.s32.totalorder %s8820_s22, %s8820_s22 }
  0x1e   :  { %p8827_p0 = por %p8826_p13, %p8825_p12 }
  0x20   :  { %p8828_p1 = pnand %p8827_p0, %p8821_p11 }
  0x22   :  { %8831 = shalt.err (!%p8828_p1)
}
  0x23   :  { %62 = dma.hbm_to_vmem [thread:$0]  %s9371_s4, 32, %s60_s27, [#allocation9]  }
  0x24   :  { %s8954_s24 = smov [#allocation2]   ;;  %s8832_s29 = scalar_lea.hbm %s9368_s1, 98304 }
  0x25   :  { %s24_s25 = sshll.u32 %s8954_s24, 4  ;;  %p8833_p2 = scmp.ne.s32.totalorder %s9368_s1, %s8832_s29  ;;  %s25_s25 = int_to_ptr.vmem [resolvable:$true] %s24_s25 }
  0x26   :  { %p8836_p3 = scmp.lt.u32.totalorder %s8832_s29, %s9368_s1 }
  0x28   :  { %p8838_p4 = pnand %p8836_p3, %p8833_p2 }
  0x2a   :  { %8841 = shalt.err (!%p8838_p4)
}
  0x2b   :  { %s8842_s11 = scalar_lea.vmem %s25_s25, 98304  ;;  %p8847_p6 = scmp.lt.s32.totalorder %s25_s25, %s25_s25 }
  0x2c   :  { %p8843_p5 = scmp.ne.s32.totalorder %s25_s25, %s8842_s11  ;;  %p8848_p7 = scmp.lt.s32.totalorder %s8842_s11, %s8842_s11 }
  0x2e   :  { %p8849_p8 = por %p8848_p7, %p8847_p6 }
  0x30   :  { %p8850_p9 = pnand %p8849_p8, %p8843_p5 }
  0x32   :  { %8853 = shalt.err (!%p8850_p9)
}
  0x33   :  { %s8955_s4 = smov 256   ;;  %s8956_s27 = smov 16  }
  0x34   :  { %30 = dma.hbm_to_vmem [thread:$0]  %s9368_s1, 98304, %s25_s25, [#allocation3], %s8955_s4, %s8955_s4, %s8956_s27  }
  0x35   :  { %s8957_s14 = smov [#allocation7]   ;;  %s8854_s18 = scalar_lea.hbm %s9370_s3, 8192 }
  0x36   :  { %s46_s15 = sshll.u32 %s8957_s14, 4  ;;  %p8855_p10 = scmp.ne.s32.totalorder %s9370_s3, %s8854_s18  ;;  %s47_s15 = int_to_ptr.vmem [resolvable:$true] %s46_s15 }
  0x37   :  { %p8858_p11 = scmp.lt.u32.totalorder %s8854_s18, %s9370_s3 }
  0x39   :  { %p8860_p12 = pnand %p8858_p11, %p8855_p10 }
  0x3b   :  { %8863 = shalt.err (!%p8860_p12)
}
  0x3c   :  { %s8864_s2 = scalar_lea.vmem %s47_s15, 8192  ;;  %p8869_p0 = scmp.lt.s32.totalorder %s47_s15, %s47_s15 }
  0x3d   :  { %p8865_p13 = scmp.ne.s32.totalorder %s47_s15, %s8864_s2  ;;  %p8870_p1 = scmp.lt.s32.totalorder %s8864_s2, %s8864_s2 }
  0x3f   :  { %p8871_p2 = por %p8870_p1, %p8869_p0 }
  0x41   :  { %p8872_p3 = pnand %p8871_p2, %p8865_p13 }
  0x43   :  { %8875 = shalt.err (!%p8872_p3)
}
  0x44   :  { %s8958_s1 = smov 128   ;;  %s8959_s23 = smov 8  }
  0x45   :  { %52 = dma.hbm_to_vmem [thread:$0]  %s9370_s3, 8192, %s47_s15, [#allocation6], %s8958_s1, %s8958_s1, %s8959_s23  }
  0x46   :  { %s8960_s26 = smov [#allocation10]   ;;  %s8876_s8 = scalar_lea.hbm %s9372_s5, 2048 }
  0x47   :  { %s68_s28 = sshll.u32 %s8960_s26, 4  ;;  %p8877_p4 = scmp.ne.s32.totalorder %s9372_s5, %s8876_s8  ;;  %s69_s28 = int_to_ptr.vmem [resolvable:$true] %s68_s28 }
  0x48   :  { %p8880_p5 = scmp.lt.u32.totalorder %s8876_s8, %s9372_s5 }
  0x4a   :  { %p8882_p6 = pnand %p8880_p5, %p8877_p4 }
  0x4c   :  { %8885 = shalt.err (!%p8882_p6)
}
  0x4d   :  { %s8886_s27 = scalar_lea.vmem %s69_s28, 2048  ;;  %p8891_p8 = scmp.lt.s32.totalorder %s69_s28, %s69_s28 }
  0x4e   :  { %p8887_p7 = scmp.ne.s32.totalorder %s69_s28, %s8886_s27  ;;  %p8892_p9 = scmp.lt.s32.totalorder %s8886_s27, %s8886_s27 }
  0x50   :  { %p8893_p10 = por %p8892_p9, %p8891_p8 }
  0x52   :  { %p8894_p11 = pnand %p8893_p10, %p8887_p7 }
  0x54   :  { %8897 = shalt.err (!%p8894_p11)
}
  0x55   :  { %s8961_s3 = smov 64   ;;  %s8962_s12 = smov 4  }
  0x56   :  { %74 = dma.hbm_to_vmem [thread:$0]  %s9372_s5, 2048, %s69_s28, [#allocation9], %s8961_s3, %s8961_s3, %s8962_s12  }
  0x57   :  { %s8963_s15 = smov [#allocation11]   ;;  %s8898_s19 = scalar_lea.hbm %s9373_s6, 16 }
  0x58   :  { %s81_s16 = sshll.u32 %s8963_s15, 4  ;;  %p8899_p12 = scmp.ne.s32.totalorder %s9373_s6, %s8898_s19  ;;  %s82_s16 = int_to_ptr.vmem [resolvable:$true] %s81_s16 }
  0x59   :  { %p8902_p13 = scmp.lt.u32.totalorder %s8898_s19, %s9373_s6 }
  0x5b   :  { %p8904_p0 = pnand %p8902_p13, %p8899_p12 }
  0x5d   :  { %8907 = shalt.err (!%p8904_p0)
}
  0x5e   :  { %s8908_s24 = scalar_lea.vmem %s82_s16, 16  ;;  %s8912_s5 = scalar_lea.vmem %s82_s16, 32 }
  0x5f   :  { %p8909_p1 = scmp.ne.s32.totalorder %s82_s16, %s8908_s24  ;;  %p8913_p2 = scmp.lt.s32.totalorder %s82_s16, %s82_s16 }
  0x60   :  { %p8914_p3 = scmp.lt.s32.totalorder %s8912_s5, %s8908_s24 }
  0x62   :  { %p8915_p4 = por %p8914_p3, %p8913_p2 }
  0x64   :  { %p8916_p5 = pnand %p8915_p4, %p8909_p1 }
  0x66   :  { %8919 = shalt.err (!%p8916_p5)
}
  0x67   :  { %84 = dma.hbm_to_vmem [thread:$0]  %s9373_s6, 16, %s82_s16, [#allocation12]  }
  0x68   :  { %8942 = dma.done.wait [#allocation3], 98304  }
  0x69   :  { %8943 = vsyncadd [#allocation3], 4294868992 }
  0x6a   :  { %8944 = dma.done.wait [#allocation6], 8256  }
  0x6b   :  { %8945 = vsyncadd [#allocation6], 4294959040 }
  0x6c   :  { %8946 = dma.done.wait [#allocation9], 2080  }
  0x6d   :  { %8947 = vsyncadd [#allocation9], 4294965216 }
  0x6e   :  { %8948 = dma.done.wait [#allocation12], 16  }
  0x6f   :  { %8949 = vsyncadd [#allocation12], 4294967280  ;;  %v7524_v0 = vld [vmem:[#allocation2 + $0x4] ss:$16 sps:$4 sm:$0xff]   ;;  %v7528_v2 = vld [vmem:[#allocation2] ss:$16 sps:$4 sm:$0xff]  }
  0x70   :  { %v7526_v1 = vld [vmem:[#allocation2 + $0x204] ss:$16 sps:$4 sm:$0xff]   ;;  %4806 = vmatprep.subr.bf16.mxu1 %v7524_v0  ;;  %v7529_v3 = vld [vmem:[#allocation2 + $0x200] ss:$16 sps:$4 sm:$0xff]   ;;  %v105_v46 = vld [vmem:[%s9367_s0 + $0x8] sm:$0xff] }
  0x71   :  { %4849 = vmatprep.subr.bf16.mxu0 %v7526_v1  ;;  %v7530_v4 = vld [vmem:[#allocation2 + $0x24] ss:$16 sps:$4 sm:$0xff]   ;;  %4807 = vmatpush1.bf16.msra.mxu1 %v7528_v2  ;;  %v7534_v6 = vld [vmem:[#allocation2 + $0x20] ss:$16 sps:$4 sm:$0xff]   ;;  %v129_v49 = vld [vmem:[%s9367_s0 + $0xc8] sm:$0xff] }
  0x72   :  { %4850 = vmatpush1.bf16.msra.mxu0 %v7529_v3  ;;  %v7532_v5 = vld [vmem:[#allocation2 + $0x224] ss:$16 sps:$4 sm:$0xff]   ;;  %4808 = vmatprep.subr.bf16.mxu1 %v7530_v4  ;;  %v7535_v7 = vld [vmem:[#allocation2 + $0x220] ss:$16 sps:$4 sm:$0xff]   ;;  %v9086_v50 = vpack.c.bf16 %v129_v49, %v105_v46  ;;  %v107_v51 = vld [vmem:[%s9367_s0 + $0x18] sm:$0xff] }
  0x73   :  { %4851 = vmatprep.subr.bf16.mxu0 %v7532_v5  ;;  %v7536_v8 = vld [vmem:[#allocation2 + $0x44] ss:$16 sps:$4 sm:$0xff]   ;;  %v7540_v10 = vld [vmem:[#allocation2 + $0x40] ss:$16 sps:$4 sm:$0xff]   ;;  %v131_v52 = vld [vmem:[%s9367_s0 + $0xd8] sm:$0xff] }
  0x74   :  { %v7538_v9 = vld [vmem:[#allocation2 + $0x244] ss:$16 sps:$4 sm:$0xff]   ;;  %v7541_v11 = vld [vmem:[#allocation2 + $0x240] ss:$16 sps:$4 sm:$0xff]   ;;  %v9094_v55 = vpack.c.bf16 %v131_v52, %v107_v51  ;;  %4838 = vmatprep.mubr.bf16.mxu1 %v9086_v50  ;;  %v7665_v46 = vld [vmem:[#allocation2 + $0xe8] ss:$16 sps:$4 sm:$0xff]  }
  0x75   :  { %4809 = vmatpush1.bf16.msra.mxu1 %v7534_v6  ;;  %v7542_v12 = vld [vmem:[#allocation2 + $0x64] ss:$16 sps:$4 sm:$0xff]   ;;  %v7546_v14 = vld [vmem:[#allocation2 + $0x60] ss:$16 sps:$4 sm:$0xff]   ;;  %v7679_v52 = vld [vmem:[#allocation2 + $0x12c] ss:$16 sps:$4 sm:$0xff]  }
  0x76   :  { %4852 = vmatpush1.bf16.msra.mxu0 %v7535_v7  ;;  %4810 = vmatprep.subr.bf16.mxu1 %v7536_v8  ;;  %v7544_v13 = vld [vmem:[#allocation2 + $0x264] ss:$16 sps:$4 sm:$0xff]   ;;  %v7547_v15 = vld [vmem:[#allocation2 + $0x260] ss:$16 sps:$4 sm:$0xff]  }
  0x77   :  { %4853 = vmatprep.subr.bf16.mxu0 %v7538_v9  ;;  %v7548_v16 = vld [vmem:[#allocation2 + $0x84] ss:$16 sps:$4 sm:$0xff]   ;;  %v7552_v18 = vld [vmem:[#allocation2 + $0x80] ss:$16 sps:$4 sm:$0xff]   ;;  %4881 = vmatprep.mubr.bf16.mxu0 %v9094_v55 }
  0x78   :  { %v7550_v17 = vld [vmem:[#allocation2 + $0x284] ss:$16 sps:$4 sm:$0xff]   ;;  %v7553_v19 = vld [vmem:[#allocation2 + $0x280] ss:$16 sps:$4 sm:$0xff]  }
  0x79   :  { %4811 = vmatpush1.bf16.msra.mxu1 %v7540_v10  ;;  %v7554_v20 = vld [vmem:[#allocation2 + $0xa4] ss:$16 sps:$4 sm:$0xff]   ;;  %v7558_v22 = vld [vmem:[#allocation2 + $0xa0] ss:$16 sps:$4 sm:$0xff]  }
  0x7a   :  { %4854 = vmatpush1.bf16.msra.mxu0 %v7541_v11  ;;  %4812 = vmatprep.subr.bf16.mxu1 %v7542_v12  ;;  %v7556_v21 = vld [vmem:[#allocation2 + $0x2a4] ss:$16 sps:$4 sm:$0xff]   ;;  %v7559_v23 = vld [vmem:[#allocation2 + $0x2a0] ss:$16 sps:$4 sm:$0xff]   ;;  %v7625_v11 = vld [vmem:[#allocation2 + $0xc] ss:$16 sps:$4 sm:$0xff]  }
  0x7b   :  { %4855 = vmatprep.subr.bf16.mxu0 %v7544_v13  ;;  %v7560_v24 = vld [vmem:[#allocation2 + $0xc4] ss:$16 sps:$4 sm:$0xff]   ;;  %v7564_v26 = vld [vmem:[#allocation2 + $0xc0] ss:$16 sps:$4 sm:$0xff]  }
  0x7c   :  { %v7562_v25 = vld [vmem:[#allocation2 + $0x2c4] ss:$16 sps:$4 sm:$0xff]   ;;  %v7565_v27 = vld [vmem:[#allocation2 + $0x2c0] ss:$16 sps:$4 sm:$0xff]  }
  0x7d   :  { %4813 = vmatpush1.bf16.msra.mxu1 %v7546_v14  ;;  %v7566_v28 = vld [vmem:[#allocation2 + $0xe4] ss:$16 sps:$4 sm:$0xff]   ;;  %v7570_v30 = vld [vmem:[#allocation2 + $0xe0] ss:$16 sps:$4 sm:$0xff]   ;;  %v7623_v14 = vld [vmem:[#allocation2 + $0x8] ss:$16 sps:$4 sm:$0xff]  }
  0x7e   :  { %4856 = vmatpush1.bf16.msra.mxu0 %v7547_v15  ;;  %4814 = vmatprep.subr.bf16.mxu1 %v7548_v16  ;;  %v7568_v29 = vld [vmem:[#allocation2 + $0x2e4] ss:$16 sps:$4 sm:$0xff]   ;;  %v7571_v31 = vld [vmem:[#allocation2 + $0x2e0] ss:$16 sps:$4 sm:$0xff]  }
  0x7f   :  { %4857 = vmatprep.subr.bf16.mxu0 %v7550_v17  ;;  %v7572_v32 = vld [vmem:[#allocation2 + $0x104] ss:$16 sps:$4 sm:$0xff]   ;;  %v7576_v34 = vld [vmem:[#allocation2 + $0x100] ss:$16 sps:$4 sm:$0xff]   ;;  %v7631_v17 = vld [vmem:[#allocation2 + $0x2c] ss:$16 sps:$4 sm:$0xff]  }
  0x80   :  { %v7574_v33 = vld [vmem:[#allocation2 + $0x304] ss:$16 sps:$4 sm:$0xff]   ;;  %v7577_v35 = vld [vmem:[#allocation2 + $0x300] ss:$16 sps:$4 sm:$0xff]  }
  0x81   :  { %4815 = vmatpush1.bf16.msra.mxu1 %v7552_v18  ;;  %v7578_v36 = vld [vmem:[#allocation2 + $0x124] ss:$16 sps:$4 sm:$0xff]   ;;  %v7582_v38 = vld [vmem:[#allocation2 + $0x120] ss:$16 sps:$4 sm:$0xff]  }
  0x82   :  { %4858 = vmatpush1.bf16.msra.mxu0 %v7553_v19  ;;  %4816 = vmatprep.subr.bf16.mxu1 %v7554_v20  ;;  %v7580_v37 = vld [vmem:[#allocation2 + $0x324] ss:$16 sps:$4 sm:$0xff]   ;;  %v7583_v39 = vld [vmem:[#allocation2 + $0x320] ss:$16 sps:$4 sm:$0xff]   ;;  %v7629_v19 = vld [vmem:[#allocation2 + $0x28] ss:$16 sps:$4 sm:$0xff]  }
  0x83   :  { %4859 = vmatprep.subr.bf16.mxu0 %v7556_v21  ;;  %v7584_v40 = vld [vmem:[#allocation2 + $0x144] ss:$16 sps:$4 sm:$0xff]   ;;  %v7588_v42 = vld [vmem:[#allocation2 + $0x140] ss:$16 sps:$4 sm:$0xff]   ;;  %v7637_v21 = vld [vmem:[#allocation2 + $0x4c] ss:$16 sps:$4 sm:$0xff]  }
  0x84   :  { %v7586_v41 = vld [vmem:[#allocation2 + $0x344] ss:$16 sps:$4 sm:$0xff]   ;;  %v7589_v43 = vld [vmem:[#allocation2 + $0x340] ss:$16 sps:$4 sm:$0xff]  }
  0x85   :  { %4817 = vmatpush1.bf16.msra.mxu1 %v7558_v22  ;;  %v7590_v44 = vld [vmem:[#allocation2 + $0x164] ss:$16 sps:$4 sm:$0xff]   ;;  %v7594_v47 = vld [vmem:[#allocation2 + $0x160] ss:$16 sps:$4 sm:$0xff]  }
  0x86   :  { %4860 = vmatpush1.bf16.msra.mxu0 %v7559_v23  ;;  %4818 = vmatprep.subr.bf16.mxu1 %v7560_v24  ;;  %v7592_v45 = vld [vmem:[#allocation2 + $0x364] ss:$16 sps:$4 sm:$0xff]   ;;  %v7595_v48 = vld [vmem:[#allocation2 + $0x360] ss:$16 sps:$4 sm:$0xff]   ;;  %v7635_v23 = vld [vmem:[#allocation2 + $0x48] ss:$16 sps:$4 sm:$0xff]  }
  0x87   :  { %4861 = vmatprep.subr.bf16.mxu0 %v7562_v25  ;;  %v7596_v53 = vld [vmem:[#allocation2 + $0x184] ss:$16 sps:$4 sm:$0xff]   ;;  %v7600_v56 = vld [vmem:[#allocation2 + $0x180] ss:$16 sps:$4 sm:$0xff]   ;;  %v7643_v25 = vld [vmem:[#allocation2 + $0x6c] ss:$16 sps:$4 sm:$0xff]  }
  0x88   :  { %v7598_v54 = vld [vmem:[#allocation2 + $0x384] ss:$16 sps:$4 sm:$0xff]   ;;  %v7601_v57 = vld [vmem:[#allocation2 + $0x380] ss:$16 sps:$4 sm:$0xff]  }
  0x89   :  { %4819 = vmatpush1.bf16.msra.mxu1 %v7564_v26  ;;  %v7602_v58 = vld [vmem:[#allocation2 + $0x1a4] ss:$16 sps:$4 sm:$0xff]   ;;  %v7606_v60 = vld [vmem:[#allocation2 + $0x1a0] ss:$16 sps:$4 sm:$0xff]  }
  0x8a   :  { %4862 = vmatpush1.bf16.msra.mxu0 %v7565_v27  ;;  %4820 = vmatprep.subr.bf16.mxu1 %v7566_v28  ;;  %v7604_v59 = vld [vmem:[#allocation2 + $0x3a4] ss:$16 sps:$4 sm:$0xff]   ;;  %v7607_v61 = vld [vmem:[#allocation2 + $0x3a0] ss:$16 sps:$4 sm:$0xff]   ;;  %v7641_v27 = vld [vmem:[#allocation2 + $0x68] ss:$16 sps:$4 sm:$0xff]  }
  0x8b   :  { %4863 = vmatprep.subr.bf16.mxu0 %v7568_v29  ;;  %v7608_v62 = vld [vmem:[#allocation2 + $0x1c4] ss:$16 sps:$4 sm:$0xff]   ;;  %v7612_v0 = vld [vmem:[#allocation2 + $0x1c0] ss:$16 sps:$4 sm:$0xff]   ;;  %v7649_v29 = vld [vmem:[#allocation2 + $0x8c] ss:$16 sps:$4 sm:$0xff]  }
  0x8c   :  { %v7610_v63 = vld [vmem:[#allocation2 + $0x3c4] ss:$16 sps:$4 sm:$0xff]   ;;  %v7613_v1 = vld [vmem:[#allocation2 + $0x3c0] ss:$16 sps:$4 sm:$0xff]  }
  0x8d   :  { %4821 = vmatpush1.bf16.msra.mxu1 %v7570_v30  ;;  %v7614_v2 = vld [vmem:[#allocation2 + $0x1e4] ss:$16 sps:$4 sm:$0xff]   ;;  %v7618_v4 = vld [vmem:[#allocation2 + $0x1e0] ss:$16 sps:$4 sm:$0xff]  }
  0x8e   :  { %4864 = vmatpush1.bf16.msra.mxu0 %v7571_v31  ;;  %4822 = vmatprep.subr.bf16.mxu1 %v7572_v32  ;;  %v7616_v3 = vld [vmem:[#allocation2 + $0x3e4] ss:$16 sps:$4 sm:$0xff]   ;;  %v7619_v5 = vld [vmem:[#allocation2 + $0x3e0] ss:$16 sps:$4 sm:$0xff]   ;;  %v7647_v31 = vld [vmem:[#allocation2 + $0x88] ss:$16 sps:$4 sm:$0xff]  }
  0x8f   :  { %4865 = vmatprep.subr.bf16.mxu0 %v7574_v33  ;;  %v104_v6 = vld [vmem:[%s9367_s0] sm:$0xff]  ;;  %v106_v9 = vld [vmem:[%s9367_s0 + $0x10] sm:$0xff]  ;;  %v7655_v33 = vld [vmem:[#allocation2 + $0xac] ss:$16 sps:$4 sm:$0xff]  }
  0x90   :  { %v128_v7 = vld [vmem:[%s9367_s0 + $0xc0] sm:$0xff]  ;;  %v130_v10 = vld [vmem:[%s9367_s0 + $0xd0] sm:$0xff] }
  0x91   :  { %4823 = vmatpush1.bf16.msra.mxu1 %v7576_v34  ;;  %v7622_v8 = vld [vmem:[#allocation2 + $0x404] ss:$16 sps:$4 sm:$0xff]   ;;  %v9110_v12 = vpack.c.bf16 %v128_v7, %v104_v6  ;;  %v7620_v13 = vld [vmem:[#allocation2 + $0x400] ss:$16 sps:$4 sm:$0xff]   ;;  %v9112_v15 = vpack.c.bf16 %v130_v10, %v106_v9  ;;  %v7701_v7 = vld [vmem:[#allocation2 + $0x1a8] ss:$16 sps:$4 sm:$0xff]  }
  0x92   :  { %4866 = vmatpush1.bf16.msra.mxu0 %v7577_v35  ;;  %4824 = vmatprep.subr.bf16.mxu1 %v7578_v36  ;;  %v7628_v16 = vld [vmem:[#allocation2 + $0x424] ss:$16 sps:$4 sm:$0xff]   ;;  %v7626_v18 = vld [vmem:[#allocation2 + $0x420] ss:$16 sps:$4 sm:$0xff]   ;;  %v7653_v35 = vld [vmem:[#allocation2 + $0xa8] ss:$16 sps:$4 sm:$0xff]  }
  0x93   :  { %4867 = vmatprep.subr.bf16.mxu0 %v7580_v37  ;;  %v7634_v20 = vld [vmem:[#allocation2 + $0x444] ss:$16 sps:$4 sm:$0xff]   ;;  %v7632_v22 = vld [vmem:[#allocation2 + $0x440] ss:$16 sps:$4 sm:$0xff]   ;;  %v7661_v37 = vld [vmem:[#allocation2 + $0xcc] ss:$16 sps:$4 sm:$0xff]  }
  0x94   :  { %v7640_v24 = vld [vmem:[#allocation2 + $0x464] ss:$16 sps:$4 sm:$0xff]   ;;  %v7638_v26 = vld [vmem:[#allocation2 + $0x460] ss:$16 sps:$4 sm:$0xff]   ;;  %v7709_v9 = vld [vmem:[#allocation2 + $0x1cc] ss:$16 sps:$4 sm:$0xff]  }
  0x95   :  { %4825 = vmatpush1.bf16.msra.mxu1 %v7582_v38  ;;  %v7646_v28 = vld [vmem:[#allocation2 + $0x484] ss:$16 sps:$4 sm:$0xff]   ;;  %v7644_v30 = vld [vmem:[#allocation2 + $0x480] ss:$16 sps:$4 sm:$0xff]  }
  0x96   :  { %4868 = vmatpush1.bf16.msra.mxu0 %v7583_v39  ;;  %4826 = vmatprep.subr.bf16.mxu1 %v7584_v40  ;;  %v7652_v32 = vld [vmem:[#allocation2 + $0x4a4] ss:$16 sps:$4 sm:$0xff]   ;;  %v7650_v34 = vld [vmem:[#allocation2 + $0x4a0] ss:$16 sps:$4 sm:$0xff]   ;;  %v7659_v39 = vld [vmem:[#allocation2 + $0xc8] ss:$16 sps:$4 sm:$0xff]  }
  0x97   :  { %4869 = vmatprep.subr.bf16.mxu0 %v7586_v41  ;;  %v7658_v36 = vld [vmem:[#allocation2 + $0x4c4] ss:$16 sps:$4 sm:$0xff]   ;;  %v7656_v38 = vld [vmem:[#allocation2 + $0x4c0] ss:$16 sps:$4 sm:$0xff]   ;;  %v109_v40 = vld [vmem:[%s9367_s0 + $0x28] sm:$0xff] }
  0x98   :  { %v133_v41 = vld [vmem:[%s9367_s0 + $0xe8] sm:$0xff]  ;;  %v7668_v49 = vld [vmem:[#allocation2 + $0x500] ss:$16 sps:$4 sm:$0xff]   ;;  %v7676_v51 = vld [vmem:[#allocation2 + $0x524] ss:$16 sps:$4 sm:$0xff]  }
  0x99   :  { %4827 = vmatpush1.bf16.msra.mxu1 %v7588_v42  ;;  %v7664_v42 = vld [vmem:[#allocation2 + $0x4e4] ss:$16 sps:$4 sm:$0xff]   ;;  %v7698_v6 = vld [vmem:[#allocation2 + $0x5a0] ss:$16 sps:$4 sm:$0xff]  }
  0x9a   :  { %4870 = vmatpush1.bf16.msra.mxu0 %v7589_v43  ;;  %4828 = vmatprep.subr.bf16.mxu1 %v7590_v44  ;;  %v7667_v43 = vld [vmem:[#allocation2 + $0xec] ss:$16 sps:$4 sm:$0xff]   ;;  %v9123_v44 = vpack.c.bf16 %v133_v41, %v109_v40  ;;  %v7704_v10 = vld [vmem:[#allocation2 + $0x5c0] ss:$16 sps:$4 sm:$0xff]  }
  0x9b   :  { %4871 = vmatprep.subr.bf16.mxu0 %v7592_v45  ;;  %v7662_v45 = vld [vmem:[#allocation2 + $0x4e0] ss:$16 sps:$4 sm:$0xff]   ;;  %v7745_v40 = vld [vmem:[#allocation2 + $0x28c] ss:$16 sps:$4 sm:$0xff]  }
  0x9c   :  { %v7740_v41 = vld [vmem:[#allocation2 + $0x680] ss:$16 sps:$4 sm:$0xff]  }
  0x9d   :  { %4829 = vmatpush1.bf16.msra.mxu1 %v7594_v47  ;;  %v7670_v47 = vld [vmem:[#allocation2 + $0x504] ss:$16 sps:$4 sm:$0xff]  }
  0x9e   :  { %4872 = vmatpush1.bf16.msra.mxu0 %v7595_v48  ;;  %4830 = vmatprep.subr.bf16.mxu1 %v7596_v53  ;;  %v7673_v48 = vld [vmem:[#allocation2 + $0x10c] ss:$16 sps:$4 sm:$0xff]   ;;  %v7674_v53 = vld [vmem:[#allocation2 + $0x520] ss:$16 sps:$4 sm:$0xff]  }
  0x9f   :  { %4873 = vmatprep.subr.bf16.mxu0 %v7598_v54  ;;  %v7677_v54 = vld [vmem:[#allocation2 + $0x128] ss:$16 sps:$4 sm:$0xff]  }
  0xa1   :  { %4831 = vmatpush1.bf16.msra.mxu1 %v7600_v56  ;;  %v7682_v56 = vld [vmem:[#allocation2 + $0x544] ss:$16 sps:$4 sm:$0xff]  }
  0xa2   :  { %4874 = vmatpush1.bf16.msra.mxu0 %v7601_v57  ;;  %4832 = vmatprep.subr.bf16.mxu1 %v7602_v58  ;;  %v7685_v57 = vld [vmem:[#allocation2 + $0x14c] ss:$16 sps:$4 sm:$0xff]   ;;  %v7680_v58 = vld [vmem:[#allocation2 + $0x540] ss:$16 sps:$4 sm:$0xff]  }
  0xa3   :  { %4875 = vmatprep.subr.bf16.mxu0 %v7604_v59  ;;  %v7683_v59 = vld [vmem:[#allocation2 + $0x148] ss:$16 sps:$4 sm:$0xff]  }
  0xa5   :  { %4833 = vmatpush1.bf16.msra.mxu1 %v7606_v60  ;;  %v7688_v60 = vld [vmem:[#allocation2 + $0x564] ss:$16 sps:$4 sm:$0xff]  }
  0xa6   :  { %4876 = vmatpush1.bf16.msra.mxu0 %v7607_v61  ;;  %4834 = vmatprep.subr.bf16.mxu1 %v7608_v62  ;;  %v7691_v61 = vld [vmem:[#allocation2 + $0x16c] ss:$16 sps:$4 sm:$0xff]   ;;  %v7686_v62 = vld [vmem:[#allocation2 + $0x560] ss:$16 sps:$4 sm:$0xff]  }
  0xa7   :  { %4877 = vmatprep.subr.bf16.mxu0 %v7610_v63  ;;  %v7689_v63 = vld [vmem:[#allocation2 + $0x168] ss:$16 sps:$4 sm:$0xff]  }
  0xa9   :  { %4835 = vmatpush1.bf16.msra.mxu1 %v7612_v0  ;;  %v7694_v0 = vld [vmem:[#allocation2 + $0x584] ss:$16 sps:$4 sm:$0xff]  }
  0xaa   :  { %4878 = vmatpush1.bf16.msra.mxu0 %v7613_v1  ;;  %4836 = vmatprep.subr.bf16.mxu1 %v7614_v2  ;;  %v7697_v1 = vld [vmem:[#allocation2 + $0x18c] ss:$16 sps:$4 sm:$0xff]   ;;  %v7692_v2 = vld [vmem:[#allocation2 + $0x580] ss:$16 sps:$4 sm:$0xff]  }
  0xab   :  { %4879 = vmatprep.subr.bf16.mxu0 %v7616_v3  ;;  %v7695_v3 = vld [vmem:[#allocation2 + $0x188] ss:$16 sps:$4 sm:$0xff]  }
  0xad   :  { %4837 = vmatpush1.bf16.msra.mxu1 %v7618_v4  ;;  %v7700_v4 = vld [vmem:[#allocation2 + $0x5a4] ss:$16 sps:$4 sm:$0xff]  }
  0xae   :  { %4880 = vmatpush1.bf16.msra.mxu0 %v7619_v5  ;;  %5322 = vmatprep.subr.bf16.mxu1 %v7625_v11  ;;  %v7703_v5 = vld [vmem:[#allocation2 + $0x1ac] ss:$16 sps:$4 sm:$0xff]   ;;  %v7707_v11 = vld [vmem:[#allocation2 + $0x1c8] ss:$16 sps:$4 sm:$0xff]  }
  0xaf   :  { %4892 = vmatprep.subr.bf16.mxu0 %v7622_v8  ;;  %v7706_v8 = vld [vmem:[#allocation2 + $0x5c4] ss:$16 sps:$4 sm:$0xff]  }
  0xb0   :  { %4839 = vmatmul.mubr.bf16.vlgmr.msra.gmra.mrb[0].mxu1 %v9110_v12 }
  0xb1   :  { %4882 = vmatmul.mubr.bf16.vlgmr.msra.gmra.mrb[0].mxu0 %v9112_v15  ;;  %5323 = vmatpush1.bf16.msra.mxu1 %v7623_v14  ;;  %v7715_v14 = vld [vmem:[#allocation2 + $0x1ec] ss:$16 sps:$4 sm:$0xff]  }
  0xb2   :  { %4893 = vmatpush1.bf16.msra.mxu0 %v7620_v13  ;;  %5324 = vmatprep.subr.bf16.mxu1 %v7631_v17  ;;  %v7712_v13 = vld [vmem:[#allocation2 + $0x5e4] ss:$16 sps:$4 sm:$0xff]   ;;  %v7713_v17 = vld [vmem:[#allocation2 + $0x1e8] ss:$16 sps:$4 sm:$0xff]  }
  0xb3   :  { %4894 = vmatprep.subr.bf16.mxu0 %v7628_v16  ;;  %5354 = vmatprep.mubr.bf16.mxu1 %v9086_v50  ;;  %v7671_v50 = vld [vmem:[#allocation2 + $0x108] ss:$16 sps:$4 sm:$0xff]   ;;  %v7710_v16 = vld [vmem:[#allocation2 + $0x5e0] ss:$16 sps:$4 sm:$0xff]  }
  0xb4   :  { %4924 = vmatprep.mubr.bf16.mxu0 %v9123_v44 }
  0xb5   :  { %5325 = vmatpush1.bf16.msra.mxu1 %v7629_v19  ;;  %v108_v19 = vld [vmem:[%s9367_s0 + $0x20] sm:$0xff] }
  0xb6   :  { %4895 = vmatpush1.bf16.msra.mxu0 %v7626_v18  ;;  %5326 = vmatprep.subr.bf16.mxu1 %v7637_v21  ;;  %v7718_v18 = vld [vmem:[#allocation2 + $0x604] ss:$16 sps:$4 sm:$0xff]   ;;  %v7721_v21 = vld [vmem:[#allocation2 + $0x20c] ss:$16 sps:$4 sm:$0xff]  }
  0xb7   :  { %4896 = vmatprep.subr.bf16.mxu0 %v7634_v20  ;;  %v132_v20 = vld [vmem:[%s9367_s0 + $0xe0] sm:$0xff] }
  0xb9   :  { %5327 = vmatpush1.bf16.msra.mxu1 %v7635_v23  ;;  %v7719_v23 = vld [vmem:[#allocation2 + $0x208] ss:$16 sps:$4 sm:$0xff]  }
  0xba   :  { %4897 = vmatpush1.bf16.msra.mxu0 %v7632_v22  ;;  %5328 = vmatprep.subr.bf16.mxu1 %v7643_v25  ;;  %v7716_v22 = vld [vmem:[#allocation2 + $0x600] ss:$16 sps:$4 sm:$0xff]   ;;  %v7724_v25 = vld [vmem:[#allocation2 + $0x624] ss:$16 sps:$4 sm:$0xff]  }
  0xbb   :  { %4898 = vmatprep.subr.bf16.mxu0 %v7640_v24  ;;  %v9132_v24 = vpack.c.bf16 %v132_v20, %v108_v19  ;;  %v7805_v19 = vld [vmem:[#allocation2 + $0x3cc] ss:$16 sps:$4 sm:$0xff]   ;;  %v7800_v20 = vld [vmem:[#allocation2 + $0x7c0] ss:$16 sps:$4 sm:$0xff]  }
  0xbd   :  { %5329 = vmatpush1.bf16.msra.mxu1 %v7641_v27  ;;  %v7722_v27 = vld [vmem:[#allocation2 + $0x620] ss:$16 sps:$4 sm:$0xff]  }
  0xbe   :  { %4899 = vmatpush1.bf16.msra.mxu0 %v7638_v26  ;;  %5330 = vmatprep.subr.bf16.mxu1 %v7649_v29  ;;  %v7727_v26 = vld [vmem:[#allocation2 + $0x22c] ss:$16 sps:$4 sm:$0xff]  }
  0xbf   :  { %4900 = vmatprep.subr.bf16.mxu0 %v7646_v28  ;;  %v7725_v28 = vld [vmem:[#allocation2 + $0x228] ss:$16 sps:$4 sm:$0xff]  }
  0xc0   :  { %v111_v29 = vld [vmem:[%s9367_s0 + $0x38] sm:$0xff] }
  0xc1   :  { %5331 = vmatpush1.bf16.msra.mxu1 %v7647_v31  ;;  %v7730_v31 = vld [vmem:[#allocation2 + $0x644] ss:$16 sps:$4 sm:$0xff]  }
  0xc2   :  { %4901 = vmatpush1.bf16.msra.mxu0 %v7644_v30  ;;  %5332 = vmatprep.subr.bf16.mxu1 %v7655_v33  ;;  %v135_v30 = vld [vmem:[%s9367_s0 + $0xf8] sm:$0xff] }
  0xc3   :  { %4902 = vmatprep.subr.bf16.mxu0 %v7652_v32  ;;  %v7733_v32 = vld [vmem:[#allocation2 + $0x24c] ss:$16 sps:$4 sm:$0xff]   ;;  %v9142_v33 = vpack.c.bf16 %v135_v30, %v111_v29  ;;  %v134_v29 = vld [vmem:[%s9367_s0 + $0xf0] sm:$0xff] }
  0xc4   :  { %v7817_v30 = vld [vmem:[#allocation2 + $0x40c] ss:$16 sps:$4 sm:$0xff]  }
  0xc5   :  { %5333 = vmatpush1.bf16.msra.mxu1 %v7653_v35  ;;  %v7736_v35 = vld [vmem:[#allocation2 + $0x664] ss:$16 sps:$4 sm:$0xff]  }
  0xc6   :  { %4903 = vmatpush1.bf16.msra.mxu0 %v7650_v34  ;;  %5334 = vmatprep.subr.bf16.mxu1 %v7661_v37  ;;  %v7731_v34 = vld [vmem:[#allocation2 + $0x248] ss:$16 sps:$4 sm:$0xff]   ;;  %v7734_v37 = vld [vmem:[#allocation2 + $0x660] ss:$16 sps:$4 sm:$0xff]  }
  0xc7   :  { %4904 = vmatprep.subr.bf16.mxu0 %v7658_v36  ;;  %v7739_v36 = vld [vmem:[#allocation2 + $0x26c] ss:$16 sps:$4 sm:$0xff]  }
  0xc9   :  { %5335 = vmatpush1.bf16.msra.mxu1 %v7659_v39  ;;  %v7742_v39 = vld [vmem:[#allocation2 + $0x684] ss:$16 sps:$4 sm:$0xff]  }
  0xca   :  { %4905 = vmatpush1.bf16.msra.mxu0 %v7656_v38  ;;  %5336 = vmatprep.subr.bf16.mxu1 %v7667_v43  ;;  %v7737_v38 = vld [vmem:[#allocation2 + $0x268] ss:$16 sps:$4 sm:$0xff]   ;;  %v7751_v43 = vld [vmem:[#allocation2 + $0x2ac] ss:$16 sps:$4 sm:$0xff]  }
  0xcb   :  { %4906 = vmatprep.subr.bf16.mxu0 %v7664_v42  ;;  %v7748_v42 = vld [vmem:[#allocation2 + $0x6a4] ss:$16 sps:$4 sm:$0xff]  }
  0xcd   :  { %5337 = vmatpush1.bf16.msra.mxu1 %v7665_v46  ;;  %v7749_v46 = vld [vmem:[#allocation2 + $0x2a8] ss:$16 sps:$4 sm:$0xff]  }
  0xce   :  { %4907 = vmatpush1.bf16.msra.mxu0 %v7662_v45  ;;  %5338 = vmatprep.subr.bf16.mxu1 %v7673_v48  ;;  %v7746_v45 = vld [vmem:[#allocation2 + $0x6a0] ss:$16 sps:$4 sm:$0xff]   ;;  %v7757_v48 = vld [vmem:[#allocation2 + $0x2cc] ss:$16 sps:$4 sm:$0xff]  }
  0xcf   :  { %4908 = vmatprep.subr.bf16.mxu0 %v7670_v47  ;;  %v7754_v47 = vld [vmem:[#allocation2 + $0x6c4] ss:$16 sps:$4 sm:$0xff]  }
  0xd1   :  { %5339 = vmatpush1.bf16.msra.mxu1 %v7671_v50  ;;  %v7755_v50 = vld [vmem:[#allocation2 + $0x2c8] ss:$16 sps:$4 sm:$0xff]  }
  0xd2   :  { %4909 = vmatpush1.bf16.msra.mxu0 %v7668_v49  ;;  %5340 = vmatprep.subr.bf16.mxu1 %v7679_v52  ;;  %v7752_v49 = vld [vmem:[#allocation2 + $0x6c0] ss:$16 sps:$4 sm:$0xff]   ;;  %v7763_v52 = vld [vmem:[#allocation2 + $0x2ec] ss:$16 sps:$4 sm:$0xff]  }
  0xd3   :  { %4910 = vmatprep.subr.bf16.mxu0 %v7676_v51  ;;  %v7760_v51 = vld [vmem:[#allocation2 + $0x6e4] ss:$16 sps:$4 sm:$0xff]  }
  0xd5   :  { %5341 = vmatpush1.bf16.msra.mxu1 %v7677_v54  ;;  %v7761_v54 = vld [vmem:[#allocation2 + $0x2e8] ss:$16 sps:$4 sm:$0xff]  }
  0xd6   :  { %4911 = vmatpush1.bf16.msra.mxu0 %v7674_v53  ;;  %5342 = vmatprep.subr.bf16.mxu1 %v7685_v57  ;;  %v7758_v53 = vld [vmem:[#allocation2 + $0x6e0] ss:$16 sps:$4 sm:$0xff]   ;;  %v7769_v57 = vld [vmem:[#allocation2 + $0x30c] ss:$16 sps:$4 sm:$0xff]  }
  0xd7   :  { %4912 = vmatprep.subr.bf16.mxu0 %v7682_v56  ;;  %v7766_v56 = vld [vmem:[#allocation2 + $0x704] ss:$16 sps:$4 sm:$0xff]  }
  0xd9   :  { %5343 = vmatpush1.bf16.msra.mxu1 %v7683_v59  ;;  %v7767_v59 = vld [vmem:[#allocation2 + $0x308] ss:$16 sps:$4 sm:$0xff]  }
  0xda   :  { %4913 = vmatpush1.bf16.msra.mxu0 %v7680_v58  ;;  %5344 = vmatprep.subr.bf16.mxu1 %v7691_v61  ;;  %v7764_v58 = vld [vmem:[#allocation2 + $0x700] ss:$16 sps:$4 sm:$0xff]   ;;  %v7775_v61 = vld [vmem:[#allocation2 + $0x32c] ss:$16 sps:$4 sm:$0xff]  }
  0xdb   :  { %4914 = vmatprep.subr.bf16.mxu0 %v7688_v60  ;;  %v7772_v60 = vld [vmem:[#allocation2 + $0x724] ss:$16 sps:$4 sm:$0xff]  }
  0xdd   :  { %5345 = vmatpush1.bf16.msra.mxu1 %v7689_v63  ;;  %v7773_v63 = vld [vmem:[#allocation2 + $0x328] ss:$16 sps:$4 sm:$0xff]  }
  0xde   :  { %4915 = vmatpush1.bf16.msra.mxu0 %v7686_v62  ;;  %5346 = vmatprep.subr.bf16.mxu1 %v7697_v1  ;;  %v7770_v62 = vld [vmem:[#allocation2 + $0x720] ss:$16 sps:$4 sm:$0xff]   ;;  %v7781_v1 = vld [vmem:[#allocation2 + $0x34c] ss:$16 sps:$4 sm:$0xff]  }
  0xdf   :  { %4916 = vmatprep.subr.bf16.mxu0 %v7694_v0  ;;  %v7778_v0 = vld [vmem:[#allocation2 + $0x744] ss:$16 sps:$4 sm:$0xff]  }
  0xe1   :  { %5347 = vmatpush1.bf16.msra.mxu1 %v7695_v3  ;;  %v7779_v3 = vld [vmem:[#allocation2 + $0x348] ss:$16 sps:$4 sm:$0xff]  }
  0xe2   :  { %4917 = vmatpush1.bf16.msra.mxu0 %v7692_v2  ;;  %5348 = vmatprep.subr.bf16.mxu1 %v7703_v5  ;;  %v7776_v2 = vld [vmem:[#allocation2 + $0x740] ss:$16 sps:$4 sm:$0xff]   ;;  %v7787_v5 = vld [vmem:[#allocation2 + $0x36c] ss:$16 sps:$4 sm:$0xff]  }
  0xe3   :  { %4918 = vmatprep.subr.bf16.mxu0 %v7700_v4  ;;  %v7784_v4 = vld [vmem:[#allocation2 + $0x764] ss:$16 sps:$4 sm:$0xff]  }
  0xe5   :  { %5349 = vmatpush1.bf16.msra.mxu1 %v7701_v7  ;;  %v7785_v7 = vld [vmem:[#allocation2 + $0x368] ss:$16 sps:$4 sm:$0xff]  }
  0xe6   :  { %4919 = vmatpush1.bf16.msra.mxu0 %v7698_v6  ;;  %5350 = vmatprep.subr.bf16.mxu1 %v7709_v9  ;;  %v7782_v6 = vld [vmem:[#allocation2 + $0x760] ss:$16 sps:$4 sm:$0xff]   ;;  %v7793_v9 = vld [vmem:[#allocation2 + $0x38c] ss:$16 sps:$4 sm:$0xff]  }
  0xe7   :  { %4920 = vmatprep.subr.bf16.mxu0 %v7706_v8  ;;  %v7790_v8 = vld [vmem:[#allocation2 + $0x784] ss:$16 sps:$4 sm:$0xff]  }
  0xe9   :  { %5351 = vmatpush1.bf16.msra.mxu1 %v7707_v11  ;;  %v7791_v11 = vld [vmem:[#allocation2 + $0x388] ss:$16 sps:$4 sm:$0xff]  }
  0xea   :  { %4921 = vmatpush1.bf16.msra.mxu0 %v7704_v10  ;;  %5352 = vmatprep.subr.bf16.mxu1 %v7715_v14  ;;  %v7788_v10 = vld [vmem:[#allocation2 + $0x780] ss:$16 sps:$4 sm:$0xff]   ;;  %v7799_v14 = vld [vmem:[#allocation2 + $0x3ac] ss:$16 sps:$4 sm:$0xff]  }
  0xeb   :  { %4922 = vmatprep.subr.bf16.mxu0 %v7712_v13  ;;  %v7796_v13 = vld [vmem:[#allocation2 + $0x7a4] ss:$16 sps:$4 sm:$0xff]  }
  0xed   :  { %5353 = vmatpush1.bf16.msra.mxu1 %v7713_v17  ;;  %v7797_v17 = vld [vmem:[#allocation2 + $0x3a8] ss:$16 sps:$4 sm:$0xff]  }
  0xee   :  { %4923 = vmatpush1.bf16.msra.mxu0 %v7710_v16  ;;  %5365 = vmatprep.subr.bf16.mxu1 %v7721_v21  ;;  %v7794_v16 = vld [vmem:[#allocation2 + $0x7a0] ss:$16 sps:$4 sm:$0xff]   ;;  %v7803_v21 = vld [vmem:[#allocation2 + $0x3c8] ss:$16 sps:$4 sm:$0xff]  }
  0xef   :  { %4935 = vmatprep.subr.bf16.mxu0 %v7718_v18  ;;  %v7802_v18 = vld [vmem:[#allocation2 + $0x7c4] ss:$16 sps:$4 sm:$0xff]  }
  0xf0   :  { %5355 = vmatmul.mubr.bf16.vlgmr.msra.gmra.mrb[4].mxu1 %v9110_v12  ;;  %v7728_v12 = vld [vmem:[#allocation2 + $0x640] ss:$16 sps:$4 sm:$0xff]  }
  0xf1   :  { %4925 = vmatmul.mubr.bf16.vlgmr.msra.gmra.mrb[0].mxu0 %v9132_v24  ;;  %5366 = vmatpush1.bf16.msra.mxu1 %v7719_v23  ;;  %v7811_v23 = vld [vmem:[#allocation2 + $0x3ec] ss:$16 sps:$4 sm:$0xff]  }
  0xf2   :  { %4936 = vmatpush1.bf16.msra.mxu0 %v7716_v22  ;;  %5367 = vmatprep.subr.bf16.mxu1 %v7727_v26  ;;  %v7808_v22 = vld [vmem:[#allocation2 + $0x7e4] ss:$16 sps:$4 sm:$0xff]   ;;  %v7809_v26 = vld [vmem:[#allocation2 + $0x3e8] ss:$16 sps:$4 sm:$0xff]  }
  0xf3   :  { %4937 = vmatprep.subr.bf16.mxu0 %v7724_v25  ;;  %5397 = vmatprep.mubr.bf16.mxu1 %v9094_v55  ;;  %v7743_v55 = vld [vmem:[#allocation2 + $0x288] ss:$16 sps:$4 sm:$0xff]   ;;  %v7806_v25 = vld [vmem:[#allocation2 + $0x7e0] ss:$16 sps:$4 sm:$0xff]  }
  0xf4   :  { %4967 = vmatprep.mubr.bf16.mxu0 %v9142_v33 }
  0xf5   :  { %5368 = vmatpush1.bf16.msra.mxu1 %v7725_v28  ;;  %v110_v28 = vld [vmem:[%s9367_s0 + $0x30] sm:$0xff] }
  0xf6   :  { %4938 = vmatpush1.bf16.msra.mxu0 %v7722_v27  ;;  %5369 = vmatprep.subr.bf16.mxu1 %v7733_v32  ;;  %v7814_v27 = vld [vmem:[#allocation2 + $0x804] ss:$16 sps:$4 sm:$0xff]   ;;  %v113_v32 = vld [vmem:[%s9367_s0 + $0x48] sm:$0xff] }
  0xf7   :  { %4939 = vmatprep.subr.bf16.mxu0 %v7730_v31  ;;  %v7812_v31 = vld [vmem:[#allocation2 + $0x800] ss:$16 sps:$4 sm:$0xff]  }
  0xf9   :  { %5370 = vmatpush1.bf16.msra.mxu1 %v7731_v34  ;;  %v137_v34 = vld [vmem:[%s9367_s0 + $0x108] sm:$0xff] }
  0xfa   :  { %4940 = vmatpush1.bf16.msra.mxu0 %v7728_v12  ;;  %5371 = vmatprep.subr.bf16.mxu1 %v7739_v36  ;;  %v9155_v12 = vpack.c.bf16 %v134_v29, %v110_v28  ;;  %v7820_v36 = vld [vmem:[#allocation2 + $0x824] ss:$16 sps:$4 sm:$0xff]   ;;  %v7901_v28 = vld [vmem:[#allocation2 + $0x5cc] ss:$16 sps:$4 sm:$0xff]   ;;  %v7896_v29 = vld [vmem:[#allocation2 + $0x9c0] ss:$16 sps:$4 sm:$0xff]  }
  0xfb   :  { %4941 = vmatprep.subr.bf16.mxu0 %v7736_v35  ;;  %v7815_v35 = vld [vmem:[#allocation2 + $0x408] ss:$16 sps:$4 sm:$0xff]  }
  0xfd   :  { %5372 = vmatpush1.bf16.msra.mxu1 %v7737_v38  ;;  %v9160_v38 = vpack.c.bf16 %v137_v34, %v113_v32  ;;  %v7907_v32 = vld [vmem:[#allocation2 + $0x5ec] ss:$16 sps:$4 sm:$0xff]   ;;  %v7902_v34 = vld [vmem:[#allocation2 + $0x9e0] ss:$16 sps:$4 sm:$0xff]  }
  0xfe   :  { %4942 = vmatpush1.bf16.msra.mxu0 %v7734_v37  ;;  %5373 = vmatprep.subr.bf16.mxu1 %v7745_v40  ;;  %v7823_v37 = vld [vmem:[#allocation2 + $0x42c] ss:$16 sps:$4 sm:$0xff]   ;;  %v7821_v40 = vld [vmem:[#allocation2 + $0x428] ss:$16 sps:$4 sm:$0xff]  }
  0xff   :  { %4943 = vmatprep.subr.bf16.mxu0 %v7742_v39  ;;  %v7818_v39 = vld [vmem:[#allocation2 + $0x820] ss:$16 sps:$4 sm:$0xff]  }
 0x101   :  { %5374 = vmatpush1.bf16.msra.mxu1 %v7743_v55  ;;  %v7829_v55 = vld [vmem:[#allocation2 + $0x44c] ss:$16 sps:$4 sm:$0xff]  }
 0x102   :  { %4944 = vmatpush1.bf16.msra.mxu0 %v7740_v41  ;;  %5375 = vmatprep.subr.bf16.mxu1 %v7751_v43  ;;  %v7826_v41 = vld [vmem:[#allocation2 + $0x844] ss:$16 sps:$4 sm:$0xff]   ;;  %v7827_v43 = vld [vmem:[#allocation2 + $0x448] ss:$16 sps:$4 sm:$0xff]  }
 0x103   :  { %4945 = vmatprep.subr.bf16.mxu0 %v7748_v42  ;;  %v7824_v42 = vld [vmem:[#allocation2 + $0x840] ss:$16 sps:$4 sm:$0xff]  }
 0x105   :  { %5376 = vmatpush1.bf16.msra.mxu1 %v7749_v46  ;;  %v7830_v46 = vld [vmem:[#allocation2 + $0x860] ss:$16 sps:$4 sm:$0xff]  }
 0x106   :  { %4946 = vmatpush1.bf16.msra.mxu0 %v7746_v45  ;;  %5377 = vmatprep.subr.bf16.mxu1 %v7757_v48  ;;  %v7832_v45 = vld [vmem:[#allocation2 + $0x864] ss:$16 sps:$4 sm:$0xff]  }
 0x107   :  { %4947 = vmatprep.subr.bf16.mxu0 %v7754_v47  ;;  %v7833_v47 = vld [vmem:[#allocation2 + $0x468] ss:$16 sps:$4 sm:$0xff]   ;;  %v7838_v48 = vld [vmem:[#allocation2 + $0x884] ss:$16 sps:$4 sm:$0xff]  }
 0x109   :  { %5378 = vmatpush1.bf16.msra.mxu1 %v7755_v50  ;;  %v7836_v50 = vld [vmem:[#allocation2 + $0x880] ss:$16 sps:$4 sm:$0xff]  }
 0x10a   :  { %4948 = vmatpush1.bf16.msra.mxu0 %v7752_v49  ;;  %5379 = vmatprep.subr.bf16.mxu1 %v7763_v52  ;;  %v7841_v49 = vld [vmem:[#allocation2 + $0x48c] ss:$16 sps:$4 sm:$0xff]  }
 0x10b   :  { %4949 = vmatprep.subr.bf16.mxu0 %v7760_v51  ;;  %v7844_v51 = vld [vmem:[#allocation2 + $0x8a4] ss:$16 sps:$4 sm:$0xff]   ;;  %v7847_v52 = vld [vmem:[#allocation2 + $0x4ac] ss:$16 sps:$4 sm:$0xff]  }
 0x10d   :  { %5380 = vmatpush1.bf16.msra.mxu1 %v7761_v54  ;;  %v7845_v54 = vld [vmem:[#allocation2 + $0x4a8] ss:$16 sps:$4 sm:$0xff]  }
 0x10e   :  { %4950 = vmatpush1.bf16.msra.mxu0 %v7758_v53  ;;  %5381 = vmatprep.subr.bf16.mxu1 %v7769_v57  ;;  %v7842_v53 = vld [vmem:[#allocation2 + $0x8a0] ss:$16 sps:$4 sm:$0xff]   ;;  %v7853_v57 = vld [vmem:[#allocation2 + $0x4cc] ss:$16 sps:$4 sm:$0xff]  }
 0x10f   :  { %4951 = vmatprep.subr.bf16.mxu0 %v7766_v56  ;;  %v7850_v56 = vld [vmem:[#allocation2 + $0x8c4] ss:$16 sps:$4 sm:$0xff]  }
 0x111   :  { %5382 = vmatpush1.bf16.msra.mxu1 %v7767_v59  ;;  %v7851_v59 = vld [vmem:[#allocation2 + $0x4c8] ss:$16 sps:$4 sm:$0xff]  }
 0x112   :  { %4952 = vmatpush1.bf16.msra.mxu0 %v7764_v58  ;;  %5383 = vmatprep.subr.bf16.mxu1 %v7775_v61  ;;  %v7848_v58 = vld [vmem:[#allocation2 + $0x8c0] ss:$16 sps:$4 sm:$0xff]   ;;  %v7859_v61 = vld [vmem:[#allocation2 + $0x4ec] ss:$16 sps:$4 sm:$0xff]  }
 0x113   :  { %4953 = vmatprep.subr.bf16.mxu0 %v7772_v60  ;;  %v7856_v60 = vld [vmem:[#allocation2 + $0x8e4] ss:$16 sps:$4 sm:$0xff]  }
 0x115   :  { %5384 = vmatpush1.bf16.msra.mxu1 %v7773_v63  ;;  %v7857_v63 = vld [vmem:[#allocation2 + $0x4e8] ss:$16 sps:$4 sm:$0xff]  }
 0x116   :  { %4954 = vmatpush1.bf16.msra.mxu0 %v7770_v62  ;;  %5385 = vmatprep.subr.bf16.mxu1 %v7781_v1  ;;  %v7854_v62 = vld [vmem:[#allocation2 + $0x8e0] ss:$16 sps:$4 sm:$0xff]   ;;  %v7865_v1 = vld [vmem:[#allocation2 + $0x50c] ss:$16 sps:$4 sm:$0xff]  }
 0x117   :  { %4955 = vmatprep.subr.bf16.mxu0 %v7778_v0  ;;  %v7862_v0 = vld [vmem:[#allocation2 + $0x904] ss:$16 sps:$4 sm:$0xff]  }
 0x119   :  { %5386 = vmatpush1.bf16.msra.mxu1 %v7779_v3  ;;  %v7863_v3 = vld [vmem:[#allocation2 + $0x508] ss:$16 sps:$4 sm:$0xff]  }
 0x11a   :  { %4956 = vmatpush1.bf16.msra.mxu0 %v7776_v2  ;;  %5387 = vmatprep.subr.bf16.mxu1 %v7787_v5  ;;  %v7860_v2 = vld [vmem:[#allocation2 + $0x900] ss:$16 sps:$4 sm:$0xff]   ;;  %v7871_v5 = vld [vmem:[#allocation2 + $0x52c] ss:$16 sps:$4 sm:$0xff]  }
 0x11b   :  { %4957 = vmatprep.subr.bf16.mxu0 %v7784_v4  ;;  %v7868_v4 = vld [vmem:[#allocation2 + $0x924] ss:$16 sps:$4 sm:$0xff]  }
 0x11d   :  { %5388 = vmatpush1.bf16.msra.mxu1 %v7785_v7  ;;  %v7869_v7 = vld [vmem:[#allocation2 + $0x528] ss:$16 sps:$4 sm:$0xff]  }
 0x11e   :  { %4958 = vmatpush1.bf16.msra.mxu0 %v7782_v6  ;;  %5389 = vmatprep.subr.bf16.mxu1 %v7793_v9  ;;  %v7866_v6 = vld [vmem:[#allocation2 + $0x920] ss:$16 sps:$4 sm:$0xff]   ;;  %v7877_v9 = vld [vmem:[#allocation2 + $0x54c] ss:$16 sps:$4 sm:$0xff]  }
 0x11f   :  { %4959 = vmatprep.subr.bf16.mxu0 %v7790_v8  ;;  %v7874_v8 = vld [vmem:[#allocation2 + $0x944] ss:$16 sps:$4 sm:$0xff]  }
 0x121   :  { %5390 = vmatpush1.bf16.msra.mxu1 %v7791_v11  ;;  %v7875_v11 = vld [vmem:[#allocation2 + $0x548] ss:$16 sps:$4 sm:$0xff]  }
 0x122   :  { %4960 = vmatpush1.bf16.msra.mxu0 %v7788_v10  ;;  %5391 = vmatprep.subr.bf16.mxu1 %v7799_v14  ;;  %v7872_v10 = vld [vmem:[#allocation2 + $0x940] ss:$16 sps:$4 sm:$0xff]   ;;  %v7883_v14 = vld [vmem:[#allocation2 + $0x56c] ss:$16 sps:$4 sm:$0xff]  }
 0x123   :  { %4961 = vmatprep.subr.bf16.mxu0 %v7796_v13  ;;  %v7880_v13 = vld [vmem:[#allocation2 + $0x964] ss:$16 sps:$4 sm:$0xff]  }
 0x125   :  { %5392 = vmatpush1.bf16.msra.mxu1 %v7797_v17  ;;  %v7881_v17 = vld [vmem:[#allocation2 + $0x568] ss:$16 sps:$4 sm:$0xff]  }
 0x126   :  { %4962 = vmatpush1.bf16.msra.mxu0 %v7794_v16  ;;  %5393 = vmatprep.subr.bf16.mxu1 %v7805_v19  ;;  %v7878_v16 = vld [vmem:[#allocation2 + $0x960] ss:$16 sps:$4 sm:$0xff]   ;;  %v7889_v19 = vld [vmem:[#allocation2 + $0x58c] ss:$16 sps:$4 sm:$0xff]  }
 0x127   :  { %4963 = vmatprep.subr.bf16.mxu0 %v7802_v18  ;;  %v7886_v18 = vld [vmem:[#allocation2 + $0x984] ss:$16 sps:$4 sm:$0xff]  }
 0x129   :  { %5394 = vmatpush1.bf16.msra.mxu1 %v7803_v21  ;;  %v7887_v21 = vld [vmem:[#allocation2 + $0x588] ss:$16 sps:$4 sm:$0xff]  }
 0x12a   :  { %4964 = vmatpush1.bf16.msra.mxu0 %v7800_v20  ;;  %5395 = vmatprep.subr.bf16.mxu1 %v7811_v23  ;;  %v7884_v20 = vld [vmem:[#allocation2 + $0x980] ss:$16 sps:$4 sm:$0xff]   ;;  %v7895_v23 = vld [vmem:[#allocation2 + $0x5ac] ss:$16 sps:$4 sm:$0xff]  }
 0x12b   :  { %4965 = vmatprep.subr.bf16.mxu0 %v7808_v22  ;;  %v7892_v22 = vld [vmem:[#allocation2 + $0x9a4] ss:$16 sps:$4 sm:$0xff]  }
 0x12d   :  { %5396 = vmatpush1.bf16.msra.mxu1 %v7809_v26  ;;  %v7893_v26 = vld [vmem:[#allocation2 + $0x5a8] ss:$16 sps:$4 sm:$0xff]  }
 0x12e   :  { %4966 = vmatpush1.bf16.msra.mxu0 %v7806_v25  ;;  %5408 = vmatprep.subr.bf16.mxu1 %v7817_v30  ;;  %v7890_v25 = vld [vmem:[#allocation2 + $0x9a0] ss:$16 sps:$4 sm:$0xff]   ;;  %v7899_v30 = vld [vmem:[#allocation2 + $0x5c8] ss:$16 sps:$4 sm:$0xff]  }
 0x12f   :  { %4978 = vmatprep.subr.bf16.mxu0 %v7814_v27  ;;  %v7898_v27 = vld [vmem:[#allocation2 + $0x9c4] ss:$16 sps:$4 sm:$0xff]  }
 0x130   :  { %5398 = vmatmul.mubr.bf16.vlgmr.msra.gmra.mrb[4].mxu1 %v9112_v15  ;;  %v7835_v15 = vld [vmem:[#allocation2 + $0x46c] ss:$16 sps:$4 sm:$0xff]  }
 0x131   :  { %4968 = vmatmul.mubr.bf16.vlgmr.msra.gmra.mrb[0].mxu0 %v9155_v12  ;;  %5409 = vmatpush1.bf16.msra.mxu1 %v7815_v35  ;;  %v7905_v35 = vld [vmem:[#allocation2 + $0x5e8] ss:$16 sps:$4 sm:$0xff]  }
 0x132   :  { %4979 = vmatpush1.bf16.msra.mxu0 %v7812_v31  ;;  %5410 = vmatprep.subr.bf16.mxu1 %v7823_v37  ;;  %v7904_v31 = vld [vmem:[#allocation2 + $0x9e4] ss:$16 sps:$4 sm:$0xff]  }
 0x133   :  { %4980 = vmatprep.subr.bf16.mxu0 %v7820_v36  ;;  %5010 = vmatprep.mubr.bf16.mxu0 %v9160_v38  ;;  %v112_v36 = vld [vmem:[%s9367_s0 + $0x40] sm:$0xff] }
 0x134   :  { %5440 = vmatprep.mubr.bf16.mxu1 %v9123_v44  ;;  %v7839_v44 = vld [vmem:[#allocation2 + $0x488] ss:$16 sps:$4 sm:$0xff]   ;;  %v136_v37 = vld [vmem:[%s9367_s0 + $0x100] sm:$0xff] }
 0x135   :  { %5411 = vmatpush1.bf16.msra.mxu1 %v7821_v40  ;;  %v7913_v40 = vld [vmem:[#allocation2 + $0x60c] ss:$16 sps:$4 sm:$0xff]  }
 0x136   :  { %4981 = vmatpush1.bf16.msra.mxu0 %v7818_v39  ;;  %5412 = vmatprep.subr.bf16.mxu1 %v7829_v55  ;;  %v7910_v39 = vld [vmem:[#allocation2 + $0xa04] ss:$16 sps:$4 sm:$0xff]   ;;  %v115_v55 = vld [vmem:[%s9367_s0 + $0x58] sm:$0xff] }
 0x137   :  { %4982 = vmatprep.subr.bf16.mxu0 %v7826_v41  ;;  %v7908_v41 = vld [vmem:[#allocation2 + $0xa00] ss:$16 sps:$4 sm:$0xff]  }
 0x139   :  { %5413 = vmatpush1.bf16.msra.mxu1 %v7827_v43  ;;  %v139_v43 = vld [vmem:[%s9367_s0 + $0x118] sm:$0xff] }
 0x13a   :  { %4983 = vmatpush1.bf16.msra.mxu0 %v7824_v42  ;;  %5414 = vmatprep.subr.bf16.mxu1 %v7835_v15  ;;  %v9175_v42 = vpack.c.bf16 %v136_v37, %v112_v36  ;;  %v7916_v15 = vld [vmem:[#allocation2 + $0xa24] ss:$16 sps:$4 sm:$0xff]   ;;  %v7991_v37 = vld [vmem:[#allocation2 + $0x7ac] ss:$16 sps:$4 sm:$0xff]  }
 0x13b   :  { %4984 = vmatprep.subr.bf16.mxu0 %v7832_v45  ;;  %v7911_v45 = vld [vmem:[#allocation2 + $0x608] ss:$16 sps:$4 sm:$0xff]   ;;  %v7988_v36 = vld [vmem:[#allocation2 + $0xba4] ss:$16 sps:$4 sm:$0xff]  }
 0x13d   :  { %5415 = vmatpush1.bf16.msra.mxu1 %v7833_v47  ;;  %v9180_v47 = vpack.c.bf16 %v139_v43, %v115_v55  ;;  %v7997_v55 = vld [vmem:[#allocation2 + $0x7cc] ss:$16 sps:$4 sm:$0xff]   ;;  %v7992_v43 = vld [vmem:[#allocation2 + $0xbc0] ss:$16 sps:$4 sm:$0xff]  }
 0x13e   :  { %4985 = vmatpush1.bf16.msra.mxu0 %v7830_v46  ;;  %5416 = vmatprep.subr.bf16.mxu1 %v7841_v49  ;;  %v7919_v46 = vld [vmem:[#allocation2 + $0x62c] ss:$16 sps:$4 sm:$0xff]   ;;  %v7917_v49 = vld [vmem:[#allocation2 + $0x628] ss:$16 sps:$4 sm:$0xff]  }
 0x13f   :  { %4986 = vmatprep.subr.bf16.mxu0 %v7838_v48  ;;  %v7914_v48 = vld [vmem:[#allocation2 + $0xa20] ss:$16 sps:$4 sm:$0xff]  }
 0x141   :  { %5417 = vmatpush1.bf16.msra.mxu1 %v7839_v44  ;;  %v7925_v44 = vld [vmem:[#allocation2 + $0x64c] ss:$16 sps:$4 sm:$0xff]  }
 0x142   :  { %4987 = vmatpush1.bf16.msra.mxu0 %v7836_v50  ;;  %5418 = vmatprep.subr.bf16.mxu1 %v7847_v52  ;;  %v7922_v50 = vld [vmem:[#allocation2 + $0xa44] ss:$16 sps:$4 sm:$0xff]   ;;  %v7923_v52 = vld [vmem:[#allocation2 + $0x648] ss:$16 sps:$4 sm:$0xff]  }
 0x143   :  { %4988 = vmatprep.subr.bf16.mxu0 %v7844_v51  ;;  %v7920_v51 = vld [vmem:[#allocation2 + $0xa40] ss:$16 sps:$4 sm:$0xff]  }
 0x145   :  { %5419 = vmatpush1.bf16.msra.mxu1 %v7845_v54  ;;  %v7926_v54 = vld [vmem:[#allocation2 + $0xa60] ss:$16 sps:$4 sm:$0xff]  }
 0x146   :  { %4989 = vmatpush1.bf16.msra.mxu0 %v7842_v53  ;;  %5420 = vmatprep.subr.bf16.mxu1 %v7853_v57  ;;  %v7928_v53 = vld [vmem:[#allocation2 + $0xa64] ss:$16 sps:$4 sm:$0xff]  }
 0x147   :  { %4990 = vmatprep.subr.bf16.mxu0 %v7850_v56  ;;  %v7929_v56 = vld [vmem:[#allocation2 + $0x668] ss:$16 sps:$4 sm:$0xff]   ;;  %v7934_v57 = vld [vmem:[#allocation2 + $0xa84] ss:$16 sps:$4 sm:$0xff]  }
 0x149   :  { %5421 = vmatpush1.bf16.msra.mxu1 %v7851_v59  ;;  %v7932_v59 = vld [vmem:[#allocation2 + $0xa80] ss:$16 sps:$4 sm:$0xff]  }
 0x14a   :  { %4991 = vmatpush1.bf16.msra.mxu0 %v7848_v58  ;;  %5422 = vmatprep.subr.bf16.mxu1 %v7859_v61  ;;  %v7937_v58 = vld [vmem:[#allocation2 + $0x68c] ss:$16 sps:$4 sm:$0xff]  }
 0x14b   :  { %4992 = vmatprep.subr.bf16.mxu0 %v7856_v60  ;;  %v7940_v60 = vld [vmem:[#allocation2 + $0xaa4] ss:$16 sps:$4 sm:$0xff]   ;;  %v7943_v61 = vld [vmem:[#allocation2 + $0x6ac] ss:$16 sps:$4 sm:$0xff]  }
 0x14d   :  { %5423 = vmatpush1.bf16.msra.mxu1 %v7857_v63  ;;  %v7941_v63 = vld [vmem:[#allocation2 + $0x6a8] ss:$16 sps:$4 sm:$0xff]  }
 0x14e   :  { %4993 = vmatpush1.bf16.msra.mxu0 %v7854_v62  ;;  %5424 = vmatprep.subr.bf16.mxu1 %v7865_v1  ;;  %v7938_v62 = vld [vmem:[#allocation2 + $0xaa0] ss:$16 sps:$4 sm:$0xff]   ;;  %v7949_v1 = vld [vmem:[#allocation2 + $0x6cc] ss:$16 sps:$4 sm:$0xff]  }
 0x14f   :  { %4994 = vmatprep.subr.bf16.mxu0 %v7862_v0  ;;  %v7946_v0 = vld [vmem:[#allocation2 + $0xac4] ss:$16 sps:$4 sm:$0xff]  }
 0x151   :  { %5425 = vmatpush1.bf16.msra.mxu1 %v7863_v3 }
 0x152   :  { %4995 = vmatpush1.bf16.msra.mxu0 %v7860_v2  ;;  %5426 = vmatprep.subr.bf16.mxu1 %v7871_v5 }
 0x153   :  { %4996 = vmatprep.subr.bf16.mxu0 %v7868_v4  ;;  %v7944_v4 = vld [vmem:[#allocation2 + $0xac0] ss:$16 sps:$4 sm:$0xff]  }
 0x155   :  { %5427 = vmatpush1.bf16.msra.mxu1 %v7869_v7 }
 0x156   :  { %4997 = vmatpush1.bf16.msra.mxu0 %v7866_v6  ;;  %5428 = vmatprep.subr.bf16.mxu1 %v7877_v9  ;;  %v7947_v6 = vld [vmem:[#allocation2 + $0x6c8] ss:$16 sps:$4 sm:$0xff]   ;;  %v7955_v9 = vld [vmem:[#allocation2 + $0x6ec] ss:$16 sps:$4 sm:$0xff]  }
 0x157   :  { %4998 = vmatprep.subr.bf16.mxu0 %v7874_v8  ;;  %v7952_v8 = vld [vmem:[#allocation2 + $0xae4] ss:$16 sps:$4 sm:$0xff]  }
 0x159   :  { %5429 = vmatpush1.bf16.msra.mxu1 %v7875_v11  ;;  %v7953_v11 = vld [vmem:[#allocation2 + $0x6e8] ss:$16 sps:$4 sm:$0xff]  }
 0x15a   :  { %4999 = vmatpush1.bf16.msra.mxu0 %v7872_v10  ;;  %5430 = vmatprep.subr.bf16.mxu1 %v7883_v14  ;;  %v7950_v10 = vld [vmem:[#allocation2 + $0xae0] ss:$16 sps:$4 sm:$0xff]   ;;  %v7961_v14 = vld [vmem:[#allocation2 + $0x70c] ss:$16 sps:$4 sm:$0xff]  }
 0x15b   :  { %5000 = vmatprep.subr.bf16.mxu0 %v7880_v13  ;;  %v7958_v13 = vld [vmem:[#allocation2 + $0xb04] ss:$16 sps:$4 sm:$0xff]  }
 0x15d   :  { %5431 = vmatpush1.bf16.msra.mxu1 %v7881_v17  ;;  %v7959_v17 = vld [vmem:[#allocation2 + $0x708] ss:$16 sps:$4 sm:$0xff]  }
 0x15e   :  { %5001 = vmatpush1.bf16.msra.mxu0 %v7878_v16  ;;  %5432 = vmatprep.subr.bf16.mxu1 %v7889_v19  ;;  %v7956_v16 = vld [vmem:[#allocation2 + $0xb00] ss:$16 sps:$4 sm:$0xff]   ;;  %v7967_v19 = vld [vmem:[#allocation2 + $0x72c] ss:$16 sps:$4 sm:$0xff]  }
 0x15f   :  { %5002 = vmatprep.subr.bf16.mxu0 %v7886_v18  ;;  %v7964_v18 = vld [vmem:[#allocation2 + $0xb24] ss:$16 sps:$4 sm:$0xff]  }
 0x161   :  { %5433 = vmatpush1.bf16.msra.mxu1 %v7887_v21  ;;  %v7965_v21 = vld [vmem:[#allocation2 + $0x728] ss:$16 sps:$4 sm:$0xff]  }
 0x162   :  { %5003 = vmatpush1.bf16.msra.mxu0 %v7884_v20  ;;  %5434 = vmatprep.subr.bf16.mxu1 %v7895_v23  ;;  %v7962_v20 = vld [vmem:[#allocation2 + $0xb20] ss:$16 sps:$4 sm:$0xff]   ;;  %v7973_v23 = vld [vmem:[#allocation2 + $0x74c] ss:$16 sps:$4 sm:$0xff]  }
 0x163   :  { %5004 = vmatprep.subr.bf16.mxu0 %v7892_v22  ;;  %v7970_v22 = vld [vmem:[#allocation2 + $0xb44] ss:$16 sps:$4 sm:$0xff]  }
 0x165   :  { %5435 = vmatpush1.bf16.msra.mxu1 %v7893_v26  ;;  %v7971_v26 = vld [vmem:[#allocation2 + $0x748] ss:$16 sps:$4 sm:$0xff]  }
 0x166   :  { %5005 = vmatpush1.bf16.msra.mxu0 %v7890_v25  ;;  %5436 = vmatprep.subr.bf16.mxu1 %v7901_v28  ;;  %v7968_v25 = vld [vmem:[#allocation2 + $0xb40] ss:$16 sps:$4 sm:$0xff]   ;;  %v7979_v28 = vld [vmem:[#allocation2 + $0x76c] ss:$16 sps:$4 sm:$0xff]  }
 0x167   :  { %5006 = vmatprep.subr.bf16.mxu0 %v7898_v27  ;;  %v7976_v27 = vld [vmem:[#allocation2 + $0xb64] ss:$16 sps:$4 sm:$0xff]  }
 0x169   :  { %5437 = vmatpush1.bf16.msra.mxu1 %v7899_v30  ;;  %v7977_v30 = vld [vmem:[#allocation2 + $0x768] ss:$16 sps:$4 sm:$0xff]  }
 0x16a   :  { %5007 = vmatpush1.bf16.msra.mxu0 %v7896_v29  ;;  %5438 = vmatprep.subr.bf16.mxu1 %v7907_v32  ;;  %v7974_v29 = vld [vmem:[#allocation2 + $0xb60] ss:$16 sps:$4 sm:$0xff]   ;;  %v7985_v32 = vld [vmem:[#allocation2 + $0x78c] ss:$16 sps:$4 sm:$0xff]  }
 0x16b   :  { %5008 = vmatprep.subr.bf16.mxu0 %v7904_v31  ;;  %v7982_v31 = vld [vmem:[#allocation2 + $0xb84] ss:$16 sps:$4 sm:$0xff]  }
 0x16d   :  { %5439 = vmatpush1.bf16.msra.mxu1 %v7905_v35  ;;  %v7983_v35 = vld [vmem:[#allocation2 + $0x788] ss:$16 sps:$4 sm:$0xff]  }
 0x16e   :  { %5009 = vmatpush1.bf16.msra.mxu0 %v7902_v34  ;;  %5451 = vmatprep.subr.bf16.mxu1 %v7913_v40  ;;  %v7980_v34 = vld [vmem:[#allocation2 + $0xb80] ss:$16 sps:$4 sm:$0xff]   ;;  %v7989_v40 = vld [vmem:[#allocation2 + $0x7a8] ss:$16 sps:$4 sm:$0xff]  }
 0x16f   :  { %5021 = vmatprep.subr.bf16.mxu0 %v7910_v39  ;;  %v7986_v39 = vld [vmem:[#allocation2 + $0xba0] ss:$16 sps:$4 sm:$0xff]  }
 0x170   :  { %5441 = vmatmul.mubr.bf16.vlgmr.msra.gmra.mrb[4].mxu1 %v9132_v24  ;;  %v7931_v24 = vld [vmem:[#allocation2 + $0x66c] ss:$16 sps:$4 sm:$0xff]  }
 0x171   :  { %5011 = vmatmul.mubr.bf16.vlgmr.msra.gmra.mrb[0].mxu0 %v9175_v42  ;;  %5452 = vmatpush1.bf16.msra.mxu1 %v7911_v45  ;;  %v7995_v45 = vld [vmem:[#allocation2 + $0x7c8] ss:$16 sps:$4 sm:$0xff]  }
 0x172   :  { %5022 = vmatpush1.bf16.msra.mxu0 %v7908_v41  ;;  %5453 = vmatprep.subr.bf16.mxu1 %v7919_v46  ;;  %v7994_v41 = vld [vmem:[#allocation2 + $0xbc4] ss:$16 sps:$4 sm:$0xff]   ;;  %v8003_v46 = vld [vmem:[#allocation2 + $0x7ec] ss:$16 sps:$4 sm:$0xff]  }
 0x173   :  { %5023 = vmatprep.subr.bf16.mxu0 %v7916_v15  ;;  %5053 = vmatprep.mubr.bf16.mxu0 %v9180_v47  ;;  %v8000_v15 = vld [vmem:[#allocation2 + $0xbe4] ss:$16 sps:$4 sm:$0xff]  }
 0x174   :  { %5483 = vmatprep.mubr.bf16.mxu1 %v9142_v33  ;;  %v7935_v33 = vld [vmem:[#allocation2 + $0x688] ss:$16 sps:$4 sm:$0xff]  }
 0x175   :  { %5454 = vmatpush1.bf16.msra.mxu1 %v7917_v49  ;;  %v8001_v49 = vld [vmem:[#allocation2 + $0x7e8] ss:$16 sps:$4 sm:$0xff]  }
 0x176   :  { %5024 = vmatpush1.bf16.msra.mxu0 %v7914_v48  ;;  %5455 = vmatprep.subr.bf16.mxu1 %v7925_v44  ;;  %v7998_v48 = vld [vmem:[#allocation2 + $0xbe0] ss:$16 sps:$4 sm:$0xff]   ;;  %v8009_v44 = vld [vmem:[#allocation2 + $0x80c] ss:$16 sps:$4 sm:$0xff]  }
 0x177   :  { %5025 = vmatprep.subr.bf16.mxu0 %v7922_v50  ;;  %v8006_v50 = vld [vmem:[#allocation2 + $0xc04] ss:$16 sps:$4 sm:$0xff]  }
 0x179   :  { %5456 = vmatpush1.bf16.msra.mxu1 %v7923_v52  ;;  %v138_v52 = vld [vmem:[%s9367_s0 + $0x110] sm:$0xff] }
 0x17a   :  { %5026 = vmatpush1.bf16.msra.mxu0 %v7920_v51  ;;  %5457 = vmatprep.subr.bf16.mxu1 %v7931_v24  ;;  %v114_v51 = vld [vmem:[%s9367_s0 + $0x50] sm:$0xff]  ;;  %v141_v24 = vld [vmem:[%s9367_s0 + $0x128] sm:$0xff] }
 0x17b   :  { %5027 = vmatprep.subr.bf16.mxu0 %v7928_v53  ;;  %v117_v53 = vld [vmem:[%s9367_s0 + $0x68] sm:$0xff] }
 0x17d   :  { %5458 = vmatpush1.bf16.msra.mxu1 %v7929_v56  ;;  %v8004_v56 = vld [vmem:[#allocation2 + $0xc00] ss:$16 sps:$4 sm:$0xff]  }
 0x17e   :  { %5028 = vmatpush1.bf16.msra.mxu0 %v7926_v54  ;;  %5459 = vmatprep.subr.bf16.mxu1 %v7937_v58  ;;  %v9206_v54 = vpack.c.bf16 %v138_v52, %v114_v51  ;;  %v8012_v58 = vld [vmem:[#allocation2 + $0xc24] ss:$16 sps:$4 sm:$0xff]   ;;  %v8082_v51 = vld [vmem:[#allocation2 + $0xda0] ss:$16 sps:$4 sm:$0xff]   ;;  %v8085_v52 = vld [vmem:[#allocation2 + $0x9a8] ss:$16 sps:$4 sm:$0xff]  }
 0x17f   :  { %5029 = vmatprep.subr.bf16.mxu0 %v7934_v57  ;;  %v8007_v57 = vld [vmem:[#allocation2 + $0x808] ss:$16 sps:$4 sm:$0xff]  }
 0x181   :  { %5460 = vmatpush1.bf16.msra.mxu1 %v7935_v33  ;;  %v9208_v33 = vpack.c.bf16 %v141_v24, %v117_v53  ;;  %v8090_v53 = vld [vmem:[#allocation2 + $0xdc4] ss:$16 sps:$4 sm:$0xff]   ;;  %v8093_v24 = vld [vmem:[#allocation2 + $0x9cc] ss:$16 sps:$4 sm:$0xff]  }
 0x182   :  { %5030 = vmatpush1.bf16.msra.mxu0 %v7932_v59  ;;  %5461 = vmatprep.subr.bf16.mxu1 %v7943_v61  ;;  %v8015_v59 = vld [vmem:[#allocation2 + $0x82c] ss:$16 sps:$4 sm:$0xff]   ;;  %v8013_v61 = vld [vmem:[#allocation2 + $0x828] ss:$16 sps:$4 sm:$0xff]  }
 0x183   :  { %5031 = vmatprep.subr.bf16.mxu0 %v7940_v60  ;;  %v9186_v2 = vpop.f32.mrb[0].mxu1  ;;  %v8010_v60 = vld [vmem:[#allocation2 + $0xc20] ss:$16 sps:$4 sm:$0xff]  }
 0x184   :  { %v9188_v3 = vpop.f32.mrb[1].mxu1 }
 0x185   :  { %v9190_v5 = vpop.f32.mrb[2].mxu1  ;;  %5462 = vmatpush1.bf16.msra.mxu1 %v7941_v63  ;;  %v8021_v63 = vld [vmem:[#allocation2 + $0x84c] ss:$16 sps:$4 sm:$0xff]  }
 0x186   :  { %5032 = vmatpush1.bf16.msra.mxu0 %v7938_v62  ;;  %v9192_v7 = vpop.f32.mrb[3].mxu1  ;;  %5463 = vmatprep.subr.bf16.mxu1 %v7949_v1  ;;  %v8018_v62 = vld [vmem:[#allocation2 + $0xc44] ss:$16 sps:$4 sm:$0xff]   ;;  %v8019_v1 = vld [vmem:[#allocation2 + $0x848] ss:$16 sps:$4 sm:$0xff]  }
 0x187   :  { %5033 = vmatprep.subr.bf16.mxu0 %v7946_v0  ;;  %v8016_v0 = vld [vmem:[#allocation2 + $0xc40] ss:$16 sps:$4 sm:$0xff]  }
 0x189   :  { %5464 = vmatpush1.bf16.msra.mxu1 %v7947_v6  ;;  %v8022_v6 = vld [vmem:[#allocation2 + $0xc60] ss:$16 sps:$4 sm:$0xff]  }
 0x18a   :  { %5034 = vmatpush1.bf16.msra.mxu0 %v7944_v4  ;;  %5465 = vmatprep.subr.bf16.mxu1 %v7955_v9  ;;  %v8024_v4 = vld [vmem:[#allocation2 + $0xc64] ss:$16 sps:$4 sm:$0xff]  }
 0x18b   :  { %5035 = vmatprep.subr.bf16.mxu0 %v7952_v8  ;;  %v8025_v8 = vld [vmem:[#allocation2 + $0x868] ss:$16 sps:$4 sm:$0xff]   ;;  %v8030_v9 = vld [vmem:[#allocation2 + $0xc84] ss:$16 sps:$4 sm:$0xff]  }
 0x18d   :  { %5466 = vmatpush1.bf16.msra.mxu1 %v7953_v11  ;;  %v8028_v11 = vld [vmem:[#allocation2 + $0xc80] ss:$16 sps:$4 sm:$0xff]  }
 0x18e   :  { %5036 = vmatpush1.bf16.msra.mxu0 %v7950_v10  ;;  %5467 = vmatprep.subr.bf16.mxu1 %v7961_v14  ;;  %v8033_v10 = vld [vmem:[#allocation2 + $0x88c] ss:$16 sps:$4 sm:$0xff]  }
 0x18f   :  { %5037 = vmatprep.subr.bf16.mxu0 %v7958_v13  ;;  %v8036_v13 = vld [vmem:[#allocation2 + $0xca4] ss:$16 sps:$4 sm:$0xff]   ;;  %v8039_v14 = vld [vmem:[#allocation2 + $0x8ac] ss:$16 sps:$4 sm:$0xff]  }
 0x191   :  { %5468 = vmatpush1.bf16.msra.mxu1 %v7959_v17  ;;  %v8037_v17 = vld [vmem:[#allocation2 + $0x8a8] ss:$16 sps:$4 sm:$0xff]  }
 0x192   :  { %5038 = vmatpush1.bf16.msra.mxu0 %v7956_v16  ;;  %5469 = vmatprep.subr.bf16.mxu1 %v7967_v19  ;;  %v8034_v16 = vld [vmem:[#allocation2 + $0xca0] ss:$16 sps:$4 sm:$0xff]   ;;  %v8045_v19 = vld [vmem:[#allocation2 + $0x8cc] ss:$16 sps:$4 sm:$0xff]  }
 0x193   :  { %5039 = vmatprep.subr.bf16.mxu0 %v7964_v18  ;;  %v8042_v18 = vld [vmem:[#allocation2 + $0xcc4] ss:$16 sps:$4 sm:$0xff]  }
 0x195   :  { %5470 = vmatpush1.bf16.msra.mxu1 %v7965_v21  ;;  %v8043_v21 = vld [vmem:[#allocation2 + $0x8c8] ss:$16 sps:$4 sm:$0xff]  }
 0x196   :  { %5040 = vmatpush1.bf16.msra.mxu0 %v7962_v20  ;;  %5471 = vmatprep.subr.bf16.mxu1 %v7973_v23  ;;  %v8040_v20 = vld [vmem:[#allocation2 + $0xcc0] ss:$16 sps:$4 sm:$0xff]   ;;  %v8051_v23 = vld [vmem:[#allocation2 + $0x8ec] ss:$16 sps:$4 sm:$0xff]  }
 0x197   :  { %5041 = vmatprep.subr.bf16.mxu0 %v7970_v22  ;;  %v8048_v22 = vld [vmem:[#allocation2 + $0xce4] ss:$16 sps:$4 sm:$0xff]  }
 0x199   :  { %5472 = vmatpush1.bf16.msra.mxu1 %v7971_v26  ;;  %v8049_v26 = vld [vmem:[#allocation2 + $0x8e8] ss:$16 sps:$4 sm:$0xff]  }
 0x19a   :  { %5042 = vmatpush1.bf16.msra.mxu0 %v7968_v25  ;;  %5473 = vmatprep.subr.bf16.mxu1 %v7979_v28  ;;  %v8046_v25 = vld [vmem:[#allocation2 + $0xce0] ss:$16 sps:$4 sm:$0xff]   ;;  %v8057_v28 = vld [vmem:[#allocation2 + $0x90c] ss:$16 sps:$4 sm:$0xff]  }
 0x19b   :  { %5043 = vmatprep.subr.bf16.mxu0 %v7976_v27  ;;  %v8054_v27 = vld [vmem:[#allocation2 + $0xd04] ss:$16 sps:$4 sm:$0xff]  }
 0x19d   :  { %5474 = vmatpush1.bf16.msra.mxu1 %v7977_v30  ;;  %v8055_v30 = vld [vmem:[#allocation2 + $0x908] ss:$16 sps:$4 sm:$0xff]  }
 0x19e   :  { %5044 = vmatpush1.bf16.msra.mxu0 %v7974_v29  ;;  %5475 = vmatprep.subr.bf16.mxu1 %v7985_v32  ;;  %v8052_v29 = vld [vmem:[#allocation2 + $0xd00] ss:$16 sps:$4 sm:$0xff]   ;;  %v8063_v32 = vld [vmem:[#allocation2 + $0x92c] ss:$16 sps:$4 sm:$0xff]  }
 0x19f   :  { %5045 = vmatprep.subr.bf16.mxu0 %v7982_v31  ;;  %v8060_v31 = vld [vmem:[#allocation2 + $0xd24] ss:$16 sps:$4 sm:$0xff]  }
 0x1a1   :  { %5476 = vmatpush1.bf16.msra.mxu1 %v7983_v35  ;;  %v8061_v35 = vld [vmem:[#allocation2 + $0x928] ss:$16 sps:$4 sm:$0xff]  }
 0x1a2   :  { %5046 = vmatpush1.bf16.msra.mxu0 %v7980_v34  ;;  %5477 = vmatprep.subr.bf16.mxu1 %v7991_v37  ;;  %v8058_v34 = vld [vmem:[#allocation2 + $0xd20] ss:$16 sps:$4 sm:$0xff]   ;;  %v8069_v37 = vld [vmem:[#allocation2 + $0x94c] ss:$16 sps:$4 sm:$0xff]  }
 0x1a3   :  { %5047 = vmatprep.subr.bf16.mxu0 %v7988_v36  ;;  %v8066_v36 = vld [vmem:[#allocation2 + $0xd44] ss:$16 sps:$4 sm:$0xff]  }
 0x1a5   :  { %5478 = vmatpush1.bf16.msra.mxu1 %v7989_v40  ;;  %v8067_v40 = vld [vmem:[#allocation2 + $0x948] ss:$16 sps:$4 sm:$0xff]  }
 0x1a6   :  { %5048 = vmatpush1.bf16.msra.mxu0 %v7986_v39  ;;  %5479 = vmatprep.subr.bf16.mxu1 %v7997_v55  ;;  %v8064_v39 = vld [vmem:[#allocation2 + $0xd40] ss:$16 sps:$4 sm:$0xff]   ;;  %v8075_v55 = vld [vmem:[#allocation2 + $0x96c] ss:$16 sps:$4 sm:$0xff]  }
 0x1a7   :  { %5049 = vmatprep.subr.bf16.mxu0 %v7994_v41  ;;  %v8072_v41 = vld [vmem:[#allocation2 + $0xd64] ss:$16 sps:$4 sm:$0xff]  }
 0x1a9   :  { %5480 = vmatpush1.bf16.msra.mxu1 %v7995_v45  ;;  %v8073_v45 = vld [vmem:[#allocation2 + $0x968] ss:$16 sps:$4 sm:$0xff]  }
 0x1aa   :  { %5050 = vmatpush1.bf16.msra.mxu0 %v7992_v43  ;;  %5481 = vmatprep.subr.bf16.mxu1 %v8003_v46  ;;  %v8070_v43 = vld [vmem:[#allocation2 + $0xd60] ss:$16 sps:$4 sm:$0xff]   ;;  %v8081_v46 = vld [vmem:[#allocation2 + $0x98c] ss:$16 sps:$4 sm:$0xff]  }
 0x1ab   :  { %5051 = vmatprep.subr.bf16.mxu0 %v8000_v15  ;;  %v8078_v15 = vld [vmem:[#allocation2 + $0xd84] ss:$16 sps:$4 sm:$0xff]  }
 0x1ad   :  { %5482 = vmatpush1.bf16.msra.mxu1 %v8001_v49  ;;  %v8079_v49 = vld [vmem:[#allocation2 + $0x988] ss:$16 sps:$4 sm:$0xff]  }
 0x1ae   :  { %5052 = vmatpush1.bf16.msra.mxu0 %v7998_v48  ;;  %5494 = vmatprep.subr.bf16.mxu1 %v8009_v44  ;;  %v8076_v48 = vld [vmem:[#allocation2 + $0xd80] ss:$16 sps:$4 sm:$0xff]   ;;  %v8087_v44 = vld [vmem:[#allocation2 + $0x9ac] ss:$16 sps:$4 sm:$0xff]  }
 0x1af   :  { %5064 = vmatprep.subr.bf16.mxu0 %v8006_v50  ;;  %v8084_v50 = vld [vmem:[#allocation2 + $0xda4] ss:$16 sps:$4 sm:$0xff]  }
 0x1b0   :  { %5484 = vmatmul.mubr.bf16.vlgmr.msra.gmra.mrb[4].mxu1 %v9155_v12  ;;  %v8027_v12 = vld [vmem:[#allocation2 + $0x86c] ss:$16 sps:$4 sm:$0xff]  }
 0x1b1   :  { %5054 = vmatmul.mubr.bf16.vlgmr.msra.gmra.mrb[0].mxu0 %v9206_v54  ;;  %5495 = vmatpush1.bf16.msra.mxu1 %v8007_v57  ;;  %v8091_v57 = vld [vmem:[#allocation2 + $0x9c8] ss:$16 sps:$4 sm:$0xff]  }
 0x1b2   :  { %5065 = vmatpush1.bf16.msra.mxu0 %v8004_v56  ;;  %5496 = vmatprep.subr.bf16.mxu1 %v8015_v59  ;;  %v8088_v56 = vld [vmem:[#allocation2 + $0xdc0] ss:$16 sps:$4 sm:$0xff]   ;;  %v8099_v59 = vld [vmem:[#allocation2 + $0x9ec] ss:$16 sps:$4 sm:$0xff]  }
 0x1b3   :  { %5066 = vmatprep.subr.bf16.mxu0 %v8012_v58  ;;  %5096 = vmatprep.mubr.bf16.mxu0 %v9208_v33  ;;  %v8096_v58 = vld [vmem:[#allocation2 + $0xde4] ss:$16 sps:$4 sm:$0xff]  }
 0x1b4   :  { %5526 = vmatprep.mubr.bf16.mxu1 %v9160_v38  ;;  %v8031_v38 = vld [vmem:[#allocation2 + $0x888] ss:$16 sps:$4 sm:$0xff]  }
 0x1b5   :  { %5497 = vmatpush1.bf16.msra.mxu1 %v8013_v61  ;;  %v8097_v61 = vld [vmem:[#allocation2 + $0x9e8] ss:$16 sps:$4 sm:$0xff]  }
 0x1b6   :  { %5067 = vmatpush1.bf16.msra.mxu0 %v8010_v60  ;;  %5498 = vmatprep.subr.bf16.mxu1 %v8021_v63  ;;  %v8094_v60 = vld [vmem:[#allocation2 + $0xde0] ss:$16 sps:$4 sm:$0xff]   ;;  %v8105_v63 = vld [vmem:[#allocation2 + $0xa0c] ss:$16 sps:$4 sm:$0xff]  }
 0x1b7   :  { %5068 = vmatprep.subr.bf16.mxu0 %v8018_v62  ;;  %v8102_v62 = vld [vmem:[#allocation2 + $0xe04] ss:$16 sps:$4 sm:$0xff]  }
 0x1b9   :  { %5499 = vmatpush1.bf16.msra.mxu1 %v8019_v1  ;;  %v140_v1 = vld [vmem:[%s9367_s0 + $0x120] sm:$0xff] }
 0x1ba   :  { %5069 = vmatpush1.bf16.msra.mxu0 %v8016_v0  ;;  %5500 = vmatprep.subr.bf16.mxu1 %v8027_v12  ;;  %v116_v0 = vld [vmem:[%s9367_s0 + $0x60] sm:$0xff]  ;;  %v143_v12 = vld [vmem:[%s9367_s0 + $0x138] sm:$0xff] }
 0x1bb   :  { %5070 = vmatprep.subr.bf16.mxu0 %v8024_v4  ;;  %v119_v4 = vld [vmem:[%s9367_s0 + $0x78] sm:$0xff] }
 0x1bd   :  { %5501 = vmatpush1.bf16.msra.mxu1 %v8025_v8  ;;  %v8100_v8 = vld [vmem:[#allocation2 + $0xe00] ss:$16 sps:$4 sm:$0xff]  }
 0x1be   :  { %5071 = vmatpush1.bf16.msra.mxu0 %v8022_v6  ;;  %5502 = vmatprep.subr.bf16.mxu1 %v8033_v10  ;;  %v9226_v6 = vpack.c.bf16 %v140_v1, %v116_v0  ;;  %v8108_v10 = vld [vmem:[#allocation2 + $0xe24] ss:$16 sps:$4 sm:$0xff]   ;;  %v8178_v0 = vld [vmem:[#allocation2 + $0xfa0] ss:$16 sps:$4 sm:$0xff]   ;;  %v8181_v1 = vld [vmem:[#allocation2 + $0xba8] ss:$16 sps:$4 sm:$0xff]  }
 0x1bf   :  { %5072 = vmatprep.subr.bf16.mxu0 %v8030_v9  ;;  %v8103_v9 = vld [vmem:[#allocation2 + $0xa08] ss:$16 sps:$4 sm:$0xff]  }
 0x1c1   :  { %5503 = vmatpush1.bf16.msra.mxu1 %v8031_v38  ;;  %v9228_v38 = vpack.c.bf16 %v143_v12, %v119_v4  ;;  %v8186_v4 = vld [vmem:[#allocation2 + $0xfc4] ss:$16 sps:$4 sm:$0xff]   ;;  %v8189_v12 = vld [vmem:[#allocation2 + $0xbcc] ss:$16 sps:$4 sm:$0xff]  }
 0x1c2   :  { %5073 = vmatpush1.bf16.msra.mxu0 %v8028_v11  ;;  %5504 = vmatprep.subr.bf16.mxu1 %v8039_v14  ;;  %v8111_v11 = vld [vmem:[#allocation2 + $0xa2c] ss:$16 sps:$4 sm:$0xff]   ;;  %v8109_v14 = vld [vmem:[#allocation2 + $0xa28] ss:$16 sps:$4 sm:$0xff]  }
 0x1c3   :  { %5074 = vmatprep.subr.bf16.mxu0 %v8036_v13  ;;  %v8106_v13 = vld [vmem:[#allocation2 + $0xe20] ss:$16 sps:$4 sm:$0xff]  }
 0x1c5   :  { %5505 = vmatpush1.bf16.msra.mxu1 %v8037_v17  ;;  %v8117_v17 = vld [vmem:[#allocation2 + $0xa4c] ss:$16 sps:$4 sm:$0xff]  }
 0x1c6   :  { %5075 = vmatpush1.bf16.msra.mxu0 %v8034_v16  ;;  %5506 = vmatprep.subr.bf16.mxu1 %v8045_v19  ;;  %v8114_v16 = vld [vmem:[#allocation2 + $0xe44] ss:$16 sps:$4 sm:$0xff]   ;;  %v8115_v19 = vld [vmem:[#allocation2 + $0xa48] ss:$16 sps:$4 sm:$0xff]  }
 0x1c7   :  { %5076 = vmatprep.subr.bf16.mxu0 %v8042_v18  ;;  %v8112_v18 = vld [vmem:[#allocation2 + $0xe40] ss:$16 sps:$4 sm:$0xff]  }
 0x1c9   :  { %5507 = vmatpush1.bf16.msra.mxu1 %v8043_v21  ;;  %v8118_v21 = vld [vmem:[#allocation2 + $0xe60] ss:$16 sps:$4 sm:$0xff]  }
 0x1ca   :  { %5077 = vmatpush1.bf16.msra.mxu0 %v8040_v20  ;;  %5508 = vmatprep.subr.bf16.mxu1 %v8051_v23  ;;  %v8120_v20 = vld [vmem:[#allocation2 + $0xe64] ss:$16 sps:$4 sm:$0xff]  }
 0x1cb   :  { %5078 = vmatprep.subr.bf16.mxu0 %v8048_v22  ;;  %v8121_v22 = vld [vmem:[#allocation2 + $0xa68] ss:$16 sps:$4 sm:$0xff]   ;;  %v8126_v23 = vld [vmem:[#allocation2 + $0xe84] ss:$16 sps:$4 sm:$0xff]  }
 0x1cd   :  { %5509 = vmatpush1.bf16.msra.mxu1 %v8049_v26  ;;  %v8124_v26 = vld [vmem:[#allocation2 + $0xe80] ss:$16 sps:$4 sm:$0xff]  }
 0x1ce   :  { %5079 = vmatpush1.bf16.msra.mxu0 %v8046_v25  ;;  %5510 = vmatprep.subr.bf16.mxu1 %v8057_v28  ;;  %v8129_v25 = vld [vmem:[#allocation2 + $0xa8c] ss:$16 sps:$4 sm:$0xff]  }
 0x1cf   :  { %5080 = vmatprep.subr.bf16.mxu0 %v8054_v27  ;;  %v8132_v27 = vld [vmem:[#allocation2 + $0xea4] ss:$16 sps:$4 sm:$0xff]   ;;  %v8135_v28 = vld [vmem:[#allocation2 + $0xaac] ss:$16 sps:$4 sm:$0xff]  }
 0x1d1   :  { %5511 = vmatpush1.bf16.msra.mxu1 %v8055_v30  ;;  %v8133_v30 = vld [vmem:[#allocation2 + $0xaa8] ss:$16 sps:$4 sm:$0xff]  }
 0x1d2   :  { %5081 = vmatpush1.bf16.msra.mxu0 %v8052_v29  ;;  %5512 = vmatprep.subr.bf16.mxu1 %v8063_v32  ;;  %v8130_v29 = vld [vmem:[#allocation2 + $0xea0] ss:$16 sps:$4 sm:$0xff]   ;;  %v8141_v32 = vld [vmem:[#allocation2 + $0xacc] ss:$16 sps:$4 sm:$0xff]  }
 0x1d3   :  { %5082 = vmatprep.subr.bf16.mxu0 %v8060_v31  ;;  %v8138_v31 = vld [vmem:[#allocation2 + $0xec4] ss:$16 sps:$4 sm:$0xff]  }
 0x1d5   :  { %5513 = vmatpush1.bf16.msra.mxu1 %v8061_v35  ;;  %v8139_v35 = vld [vmem:[#allocation2 + $0xac8] ss:$16 sps:$4 sm:$0xff]  }
 0x1d6   :  { %5083 = vmatpush1.bf16.msra.mxu0 %v8058_v34  ;;  %5514 = vmatprep.subr.bf16.mxu1 %v8069_v37  ;;  %v8136_v34 = vld [vmem:[#allocation2 + $0xec0] ss:$16 sps:$4 sm:$0xff]   ;;  %v8147_v37 = vld [vmem:[#allocation2 + $0xaec] ss:$16 sps:$4 sm:$0xff]  }
 0x1d7   :  { %5084 = vmatprep.subr.bf16.mxu0 %v8066_v36  ;;  %v8144_v36 = vld [vmem:[#allocation2 + $0xee4] ss:$16 sps:$4 sm:$0xff]  }
 0x1d9   :  { %5515 = vmatpush1.bf16.msra.mxu1 %v8067_v40  ;;  %v8145_v40 = vld [vmem:[#allocation2 + $0xae8] ss:$16 sps:$4 sm:$0xff]  }
 0x1da   :  { %5085 = vmatpush1.bf16.msra.mxu0 %v8064_v39  ;;  %5516 = vmatprep.subr.bf16.mxu1 %v8075_v55  ;;  %v8142_v39 = vld [vmem:[#allocation2 + $0xee0] ss:$16 sps:$4 sm:$0xff]   ;;  %v8153_v55 = vld [vmem:[#allocation2 + $0xb0c] ss:$16 sps:$4 sm:$0xff]  }
 0x1db   :  { %5086 = vmatprep.subr.bf16.mxu0 %v8072_v41  ;;  %v8150_v41 = vld [vmem:[#allocation2 + $0xf04] ss:$16 sps:$4 sm:$0xff]  }
 0x1dd   :  { %5517 = vmatpush1.bf16.msra.mxu1 %v8073_v45  ;;  %v8151_v45 = vld [vmem:[#allocation2 + $0xb08] ss:$16 sps:$4 sm:$0xff]  }
 0x1de   :  { %5087 = vmatpush1.bf16.msra.mxu0 %v8070_v43  ;;  %5518 = vmatprep.subr.bf16.mxu1 %v8081_v46  ;;  %v8148_v43 = vld [vmem:[#allocation2 + $0xf00] ss:$16 sps:$4 sm:$0xff]   ;;  %v8159_v46 = vld [vmem:[#allocation2 + $0xb2c] ss:$16 sps:$4 sm:$0xff]  }
 0x1df   :  { %5088 = vmatprep.subr.bf16.mxu0 %v8078_v15  ;;  %v8156_v15 = vld [vmem:[#allocation2 + $0xf24] ss:$16 sps:$4 sm:$0xff]  }
 0x1e1   :  { %5519 = vmatpush1.bf16.msra.mxu1 %v8079_v49  ;;  %v8157_v49 = vld [vmem:[#allocation2 + $0xb28] ss:$16 sps:$4 sm:$0xff]  }
 0x1e2   :  { %5089 = vmatpush1.bf16.msra.mxu0 %v8076_v48  ;;  %5520 = vmatprep.subr.bf16.mxu1 %v8087_v44  ;;  %v8154_v48 = vld [vmem:[#allocation2 + $0xf20] ss:$16 sps:$4 sm:$0xff]   ;;  %v8165_v44 = vld [vmem:[#allocation2 + $0xb4c] ss:$16 sps:$4 sm:$0xff]  }
 0x1e3   :  { %5090 = vmatprep.subr.bf16.mxu0 %v8084_v50  ;;  %v8162_v50 = vld [vmem:[#allocation2 + $0xf44] ss:$16 sps:$4 sm:$0xff]  }
 0x1e5   :  { %5521 = vmatpush1.bf16.msra.mxu1 %v8085_v52  ;;  %v8163_v52 = vld [vmem:[#allocation2 + $0xb48] ss:$16 sps:$4 sm:$0xff]  }
 0x1e6   :  { %5091 = vmatpush1.bf16.msra.mxu0 %v8082_v51  ;;  %5522 = vmatprep.subr.bf16.mxu1 %v8093_v24  ;;  %v8160_v51 = vld [vmem:[#allocation2 + $0xf40] ss:$16 sps:$4 sm:$0xff]   ;;  %v8171_v24 = vld [vmem:[#allocation2 + $0xb6c] ss:$16 sps:$4 sm:$0xff]  }
 0x1e7   :  { %5092 = vmatprep.subr.bf16.mxu0 %v8090_v53  ;;  %v8168_v53 = vld [vmem:[#allocation2 + $0xf64] ss:$16 sps:$4 sm:$0xff]  }
 0x1e9   :  { %5523 = vmatpush1.bf16.msra.mxu1 %v8091_v57  ;;  %v8169_v57 = vld [vmem:[#allocation2 + $0xb68] ss:$16 sps:$4 sm:$0xff]  }
 0x1ea   :  { %5093 = vmatpush1.bf16.msra.mxu0 %v8088_v56  ;;  %5524 = vmatprep.subr.bf16.mxu1 %v8099_v59  ;;  %v8166_v56 = vld [vmem:[#allocation2 + $0xf60] ss:$16 sps:$4 sm:$0xff]   ;;  %v8177_v59 = vld [vmem:[#allocation2 + $0xb8c] ss:$16 sps:$4 sm:$0xff]  }
 0x1eb   :  { %5094 = vmatprep.subr.bf16.mxu0 %v8096_v58  ;;  %v8174_v58 = vld [vmem:[#allocation2 + $0xf84] ss:$16 sps:$4 sm:$0xff]  }
 0x1ed   :  { %5525 = vmatpush1.bf16.msra.mxu1 %v8097_v61  ;;  %v8175_v61 = vld [vmem:[#allocation2 + $0xb88] ss:$16 sps:$4 sm:$0xff]  }
 0x1ee   :  { %5095 = vmatpush1.bf16.msra.mxu0 %v8094_v60  ;;  %5537 = vmatprep.subr.bf16.mxu1 %v8105_v63  ;;  %v8172_v60 = vld [vmem:[#allocation2 + $0xf80] ss:$16 sps:$4 sm:$0xff]   ;;  %v8183_v63 = vld [vmem:[#allocation2 + $0xbac] ss:$16 sps:$4 sm:$0xff]  }
 0x1ef   :  { %5107 = vmatprep.subr.bf16.mxu0 %v8102_v62  ;;  %v8180_v62 = vld [vmem:[#allocation2 + $0xfa4] ss:$16 sps:$4 sm:$0xff]  }
 0x1f0   :  { %5527 = vmatmul.mubr.bf16.vlgmr.msra.gmra.mrb[4].mxu1 %v9175_v42  ;;  %v8123_v42 = vld [vmem:[#allocation2 + $0xa6c] ss:$16 sps:$4 sm:$0xff]  }
 0x1f1   :  { %5097 = vmatmul.mubr.bf16.vlgmr.msra.gmra.mrb[0].mxu0 %v9226_v6  ;;  %5538 = vmatpush1.bf16.msra.mxu1 %v8103_v9  ;;  %v8187_v9 = vld [vmem:[#allocation2 + $0xbc8] ss:$16 sps:$4 sm:$0xff]  }
 0x1f2   :  { %5108 = vmatpush1.bf16.msra.mxu0 %v8100_v8  ;;  %5539 = vmatprep.subr.bf16.mxu1 %v8111_v11  ;;  %v8184_v8 = vld [vmem:[#allocation2 + $0xfc0] ss:$16 sps:$4 sm:$0xff]   ;;  %v8195_v11 = vld [vmem:[#allocation2 + $0xbec] ss:$16 sps:$4 sm:$0xff]  }
 0x1f3   :  { %5109 = vmatprep.subr.bf16.mxu0 %v8108_v10  ;;  %5139 = vmatprep.mubr.bf16.mxu0 %v9228_v38  ;;  %v8192_v10 = vld [vmem:[#allocation2 + $0xfe4] ss:$16 sps:$4 sm:$0xff]  }
 0x1f4   :  { %5569 = vmatprep.mubr.bf16.mxu1 %v9180_v47  ;;  %v8127_v47 = vld [vmem:[#allocation2 + $0xa88] ss:$16 sps:$4 sm:$0xff]  }
 0x1f5   :  { %5540 = vmatpush1.bf16.msra.mxu1 %v8109_v14  ;;  %v8193_v14 = vld [vmem:[#allocation2 + $0xbe8] ss:$16 sps:$4 sm:$0xff]  }
 0x1f6   :  { %5110 = vmatpush1.bf16.msra.mxu0 %v8106_v13  ;;  %5541 = vmatprep.subr.bf16.mxu1 %v8117_v17  ;;  %v8190_v13 = vld [vmem:[#allocation2 + $0xfe0] ss:$16 sps:$4 sm:$0xff]   ;;  %v8201_v17 = vld [vmem:[#allocation2 + $0xc0c] ss:$16 sps:$4 sm:$0xff]  }
 0x1f7   :  { %5111 = vmatprep.subr.bf16.mxu0 %v8114_v16  ;;  %v8198_v16 = vld [vmem:[#allocation2 + $0x1004] ss:$16 sps:$4 sm:$0xff]  }
 0x1f9   :  { %5542 = vmatpush1.bf16.msra.mxu1 %v8115_v19  ;;  %v142_v19 = vld [vmem:[%s9367_s0 + $0x130] sm:$0xff] }
 0x1fa   :  { %5112 = vmatpush1.bf16.msra.mxu0 %v8112_v18  ;;  %5543 = vmatprep.subr.bf16.mxu1 %v8123_v42  ;;  %v118_v18 = vld [vmem:[%s9367_s0 + $0x70] sm:$0xff]  ;;  %v145_v42 = vld [vmem:[%s9367_s0 + $0x148] sm:$0xff] }
 0x1fb   :  { %5113 = vmatprep.subr.bf16.mxu0 %v8120_v20  ;;  %v121_v20 = vld [vmem:[%s9367_s0 + $0x88] sm:$0xff] }
 0x1fd   :  { %5544 = vmatpush1.bf16.msra.mxu1 %v8121_v22  ;;  %v8196_v22 = vld [vmem:[#allocation2 + $0x1000] ss:$16 sps:$4 sm:$0xff]  }
 0x1fe   :  { %5114 = vmatpush1.bf16.msra.mxu0 %v8118_v21  ;;  %5545 = vmatprep.subr.bf16.mxu1 %v8129_v25  ;;  %v9246_v21 = vpack.c.bf16 %v142_v19, %v118_v18  ;;  %v8204_v25 = vld [vmem:[#allocation2 + $0x1024] ss:$16 sps:$4 sm:$0xff]   ;;  %v8274_v18 = vld [vmem:[#allocation2 + $0x11a0] ss:$16 sps:$4 sm:$0xff]   ;;  %v8277_v19 = vld [vmem:[#allocation2 + $0xda8] ss:$16 sps:$4 sm:$0xff]  }
 0x1ff   :  { %5115 = vmatprep.subr.bf16.mxu0 %v8126_v23  ;;  %v8199_v23 = vld [vmem:[#allocation2 + $0xc08] ss:$16 sps:$4 sm:$0xff]  }
 0x201   :  { %5546 = vmatpush1.bf16.msra.mxu1 %v8127_v47  ;;  %v9248_v47 = vpack.c.bf16 %v145_v42, %v121_v20  ;;  %v8282_v20 = vld [vmem:[#allocation2 + $0x11c4] ss:$16 sps:$4 sm:$0xff]   ;;  %v8285_v42 = vld [vmem:[#allocation2 + $0xdcc] ss:$16 sps:$4 sm:$0xff]  }
 0x202   :  { %5116 = vmatpush1.bf16.msra.mxu0 %v8124_v26  ;;  %5547 = vmatprep.subr.bf16.mxu1 %v8135_v28  ;;  %v8207_v26 = vld [vmem:[#allocation2 + $0xc2c] ss:$16 sps:$4 sm:$0xff]   ;;  %v8205_v28 = vld [vmem:[#allocation2 + $0xc28] ss:$16 sps:$4 sm:$0xff]  }
 0x203   :  { %5117 = vmatprep.subr.bf16.mxu0 %v8132_v27  ;;  %v8202_v27 = vld [vmem:[#allocation2 + $0x1020] ss:$16 sps:$4 sm:$0xff]  }
 0x205   :  { %5548 = vmatpush1.bf16.msra.mxu1 %v8133_v30  ;;  %v8213_v30 = vld [vmem:[#allocation2 + $0xc4c] ss:$16 sps:$4 sm:$0xff]  }
 0x206   :  { %5118 = vmatpush1.bf16.msra.mxu0 %v8130_v29  ;;  %5549 = vmatprep.subr.bf16.mxu1 %v8141_v32  ;;  %v8210_v29 = vld [vmem:[#allocation2 + $0x1044] ss:$16 sps:$4 sm:$0xff]   ;;  %v8211_v32 = vld [vmem:[#allocation2 + $0xc48] ss:$16 sps:$4 sm:$0xff]  }
 0x207   :  { %5119 = vmatprep.subr.bf16.mxu0 %v8138_v31  ;;  %v8208_v31 = vld [vmem:[#allocation2 + $0x1040] ss:$16 sps:$4 sm:$0xff]  }
 0x209   :  { %5550 = vmatpush1.bf16.msra.mxu1 %v8139_v35  ;;  %v8214_v35 = vld [vmem:[#allocation2 + $0x1060] ss:$16 sps:$4 sm:$0xff]  }
 0x20a   :  { %5120 = vmatpush1.bf16.msra.mxu0 %v8136_v34  ;;  %5551 = vmatprep.subr.bf16.mxu1 %v8147_v37  ;;  %v8216_v34 = vld [vmem:[#allocation2 + $0x1064] ss:$16 sps:$4 sm:$0xff]  }
 0x20b   :  { %5121 = vmatprep.subr.bf16.mxu0 %v8144_v36  ;;  %v8217_v36 = vld [vmem:[#allocation2 + $0xc68] ss:$16 sps:$4 sm:$0xff]   ;;  %v8222_v37 = vld [vmem:[#allocation2 + $0x1084] ss:$16 sps:$4 sm:$0xff]  }
 0x20d   :  { %5552 = vmatpush1.bf16.msra.mxu1 %v8145_v40  ;;  %v8220_v40 = vld [vmem:[#allocation2 + $0x1080] ss:$16 sps:$4 sm:$0xff]  }
 0x20e   :  { %5122 = vmatpush1.bf16.msra.mxu0 %v8142_v39  ;;  %5553 = vmatprep.subr.bf16.mxu1 %v8153_v55  ;;  %v8225_v39 = vld [vmem:[#allocation2 + $0xc8c] ss:$16 sps:$4 sm:$0xff]  }
 0x20f   :  { %5123 = vmatprep.subr.bf16.mxu0 %v8150_v41  ;;  %v8228_v41 = vld [vmem:[#allocation2 + $0x10a4] ss:$16 sps:$4 sm:$0xff]   ;;  %v8231_v55 = vld [vmem:[#allocation2 + $0xcac] ss:$16 sps:$4 sm:$0xff]  }
 0x211   :  { %5554 = vmatpush1.bf16.msra.mxu1 %v8151_v45  ;;  %v8229_v45 = vld [vmem:[#allocation2 + $0xca8] ss:$16 sps:$4 sm:$0xff]  }
 0x212   :  { %5124 = vmatpush1.bf16.msra.mxu0 %v8148_v43  ;;  %5555 = vmatprep.subr.bf16.mxu1 %v8159_v46  ;;  %v8226_v43 = vld [vmem:[#allocation2 + $0x10a0] ss:$16 sps:$4 sm:$0xff]   ;;  %v8237_v46 = vld [vmem:[#allocation2 + $0xccc] ss:$16 sps:$4 sm:$0xff]  }
 0x213   :  { %5125 = vmatprep.subr.bf16.mxu0 %v8156_v15  ;;  %v8234_v15 = vld [vmem:[#allocation2 + $0x10c4] ss:$16 sps:$4 sm:$0xff]  }
 0x215   :  { %5556 = vmatpush1.bf16.msra.mxu1 %v8157_v49  ;;  %v8235_v49 = vld [vmem:[#allocation2 + $0xcc8] ss:$16 sps:$4 sm:$0xff]  }
 0x216   :  { %5126 = vmatpush1.bf16.msra.mxu0 %v8154_v48  ;;  %5557 = vmatprep.subr.bf16.mxu1 %v8165_v44  ;;  %v8232_v48 = vld [vmem:[#allocation2 + $0x10c0] ss:$16 sps:$4 sm:$0xff]   ;;  %v8243_v44 = vld [vmem:[#allocation2 + $0xcec] ss:$16 sps:$4 sm:$0xff]  }
 0x217   :  { %5127 = vmatprep.subr.bf16.mxu0 %v8162_v50  ;;  %v8240_v50 = vld [vmem:[#allocation2 + $0x10e4] ss:$16 sps:$4 sm:$0xff]  }
 0x219   :  { %5558 = vmatpush1.bf16.msra.mxu1 %v8163_v52  ;;  %v8241_v52 = vld [vmem:[#allocation2 + $0xce8] ss:$16 sps:$4 sm:$0xff]  }
 0x21a   :  { %5128 = vmatpush1.bf16.msra.mxu0 %v8160_v51  ;;  %5559 = vmatprep.subr.bf16.mxu1 %v8171_v24  ;;  %v8238_v51 = vld [vmem:[#allocation2 + $0x10e0] ss:$16 sps:$4 sm:$0xff]   ;;  %v8249_v24 = vld [vmem:[#allocation2 + $0xd0c] ss:$16 sps:$4 sm:$0xff]  }
 0x21b   :  { %5129 = vmatprep.subr.bf16.mxu0 %v8168_v53  ;;  %v8246_v53 = vld [vmem:[#allocation2 + $0x1104] ss:$16 sps:$4 sm:$0xff]  }
 0x21d   :  { %5560 = vmatpush1.bf16.msra.mxu1 %v8169_v57  ;;  %v8247_v57 = vld [vmem:[#allocation2 + $0xd08] ss:$16 sps:$4 sm:$0xff]  }
 0x21e   :  { %5130 = vmatpush1.bf16.msra.mxu0 %v8166_v56  ;;  %5561 = vmatprep.subr.bf16.mxu1 %v8177_v59  ;;  %v8244_v56 = vld [vmem:[#allocation2 + $0x1100] ss:$16 sps:$4 sm:$0xff]   ;;  %v8255_v59 = vld [vmem:[#allocation2 + $0xd2c] ss:$16 sps:$4 sm:$0xff]  }
 0x21f   :  { %5131 = vmatprep.subr.bf16.mxu0 %v8174_v58  ;;  %v8252_v58 = vld [vmem:[#allocation2 + $0x1124] ss:$16 sps:$4 sm:$0xff]  }
 0x221   :  { %5562 = vmatpush1.bf16.msra.mxu1 %v8175_v61  ;;  %v8253_v61 = vld [vmem:[#allocation2 + $0xd28] ss:$16 sps:$4 sm:$0xff]  }
 0x222   :  { %5132 = vmatpush1.bf16.msra.mxu0 %v8172_v60  ;;  %5563 = vmatprep.subr.bf16.mxu1 %v8183_v63  ;;  %v8250_v60 = vld [vmem:[#allocation2 + $0x1120] ss:$16 sps:$4 sm:$0xff]   ;;  %v8261_v63 = vld [vmem:[#allocation2 + $0xd4c] ss:$16 sps:$4 sm:$0xff]  }
 0x223   :  { %5133 = vmatprep.subr.bf16.mxu0 %v8180_v62  ;;  %v8258_v62 = vld [vmem:[#allocation2 + $0x1144] ss:$16 sps:$4 sm:$0xff]  }
 0x225   :  { %5564 = vmatpush1.bf16.msra.mxu1 %v8181_v1  ;;  %v8259_v1 = vld [vmem:[#allocation2 + $0xd48] ss:$16 sps:$4 sm:$0xff]  }
 0x226   :  { %5134 = vmatpush1.bf16.msra.mxu0 %v8178_v0  ;;  %5565 = vmatprep.subr.bf16.mxu1 %v8189_v12  ;;  %v8256_v0 = vld [vmem:[#allocation2 + $0x1140] ss:$16 sps:$4 sm:$0xff]   ;;  %v8267_v12 = vld [vmem:[#allocation2 + $0xd6c] ss:$16 sps:$4 sm:$0xff]  }
 0x227   :  { %5135 = vmatprep.subr.bf16.mxu0 %v8186_v4  ;;  %v8264_v4 = vld [vmem:[#allocation2 + $0x1164] ss:$16 sps:$4 sm:$0xff]  }
 0x229   :  { %5566 = vmatpush1.bf16.msra.mxu1 %v8187_v9  ;;  %v8265_v9 = vld [vmem:[#allocation2 + $0xd68] ss:$16 sps:$4 sm:$0xff]  }
 0x22a   :  { %5136 = vmatpush1.bf16.msra.mxu0 %v8184_v8  ;;  %5567 = vmatprep.subr.bf16.mxu1 %v8195_v11  ;;  %v8262_v8 = vld [vmem:[#allocation2 + $0x1160] ss:$16 sps:$4 sm:$0xff]   ;;  %v8273_v11 = vld [vmem:[#allocation2 + $0xd8c] ss:$16 sps:$4 sm:$0xff]  }
 0x22b   :  { %5137 = vmatprep.subr.bf16.mxu0 %v8192_v10  ;;  %v8270_v10 = vld [vmem:[#allocation2 + $0x1184] ss:$16 sps:$4 sm:$0xff]  }
 0x22d   :  { %5568 = vmatpush1.bf16.msra.mxu1 %v8193_v14  ;;  %v8271_v14 = vld [vmem:[#allocation2 + $0xd88] ss:$16 sps:$4 sm:$0xff]  }
 0x22e   :  { %5138 = vmatpush1.bf16.msra.mxu0 %v8190_v13  ;;  %5580 = vmatprep.subr.bf16.mxu1 %v8201_v17  ;;  %v8268_v13 = vld [vmem:[#allocation2 + $0x1180] ss:$16 sps:$4 sm:$0xff]   ;;  %v8279_v17 = vld [vmem:[#allocation2 + $0xdac] ss:$16 sps:$4 sm:$0xff]  }
 0x22f   :  { %5150 = vmatprep.subr.bf16.mxu0 %v8198_v16  ;;  %v8276_v16 = vld [vmem:[#allocation2 + $0x11a4] ss:$16 sps:$4 sm:$0xff]  }
 0x230   :  { %5570 = vmatmul.mubr.bf16.vlgmr.msra.gmra.mrb[4].mxu1 %v9206_v54  ;;  %v8219_v54 = vld [vmem:[#allocation2 + $0xc6c] ss:$16 sps:$4 sm:$0xff]  }
 0x231   :  { %5140 = vmatmul.mubr.bf16.vlgmr.msra.gmra.mrb[0].mxu0 %v9246_v21  ;;  %5581 = vmatpush1.bf16.msra.mxu1 %v8199_v23  ;;  %v8283_v23 = vld [vmem:[#allocation2 + $0xdc8] ss:$16 sps:$4 sm:$0xff]  }
 0x232   :  { %5151 = vmatpush1.bf16.msra.mxu0 %v8196_v22  ;;  %5582 = vmatprep.subr.bf16.mxu1 %v8207_v26  ;;  %v8280_v22 = vld [vmem:[#allocation2 + $0x11c0] ss:$16 sps:$4 sm:$0xff]   ;;  %v8291_v26 = vld [vmem:[#allocation2 + $0xdec] ss:$16 sps:$4 sm:$0xff]  }
 0x233   :  { %5152 = vmatprep.subr.bf16.mxu0 %v8204_v25  ;;  %5182 = vmatprep.mubr.bf16.mxu0 %v9248_v47  ;;  %v8288_v25 = vld [vmem:[#allocation2 + $0x11e4] ss:$16 sps:$4 sm:$0xff]  }
 0x234   :  { %5612 = vmatprep.mubr.bf16.mxu1 %v9208_v33  ;;  %v8223_v33 = vld [vmem:[#allocation2 + $0xc88] ss:$16 sps:$4 sm:$0xff]  }
 0x235   :  { %5583 = vmatpush1.bf16.msra.mxu1 %v8205_v28  ;;  %v8289_v28 = vld [vmem:[#allocation2 + $0xde8] ss:$16 sps:$4 sm:$0xff]  }
 0x236   :  { %5153 = vmatpush1.bf16.msra.mxu0 %v8202_v27  ;;  %5584 = vmatprep.subr.bf16.mxu1 %v8213_v30  ;;  %v8286_v27 = vld [vmem:[#allocation2 + $0x11e0] ss:$16 sps:$4 sm:$0xff]   ;;  %v8297_v30 = vld [vmem:[#allocation2 + $0xe0c] ss:$16 sps:$4 sm:$0xff]  }
 0x237   :  { %5154 = vmatprep.subr.bf16.mxu0 %v8210_v29  ;;  %v8294_v29 = vld [vmem:[#allocation2 + $0x1204] ss:$16 sps:$4 sm:$0xff]  }
 0x239   :  { %5585 = vmatpush1.bf16.msra.mxu1 %v8211_v32  ;;  %v144_v32 = vld [vmem:[%s9367_s0 + $0x140] sm:$0xff] }
 0x23a   :  { %5155 = vmatpush1.bf16.msra.mxu0 %v8208_v31  ;;  %5586 = vmatprep.subr.bf16.mxu1 %v8219_v54  ;;  %v120_v31 = vld [vmem:[%s9367_s0 + $0x80] sm:$0xff]  ;;  %v147_v54 = vld [vmem:[%s9367_s0 + $0x158] sm:$0xff] }
 0x23b   :  { %5156 = vmatprep.subr.bf16.mxu0 %v8216_v34  ;;  %v123_v34 = vld [vmem:[%s9367_s0 + $0x98] sm:$0xff] }
 0x23d   :  { %5587 = vmatpush1.bf16.msra.mxu1 %v8217_v36  ;;  %v8292_v36 = vld [vmem:[#allocation2 + $0x1200] ss:$16 sps:$4 sm:$0xff]  }
 0x23e   :  { %5157 = vmatpush1.bf16.msra.mxu0 %v8214_v35  ;;  %5588 = vmatprep.subr.bf16.mxu1 %v8225_v39  ;;  %v9266_v35 = vpack.c.bf16 %v144_v32, %v120_v31  ;;  %v8300_v39 = vld [vmem:[#allocation2 + $0x1224] ss:$16 sps:$4 sm:$0xff]   ;;  %v8370_v31 = vld [vmem:[#allocation2 + $0x13a0] ss:$16 sps:$4 sm:$0xff]   ;;  %v8373_v32 = vld [vmem:[#allocation2 + $0xfa8] ss:$16 sps:$4 sm:$0xff]  }
 0x23f   :  { %5158 = vmatprep.subr.bf16.mxu0 %v8222_v37  ;;  %v8295_v37 = vld [vmem:[#allocation2 + $0xe08] ss:$16 sps:$4 sm:$0xff]  }
 0x241   :  { %5589 = vmatpush1.bf16.msra.mxu1 %v8223_v33  ;;  %v9268_v33 = vpack.c.bf16 %v147_v54, %v123_v34  ;;  %v8378_v34 = vld [vmem:[#allocation2 + $0x13c4] ss:$16 sps:$4 sm:$0xff]   ;;  %v8381_v54 = vld [vmem:[#allocation2 + $0xfcc] ss:$16 sps:$4 sm:$0xff]  }
 0x242   :  { %5159 = vmatpush1.bf16.msra.mxu0 %v8220_v40  ;;  %5590 = vmatprep.subr.bf16.mxu1 %v8231_v55  ;;  %v8303_v40 = vld [vmem:[#allocation2 + $0xe2c] ss:$16 sps:$4 sm:$0xff]   ;;  %v8301_v55 = vld [vmem:[#allocation2 + $0xe28] ss:$16 sps:$4 sm:$0xff]  }
 0x243   :  { %5160 = vmatprep.subr.bf16.mxu0 %v8228_v41  ;;  %v8298_v41 = vld [vmem:[#allocation2 + $0x1220] ss:$16 sps:$4 sm:$0xff]  }
 0x245   :  { %5591 = vmatpush1.bf16.msra.mxu1 %v8229_v45  ;;  %v8309_v45 = vld [vmem:[#allocation2 + $0xe4c] ss:$16 sps:$4 sm:$0xff]  }
 0x246   :  { %5161 = vmatpush1.bf16.msra.mxu0 %v8226_v43  ;;  %5592 = vmatprep.subr.bf16.mxu1 %v8237_v46  ;;  %v8306_v43 = vld [vmem:[#allocation2 + $0x1244] ss:$16 sps:$4 sm:$0xff]   ;;  %v8307_v46 = vld [vmem:[#allocation2 + $0xe48] ss:$16 sps:$4 sm:$0xff]  }
 0x247   :  { %5162 = vmatprep.subr.bf16.mxu0 %v8234_v15  ;;  %v8304_v15 = vld [vmem:[#allocation2 + $0x1240] ss:$16 sps:$4 sm:$0xff]  }
 0x249   :  { %5593 = vmatpush1.bf16.msra.mxu1 %v8235_v49  ;;  %v8310_v49 = vld [vmem:[#allocation2 + $0x1260] ss:$16 sps:$4 sm:$0xff]  }
 0x24a   :  { %5163 = vmatpush1.bf16.msra.mxu0 %v8232_v48  ;;  %5594 = vmatprep.subr.bf16.mxu1 %v8243_v44  ;;  %v8312_v48 = vld [vmem:[#allocation2 + $0x1264] ss:$16 sps:$4 sm:$0xff]  }
 0x24b   :  { %5164 = vmatprep.subr.bf16.mxu0 %v8240_v50  ;;  %v8313_v50 = vld [vmem:[#allocation2 + $0xe68] ss:$16 sps:$4 sm:$0xff]   ;;  %v8318_v44 = vld [vmem:[#allocation2 + $0x1284] ss:$16 sps:$4 sm:$0xff]  }
 0x24d   :  { %5595 = vmatpush1.bf16.msra.mxu1 %v8241_v52  ;;  %v8316_v52 = vld [vmem:[#allocation2 + $0x1280] ss:$16 sps:$4 sm:$0xff]  }
 0x24e   :  { %5165 = vmatpush1.bf16.msra.mxu0 %v8238_v51  ;;  %5596 = vmatprep.subr.bf16.mxu1 %v8249_v24  ;;  %v8321_v51 = vld [vmem:[#allocation2 + $0xe8c] ss:$16 sps:$4 sm:$0xff]  }
 0x24f   :  { %5166 = vmatprep.subr.bf16.mxu0 %v8246_v53  ;;  %v8324_v53 = vld [vmem:[#allocation2 + $0x12a4] ss:$16 sps:$4 sm:$0xff]   ;;  %v8327_v24 = vld [vmem:[#allocation2 + $0xeac] ss:$16 sps:$4 sm:$0xff]  }
 0x251   :  { %5597 = vmatpush1.bf16.msra.mxu1 %v8247_v57  ;;  %v8325_v57 = vld [vmem:[#allocation2 + $0xea8] ss:$16 sps:$4 sm:$0xff]  }
 0x252   :  { %5167 = vmatpush1.bf16.msra.mxu0 %v8244_v56  ;;  %5598 = vmatprep.subr.bf16.mxu1 %v8255_v59  ;;  %v8322_v56 = vld [vmem:[#allocation2 + $0x12a0] ss:$16 sps:$4 sm:$0xff]   ;;  %v8333_v59 = vld [vmem:[#allocation2 + $0xecc] ss:$16 sps:$4 sm:$0xff]  }
 0x253   :  { %5168 = vmatprep.subr.bf16.mxu0 %v8252_v58  ;;  %v8330_v58 = vld [vmem:[#allocation2 + $0x12c4] ss:$16 sps:$4 sm:$0xff]  }
 0x255   :  { %5599 = vmatpush1.bf16.msra.mxu1 %v8253_v61  ;;  %v8331_v61 = vld [vmem:[#allocation2 + $0xec8] ss:$16 sps:$4 sm:$0xff]  }
 0x256   :  { %5169 = vmatpush1.bf16.msra.mxu0 %v8250_v60  ;;  %5600 = vmatprep.subr.bf16.mxu1 %v8261_v63  ;;  %v8328_v60 = vld [vmem:[#allocation2 + $0x12c0] ss:$16 sps:$4 sm:$0xff]   ;;  %v8339_v63 = vld [vmem:[#allocation2 + $0xeec] ss:$16 sps:$4 sm:$0xff]  }
 0x257   :  { %5170 = vmatprep.subr.bf16.mxu0 %v8258_v62  ;;  %v8336_v62 = vld [vmem:[#allocation2 + $0x12e4] ss:$16 sps:$4 sm:$0xff]  }
 0x259   :  { %5601 = vmatpush1.bf16.msra.mxu1 %v8259_v1  ;;  %v8337_v1 = vld [vmem:[#allocation2 + $0xee8] ss:$16 sps:$4 sm:$0xff]  }
 0x25a   :  { %5171 = vmatpush1.bf16.msra.mxu0 %v8256_v0  ;;  %5602 = vmatprep.subr.bf16.mxu1 %v8267_v12  ;;  %v8334_v0 = vld [vmem:[#allocation2 + $0x12e0] ss:$16 sps:$4 sm:$0xff]   ;;  %v8345_v12 = vld [vmem:[#allocation2 + $0xf0c] ss:$16 sps:$4 sm:$0xff]  }
 0x25b   :  { %5172 = vmatprep.subr.bf16.mxu0 %v8264_v4  ;;  %v8342_v4 = vld [vmem:[#allocation2 + $0x1304] ss:$16 sps:$4 sm:$0xff]  }
 0x25d   :  { %5603 = vmatpush1.bf16.msra.mxu1 %v8265_v9  ;;  %v8343_v9 = vld [vmem:[#allocation2 + $0xf08] ss:$16 sps:$4 sm:$0xff]  }
 0x25e   :  { %5173 = vmatpush1.bf16.msra.mxu0 %v8262_v8  ;;  %5604 = vmatprep.subr.bf16.mxu1 %v8273_v11  ;;  %v8340_v8 = vld [vmem:[#allocation2 + $0x1300] ss:$16 sps:$4 sm:$0xff]   ;;  %v8351_v11 = vld [vmem:[#allocation2 + $0xf2c] ss:$16 sps:$4 sm:$0xff]  }
 0x25f   :  { %5174 = vmatprep.subr.bf16.mxu0 %v8270_v10  ;;  %v8348_v10 = vld [vmem:[#allocation2 + $0x1324] ss:$16 sps:$4 sm:$0xff]  }
 0x261   :  { %5605 = vmatpush1.bf16.msra.mxu1 %v8271_v14  ;;  %v8349_v14 = vld [vmem:[#allocation2 + $0xf28] ss:$16 sps:$4 sm:$0xff]  }
 0x262   :  { %5175 = vmatpush1.bf16.msra.mxu0 %v8268_v13  ;;  %5606 = vmatprep.subr.bf16.mxu1 %v8279_v17  ;;  %v8346_v13 = vld [vmem:[#allocation2 + $0x1320] ss:$16 sps:$4 sm:$0xff]   ;;  %v8357_v17 = vld [vmem:[#allocation2 + $0xf4c] ss:$16 sps:$4 sm:$0xff]  }
 0x263   :  { %5176 = vmatprep.subr.bf16.mxu0 %v8276_v16  ;;  %v8354_v16 = vld [vmem:[#allocation2 + $0x1344] ss:$16 sps:$4 sm:$0xff]  }
 0x265   :  { %5607 = vmatpush1.bf16.msra.mxu1 %v8277_v19  ;;  %v8355_v19 = vld [vmem:[#allocation2 + $0xf48] ss:$16 sps:$4 sm:$0xff]  }
 0x266   :  { %5177 = vmatpush1.bf16.msra.mxu0 %v8274_v18  ;;  %5608 = vmatprep.subr.bf16.mxu1 %v8285_v42  ;;  %v8352_v18 = vld [vmem:[#allocation2 + $0x1340] ss:$16 sps:$4 sm:$0xff]   ;;  %v8363_v42 = vld [vmem:[#allocation2 + $0xf6c] ss:$16 sps:$4 sm:$0xff]  }
 0x267   :  { %5178 = vmatprep.subr.bf16.mxu0 %v8282_v20  ;;  %v8360_v20 = vld [vmem:[#allocation2 + $0x1364] ss:$16 sps:$4 sm:$0xff]  }
 0x269   :  { %5609 = vmatpush1.bf16.msra.mxu1 %v8283_v23  ;;  %v8361_v23 = vld [vmem:[#allocation2 + $0xf68] ss:$16 sps:$4 sm:$0xff]  }
 0x26a   :  { %5179 = vmatpush1.bf16.msra.mxu0 %v8280_v22  ;;  %5610 = vmatprep.subr.bf16.mxu1 %v8291_v26  ;;  %v8358_v22 = vld [vmem:[#allocation2 + $0x1360] ss:$16 sps:$4 sm:$0xff]   ;;  %v8369_v26 = vld [vmem:[#allocation2 + $0xf8c] ss:$16 sps:$4 sm:$0xff]  }
 0x26b   :  { %5180 = vmatprep.subr.bf16.mxu0 %v8288_v25  ;;  %v8366_v25 = vld [vmem:[#allocation2 + $0x1384] ss:$16 sps:$4 sm:$0xff]  }
 0x26d   :  { %5611 = vmatpush1.bf16.msra.mxu1 %v8289_v28  ;;  %v8367_v28 = vld [vmem:[#allocation2 + $0xf88] ss:$16 sps:$4 sm:$0xff]  }
 0x26e   :  { %5181 = vmatpush1.bf16.msra.mxu0 %v8286_v27  ;;  %5623 = vmatprep.subr.bf16.mxu1 %v8297_v30  ;;  %v8364_v27 = vld [vmem:[#allocation2 + $0x1380] ss:$16 sps:$4 sm:$0xff]   ;;  %v8375_v30 = vld [vmem:[#allocation2 + $0xfac] ss:$16 sps:$4 sm:$0xff]  }
 0x26f   :  { %5193 = vmatprep.subr.bf16.mxu0 %v8294_v29  ;;  %v8372_v29 = vld [vmem:[#allocation2 + $0x13a4] ss:$16 sps:$4 sm:$0xff]  }
 0x270   :  { %5613 = vmatmul.mubr.bf16.vlgmr.msra.gmra.mrb[4].mxu1 %v9226_v6  ;;  %v8315_v6 = vld [vmem:[#allocation2 + $0xe6c] ss:$16 sps:$4 sm:$0xff]  }
 0x271   :  { %5183 = vmatmul.mubr.bf16.vlgmr.msra.gmra.mrb[0].mxu0 %v9266_v35  ;;  %5624 = vmatpush1.bf16.msra.mxu1 %v8295_v37  ;;  %v8379_v37 = vld [vmem:[#allocation2 + $0xfc8] ss:$16 sps:$4 sm:$0xff]  }
 0x272   :  { %5194 = vmatpush1.bf16.msra.mxu0 %v8292_v36  ;;  %5625 = vmatprep.subr.bf16.mxu1 %v8303_v40  ;;  %v8376_v36 = vld [vmem:[#allocation2 + $0x13c0] ss:$16 sps:$4 sm:$0xff]   ;;  %v8387_v40 = vld [vmem:[#allocation2 + $0xfec] ss:$16 sps:$4 sm:$0xff]  }
 0x273   :  { %5195 = vmatprep.subr.bf16.mxu0 %v8300_v39  ;;  %5225 = vmatprep.mubr.bf16.mxu0 %v9268_v33  ;;  %v8384_v39 = vld [vmem:[#allocation2 + $0x13e4] ss:$16 sps:$4 sm:$0xff]  }
 0x274   :  { %5655 = vmatprep.mubr.bf16.mxu1 %v9228_v38  ;;  %v8319_v38 = vld [vmem:[#allocation2 + $0xe88] ss:$16 sps:$4 sm:$0xff]  }
 0x275   :  { %5626 = vmatpush1.bf16.msra.mxu1 %v8301_v55  ;;  %v8385_v55 = vld [vmem:[#allocation2 + $0xfe8] ss:$16 sps:$4 sm:$0xff]  }
 0x276   :  { %5196 = vmatpush1.bf16.msra.mxu0 %v8298_v41  ;;  %5627 = vmatprep.subr.bf16.mxu1 %v8309_v45  ;;  %v8382_v41 = vld [vmem:[#allocation2 + $0x13e0] ss:$16 sps:$4 sm:$0xff]  }
 0x277   :  { %5197 = vmatprep.subr.bf16.mxu0 %v8306_v43  ;;  %v122_v43 = vld [vmem:[%s9367_s0 + $0x90] sm:$0xff] }
 0x278   :  { %v146_v45 = vld [vmem:[%s9367_s0 + $0x150] sm:$0xff] }
 0x279   :  { %5628 = vmatpush1.bf16.msra.mxu1 %v8307_v46  ;;  %v8393_v46 = vld [vmem:[#allocation2 + $0x100c] ss:$16 sps:$4 sm:$0xff]  }
 0x27a   :  { %5198 = vmatpush1.bf16.msra.mxu0 %v8304_v15  ;;  %5629 = vmatprep.subr.bf16.mxu1 %v8315_v6  ;;  %v8390_v15 = vld [vmem:[#allocation2 + $0x1404] ss:$16 sps:$4 sm:$0xff]   ;;  %v125_v6 = vld [vmem:[%s9367_s0 + $0xa8] sm:$0xff] }
 0x27b   :  { %5199 = vmatprep.subr.bf16.mxu0 %v8312_v48  ;;  %v9280_v48 = vpack.c.bf16 %v146_v45, %v122_v43  ;;  %v8468_v43 = vld [vmem:[#allocation2 + $0x15a4] ss:$16 sps:$4 sm:$0xff]   ;;  %v8471_v45 = vld [vmem:[#allocation2 + $0x11ac] ss:$16 sps:$4 sm:$0xff]  }
 0x27d   :  { %5630 = vmatpush1.bf16.msra.mxu1 %v8313_v50  ;;  %v8388_v50 = vld [vmem:[#allocation2 + $0x1400] ss:$16 sps:$4 sm:$0xff]  }
 0x27e   :  { %5200 = vmatpush1.bf16.msra.mxu0 %v8310_v49  ;;  %5631 = vmatprep.subr.bf16.mxu1 %v8321_v51  ;;  %v149_v49 = vld [vmem:[%s9367_s0 + $0x168] sm:$0xff]  ;;  %v8396_v51 = vld [vmem:[#allocation2 + $0x1424] ss:$16 sps:$4 sm:$0xff]  }
 0x27f   :  { %5201 = vmatprep.subr.bf16.mxu0 %v8318_v44  ;;  %v8391_v44 = vld [vmem:[#allocation2 + $0x1008] ss:$16 sps:$4 sm:$0xff]  }
 0x281   :  { %5632 = vmatpush1.bf16.msra.mxu1 %v8319_v38  ;;  %v9288_v38 = vpack.c.bf16 %v149_v49, %v125_v6  ;;  %v8474_v6 = vld [vmem:[#allocation2 + $0x15c4] ss:$16 sps:$4 sm:$0xff]   ;;  %v8477_v49 = vld [vmem:[#allocation2 + $0x11cc] ss:$16 sps:$4 sm:$0xff]  }
 0x282   :  { %5202 = vmatpush1.bf16.msra.mxu0 %v8316_v52  ;;  %5633 = vmatprep.subr.bf16.mxu1 %v8327_v24  ;;  %v8399_v52 = vld [vmem:[#allocation2 + $0x102c] ss:$16 sps:$4 sm:$0xff]   ;;  %v8397_v24 = vld [vmem:[#allocation2 + $0x1028] ss:$16 sps:$4 sm:$0xff]  }
 0x283   :  { %5203 = vmatprep.subr.bf16.mxu0 %v8324_v53  ;;  %v8394_v53 = vld [vmem:[#allocation2 + $0x1420] ss:$16 sps:$4 sm:$0xff]  }
 0x285   :  { %5634 = vmatpush1.bf16.msra.mxu1 %v8325_v57  ;;  %v8405_v57 = vld [vmem:[#allocation2 + $0x104c] ss:$16 sps:$4 sm:$0xff]  }
 0x286   :  { %5204 = vmatpush1.bf16.msra.mxu0 %v8322_v56  ;;  %5635 = vmatprep.subr.bf16.mxu1 %v8333_v59  ;;  %v8402_v56 = vld [vmem:[#allocation2 + $0x1444] ss:$16 sps:$4 sm:$0xff]   ;;  %v8403_v59 = vld [vmem:[#allocation2 + $0x1048] ss:$16 sps:$4 sm:$0xff]  }
 0x287   :  { %5205 = vmatprep.subr.bf16.mxu0 %v8330_v58  ;;  %v8400_v58 = vld [vmem:[#allocation2 + $0x1440] ss:$16 sps:$4 sm:$0xff]  }
 0x289   :  { %5636 = vmatpush1.bf16.msra.mxu1 %v8331_v61  ;;  %v8406_v61 = vld [vmem:[#allocation2 + $0x1460] ss:$16 sps:$4 sm:$0xff]  }
 0x28a   :  { %5206 = vmatpush1.bf16.msra.mxu0 %v8328_v60  ;;  %5637 = vmatprep.subr.bf16.mxu1 %v8339_v63  ;;  %v8408_v60 = vld [vmem:[#allocation2 + $0x1464] ss:$16 sps:$4 sm:$0xff]  }
 0x28b   :  { %5207 = vmatprep.subr.bf16.mxu0 %v8336_v62  ;;  %v8409_v62 = vld [vmem:[#allocation2 + $0x1068] ss:$16 sps:$4 sm:$0xff]   ;;  %v8414_v63 = vld [vmem:[#allocation2 + $0x1484] ss:$16 sps:$4 sm:$0xff]  }
 0x28d   :  { %5638 = vmatpush1.bf16.msra.mxu1 %v8337_v1  ;;  %v8412_v1 = vld [vmem:[#allocation2 + $0x1480] ss:$16 sps:$4 sm:$0xff]  }
 0x28e   :  { %5208 = vmatpush1.bf16.msra.mxu0 %v8334_v0  ;;  %5639 = vmatprep.subr.bf16.mxu1 %v8345_v12  ;;  %v8417_v0 = vld [vmem:[#allocation2 + $0x108c] ss:$16 sps:$4 sm:$0xff]  }
 0x28f   :  { %5209 = vmatprep.subr.bf16.mxu0 %v8342_v4  ;;  %v8420_v4 = vld [vmem:[#allocation2 + $0x14a4] ss:$16 sps:$4 sm:$0xff]   ;;  %v8423_v12 = vld [vmem:[#allocation2 + $0x10ac] ss:$16 sps:$4 sm:$0xff]  }
 0x291   :  { %5640 = vmatpush1.bf16.msra.mxu1 %v8343_v9  ;;  %v8421_v9 = vld [vmem:[#allocation2 + $0x10a8] ss:$16 sps:$4 sm:$0xff]  }
 0x292   :  { %5210 = vmatpush1.bf16.msra.mxu0 %v8340_v8  ;;  %5641 = vmatprep.subr.bf16.mxu1 %v8351_v11  ;;  %v8418_v8 = vld [vmem:[#allocation2 + $0x14a0] ss:$16 sps:$4 sm:$0xff]   ;;  %v8429_v11 = vld [vmem:[#allocation2 + $0x10cc] ss:$16 sps:$4 sm:$0xff]  }
 0x293   :  { %5211 = vmatprep.subr.bf16.mxu0 %v8348_v10  ;;  %v8426_v10 = vld [vmem:[#allocation2 + $0x14c4] ss:$16 sps:$4 sm:$0xff]  }
 0x295   :  { %5642 = vmatpush1.bf16.msra.mxu1 %v8349_v14  ;;  %v8427_v14 = vld [vmem:[#allocation2 + $0x10c8] ss:$16 sps:$4 sm:$0xff]  }
 0x296   :  { %5212 = vmatpush1.bf16.msra.mxu0 %v8346_v13  ;;  %5643 = vmatprep.subr.bf16.mxu1 %v8357_v17  ;;  %v8424_v13 = vld [vmem:[#allocation2 + $0x14c0] ss:$16 sps:$4 sm:$0xff]   ;;  %v8435_v17 = vld [vmem:[#allocation2 + $0x10ec] ss:$16 sps:$4 sm:$0xff]  }
 0x297   :  { %5213 = vmatprep.subr.bf16.mxu0 %v8354_v16  ;;  %v8432_v16 = vld [vmem:[#allocation2 + $0x14e4] ss:$16 sps:$4 sm:$0xff]  }
 0x299   :  { %5644 = vmatpush1.bf16.msra.mxu1 %v8355_v19  ;;  %v8433_v19 = vld [vmem:[#allocation2 + $0x10e8] ss:$16 sps:$4 sm:$0xff]  }
 0x29a   :  { %5214 = vmatpush1.bf16.msra.mxu0 %v8352_v18  ;;  %5645 = vmatprep.subr.bf16.mxu1 %v8363_v42  ;;  %v8430_v18 = vld [vmem:[#allocation2 + $0x14e0] ss:$16 sps:$4 sm:$0xff]   ;;  %v8441_v42 = vld [vmem:[#allocation2 + $0x110c] ss:$16 sps:$4 sm:$0xff]  }
 0x29b   :  { %5215 = vmatprep.subr.bf16.mxu0 %v8360_v20  ;;  %v8438_v20 = vld [vmem:[#allocation2 + $0x1504] ss:$16 sps:$4 sm:$0xff]  }
 0x29d   :  { %5646 = vmatpush1.bf16.msra.mxu1 %v8361_v23  ;;  %v8439_v23 = vld [vmem:[#allocation2 + $0x1108] ss:$16 sps:$4 sm:$0xff]  }
 0x29e   :  { %5216 = vmatpush1.bf16.msra.mxu0 %v8358_v22  ;;  %5647 = vmatprep.subr.bf16.mxu1 %v8369_v26  ;;  %v8436_v22 = vld [vmem:[#allocation2 + $0x1500] ss:$16 sps:$4 sm:$0xff]   ;;  %v8447_v26 = vld [vmem:[#allocation2 + $0x112c] ss:$16 sps:$4 sm:$0xff]  }
 0x29f   :  { %5217 = vmatprep.subr.bf16.mxu0 %v8366_v25  ;;  %v8444_v25 = vld [vmem:[#allocation2 + $0x1524] ss:$16 sps:$4 sm:$0xff]  }
 0x2a1   :  { %5648 = vmatpush1.bf16.msra.mxu1 %v8367_v28  ;;  %v8445_v28 = vld [vmem:[#allocation2 + $0x1128] ss:$16 sps:$4 sm:$0xff]  }
 0x2a2   :  { %5218 = vmatpush1.bf16.msra.mxu0 %v8364_v27  ;;  %5649 = vmatprep.subr.bf16.mxu1 %v8375_v30  ;;  %v8442_v27 = vld [vmem:[#allocation2 + $0x1520] ss:$16 sps:$4 sm:$0xff]   ;;  %v8453_v30 = vld [vmem:[#allocation2 + $0x114c] ss:$16 sps:$4 sm:$0xff]  }
 0x2a3   :  { %5219 = vmatprep.subr.bf16.mxu0 %v8372_v29  ;;  %v8450_v29 = vld [vmem:[#allocation2 + $0x1544] ss:$16 sps:$4 sm:$0xff]  }
 0x2a5   :  { %5650 = vmatpush1.bf16.msra.mxu1 %v8373_v32  ;;  %v8451_v32 = vld [vmem:[#allocation2 + $0x1148] ss:$16 sps:$4 sm:$0xff]  }
 0x2a6   :  { %5220 = vmatpush1.bf16.msra.mxu0 %v8370_v31  ;;  %5651 = vmatprep.subr.bf16.mxu1 %v8381_v54  ;;  %v8448_v31 = vld [vmem:[#allocation2 + $0x1540] ss:$16 sps:$4 sm:$0xff]   ;;  %v8459_v54 = vld [vmem:[#allocation2 + $0x116c] ss:$16 sps:$4 sm:$0xff]  }
 0x2a7   :  { %5221 = vmatprep.subr.bf16.mxu0 %v8378_v34  ;;  %v8456_v34 = vld [vmem:[#allocation2 + $0x1564] ss:$16 sps:$4 sm:$0xff]  }
 0x2a9   :  { %5652 = vmatpush1.bf16.msra.mxu1 %v8379_v37  ;;  %v8457_v37 = vld [vmem:[#allocation2 + $0x1168] ss:$16 sps:$4 sm:$0xff]  }
 0x2aa   :  { %5222 = vmatpush1.bf16.msra.mxu0 %v8376_v36  ;;  %5653 = vmatprep.subr.bf16.mxu1 %v8387_v40  ;;  %v8454_v36 = vld [vmem:[#allocation2 + $0x1560] ss:$16 sps:$4 sm:$0xff]   ;;  %v8465_v40 = vld [vmem:[#allocation2 + $0x118c] ss:$16 sps:$4 sm:$0xff]  }
 0x2ab   :  { %5223 = vmatprep.subr.bf16.mxu0 %v8384_v39  ;;  %v8462_v39 = vld [vmem:[#allocation2 + $0x1584] ss:$16 sps:$4 sm:$0xff]  }
 0x2ad   :  { %5654 = vmatpush1.bf16.msra.mxu1 %v8385_v55  ;;  %v8463_v55 = vld [vmem:[#allocation2 + $0x1188] ss:$16 sps:$4 sm:$0xff]  }
 0x2ae   :  { %5224 = vmatpush1.bf16.msra.mxu0 %v8382_v41  ;;  %5666 = vmatprep.subr.bf16.mxu1 %v8393_v46  ;;  %v8460_v41 = vld [vmem:[#allocation2 + $0x1580] ss:$16 sps:$4 sm:$0xff]   ;;  %v8469_v46 = vld [vmem:[#allocation2 + $0x11a8] ss:$16 sps:$4 sm:$0xff]  }
 0x2af   :  { %5236 = vmatprep.subr.bf16.mxu0 %v8390_v15  ;;  %v8466_v15 = vld [vmem:[#allocation2 + $0x15a0] ss:$16 sps:$4 sm:$0xff]  }
 0x2b0   :  { %5656 = vmatmul.mubr.bf16.vlgmr.msra.gmra.mrb[4].mxu1 %v9246_v21  ;;  %v8411_v21 = vld [vmem:[#allocation2 + $0x106c] ss:$16 sps:$4 sm:$0xff]  }
 0x2b1   :  { %5226 = vmatmul.mubr.bf16.vlgmr.msra.gmra.mrb[0].mxu0 %v9280_v48  ;;  %5667 = vmatpush1.bf16.msra.mxu1 %v8391_v44  ;;  %v8475_v44 = vld [vmem:[#allocation2 + $0x11c8] ss:$16 sps:$4 sm:$0xff]  }
 0x2b2   :  { %5237 = vmatpush1.bf16.msra.mxu0 %v8388_v50  ;;  %5668 = vmatprep.subr.bf16.mxu1 %v8399_v52  ;;  %v8472_v50 = vld [vmem:[#allocation2 + $0x15c0] ss:$16 sps:$4 sm:$0xff]   ;;  %v8483_v52 = vld [vmem:[#allocation2 + $0x11ec] ss:$16 sps:$4 sm:$0xff]  }
 0x2b3   :  { %5238 = vmatprep.subr.bf16.mxu0 %v8396_v51  ;;  %5268 = vmatprep.mubr.bf16.mxu0 %v9288_v38  ;;  %v8480_v51 = vld [vmem:[#allocation2 + $0x15e4] ss:$16 sps:$4 sm:$0xff]  }
 0x2b4   :  { %5698 = vmatprep.mubr.bf16.mxu1 %v9248_v47  ;;  %v8415_v47 = vld [vmem:[#allocation2 + $0x1088] ss:$16 sps:$4 sm:$0xff]  }
 0x2b5   :  { %5669 = vmatpush1.bf16.msra.mxu1 %v8397_v24  ;;  %v8481_v24 = vld [vmem:[#allocation2 + $0x11e8] ss:$16 sps:$4 sm:$0xff]  }
 0x2b6   :  { %5239 = vmatpush1.bf16.msra.mxu0 %v8394_v53  ;;  %5670 = vmatprep.subr.bf16.mxu1 %v8405_v57  ;;  %v8478_v53 = vld [vmem:[#allocation2 + $0x15e0] ss:$16 sps:$4 sm:$0xff]  }
 0x2b7   :  { %5240 = vmatprep.subr.bf16.mxu0 %v8402_v56  ;;  %v124_v56 = vld [vmem:[%s9367_s0 + $0xa0] sm:$0xff] }
 0x2b8   :  { %v148_v57 = vld [vmem:[%s9367_s0 + $0x160] sm:$0xff] }
 0x2b9   :  { %5671 = vmatpush1.bf16.msra.mxu1 %v8403_v59  ;;  %v8489_v59 = vld [vmem:[#allocation2 + $0x120c] ss:$16 sps:$4 sm:$0xff]  }
 0x2ba   :  { %5241 = vmatpush1.bf16.msra.mxu0 %v8400_v58  ;;  %5672 = vmatprep.subr.bf16.mxu1 %v8411_v21  ;;  %v8486_v58 = vld [vmem:[#allocation2 + $0x1604] ss:$16 sps:$4 sm:$0xff]   ;;  %v127_v21 = vld [vmem:[%s9367_s0 + $0xb8] sm:$0xff] }
 0x2bb   :  { %5242 = vmatprep.subr.bf16.mxu0 %v8408_v60  ;;  %v9300_v60 = vpack.c.bf16 %v148_v57, %v124_v56  ;;  %v8564_v56 = vld [vmem:[#allocation2 + $0x17a4] ss:$16 sps:$4 sm:$0xff]   ;;  %v8567_v57 = vld [vmem:[#allocation2 + $0x13ac] ss:$16 sps:$4 sm:$0xff]  }
 0x2bd   :  { %5673 = vmatpush1.bf16.msra.mxu1 %v8409_v62  ;;  %v8484_v62 = vld [vmem:[#allocation2 + $0x1600] ss:$16 sps:$4 sm:$0xff]  }
 0x2be   :  { %5243 = vmatpush1.bf16.msra.mxu0 %v8406_v61  ;;  %5674 = vmatprep.subr.bf16.mxu1 %v8417_v0  ;;  %v151_v61 = vld [vmem:[%s9367_s0 + $0x178] sm:$0xff]  ;;  %v8492_v0 = vld [vmem:[#allocation2 + $0x1624] ss:$16 sps:$4 sm:$0xff]  }
 0x2bf   :  { %5244 = vmatprep.subr.bf16.mxu0 %v8414_v63  ;;  %v8487_v63 = vld [vmem:[#allocation2 + $0x1208] ss:$16 sps:$4 sm:$0xff]  }
 0x2c1   :  { %5675 = vmatpush1.bf16.msra.mxu1 %v8415_v47  ;;  %v9308_v47 = vpack.c.bf16 %v151_v61, %v127_v21  ;;  %v8570_v21 = vld [vmem:[#allocation2 + $0x17c4] ss:$16 sps:$4 sm:$0xff]   ;;  %v8573_v61 = vld [vmem:[#allocation2 + $0x13cc] ss:$16 sps:$4 sm:$0xff]  }
 0x2c2   :  { %5245 = vmatpush1.bf16.msra.mxu0 %v8412_v1  ;;  %5676 = vmatprep.subr.bf16.mxu1 %v8423_v12  ;;  %v8495_v1 = vld [vmem:[#allocation2 + $0x122c] ss:$16 sps:$4 sm:$0xff]   ;;  %v8493_v12 = vld [vmem:[#allocation2 + $0x1228] ss:$16 sps:$4 sm:$0xff]  }
 0x2c3   :  { %5246 = vmatprep.subr.bf16.mxu0 %v8420_v4  ;;  %v8490_v4 = vld [vmem:[#allocation2 + $0x1620] ss:$16 sps:$4 sm:$0xff]  }
 0x2c5   :  { %5677 = vmatpush1.bf16.msra.mxu1 %v8421_v9  ;;  %v8501_v9 = vld [vmem:[#allocation2 + $0x124c] ss:$16 sps:$4 sm:$0xff]  }
 0x2c6   :  { %5247 = vmatpush1.bf16.msra.mxu0 %v8418_v8  ;;  %5678 = vmatprep.subr.bf16.mxu1 %v8429_v11  ;;  %v8498_v8 = vld [vmem:[#allocation2 + $0x1644] ss:$16 sps:$4 sm:$0xff]   ;;  %v8499_v11 = vld [vmem:[#allocation2 + $0x1248] ss:$16 sps:$4 sm:$0xff]  }
 0x2c7   :  { %5248 = vmatprep.subr.bf16.mxu0 %v8426_v10  ;;  %v8496_v10 = vld [vmem:[#allocation2 + $0x1640] ss:$16 sps:$4 sm:$0xff]  }
 0x2c9   :  { %5679 = vmatpush1.bf16.msra.mxu1 %v8427_v14  ;;  %v8502_v14 = vld [vmem:[#allocation2 + $0x1660] ss:$16 sps:$4 sm:$0xff]  }
 0x2ca   :  { %5249 = vmatpush1.bf16.msra.mxu0 %v8424_v13  ;;  %5680 = vmatprep.subr.bf16.mxu1 %v8435_v17  ;;  %v8504_v13 = vld [vmem:[#allocation2 + $0x1664] ss:$16 sps:$4 sm:$0xff]  }
 0x2cb   :  { %5250 = vmatprep.subr.bf16.mxu0 %v8432_v16  ;;  %v8505_v16 = vld [vmem:[#allocation2 + $0x1268] ss:$16 sps:$4 sm:$0xff]   ;;  %v8510_v17 = vld [vmem:[#allocation2 + $0x1684] ss:$16 sps:$4 sm:$0xff]  }
 0x2cd   :  { %5681 = vmatpush1.bf16.msra.mxu1 %v8433_v19  ;;  %v8508_v19 = vld [vmem:[#allocation2 + $0x1680] ss:$16 sps:$4 sm:$0xff]  }
 0x2ce   :  { %5251 = vmatpush1.bf16.msra.mxu0 %v8430_v18  ;;  %5682 = vmatprep.subr.bf16.mxu1 %v8441_v42  ;;  %v8513_v18 = vld [vmem:[#allocation2 + $0x128c] ss:$16 sps:$4 sm:$0xff]  }
 0x2cf   :  { %5252 = vmatprep.subr.bf16.mxu0 %v8438_v20  ;;  %v8516_v20 = vld [vmem:[#allocation2 + $0x16a4] ss:$16 sps:$4 sm:$0xff]   ;;  %v8519_v42 = vld [vmem:[#allocation2 + $0x12ac] ss:$16 sps:$4 sm:$0xff]  }
 0x2d1   :  { %5683 = vmatpush1.bf16.msra.mxu1 %v8439_v23  ;;  %v8517_v23 = vld [vmem:[#allocation2 + $0x12a8] ss:$16 sps:$4 sm:$0xff]  }
 0x2d2   :  { %5253 = vmatpush1.bf16.msra.mxu0 %v8436_v22  ;;  %5684 = vmatprep.subr.bf16.mxu1 %v8447_v26  ;;  %v8514_v22 = vld [vmem:[#allocation2 + $0x16a0] ss:$16 sps:$4 sm:$0xff]   ;;  %v8525_v26 = vld [vmem:[#allocation2 + $0x12cc] ss:$16 sps:$4 sm:$0xff]  }
 0x2d3   :  { %5254 = vmatprep.subr.bf16.mxu0 %v8444_v25  ;;  %v8522_v25 = vld [vmem:[#allocation2 + $0x16c4] ss:$16 sps:$4 sm:$0xff]  }
 0x2d5   :  { %5685 = vmatpush1.bf16.msra.mxu1 %v8445_v28  ;;  %v8523_v28 = vld [vmem:[#allocation2 + $0x12c8] ss:$16 sps:$4 sm:$0xff]  }
 0x2d6   :  { %5255 = vmatpush1.bf16.msra.mxu0 %v8442_v27  ;;  %5686 = vmatprep.subr.bf16.mxu1 %v8453_v30  ;;  %v8520_v27 = vld [vmem:[#allocation2 + $0x16c0] ss:$16 sps:$4 sm:$0xff]   ;;  %v8531_v30 = vld [vmem:[#allocation2 + $0x12ec] ss:$16 sps:$4 sm:$0xff]  }
 0x2d7   :  { %5256 = vmatprep.subr.bf16.mxu0 %v8450_v29  ;;  %v8528_v29 = vld [vmem:[#allocation2 + $0x16e4] ss:$16 sps:$4 sm:$0xff]  }
 0x2d9   :  { %5687 = vmatpush1.bf16.msra.mxu1 %v8451_v32  ;;  %v8529_v32 = vld [vmem:[#allocation2 + $0x12e8] ss:$16 sps:$4 sm:$0xff]  }
 0x2da   :  { %5257 = vmatpush1.bf16.msra.mxu0 %v8448_v31  ;;  %5688 = vmatprep.subr.bf16.mxu1 %v8459_v54  ;;  %v8526_v31 = vld [vmem:[#allocation2 + $0x16e0] ss:$16 sps:$4 sm:$0xff]   ;;  %v8537_v54 = vld [vmem:[#allocation2 + $0x130c] ss:$16 sps:$4 sm:$0xff]  }
 0x2db   :  { %5258 = vmatprep.subr.bf16.mxu0 %v8456_v34  ;;  %v8534_v34 = vld [vmem:[#allocation2 + $0x1704] ss:$16 sps:$4 sm:$0xff]  }
 0x2dd   :  { %5689 = vmatpush1.bf16.msra.mxu1 %v8457_v37  ;;  %v8535_v37 = vld [vmem:[#allocation2 + $0x1308] ss:$16 sps:$4 sm:$0xff]  }
 0x2de   :  { %5259 = vmatpush1.bf16.msra.mxu0 %v8454_v36  ;;  %5690 = vmatprep.subr.bf16.mxu1 %v8465_v40  ;;  %v8532_v36 = vld [vmem:[#allocation2 + $0x1700] ss:$16 sps:$4 sm:$0xff]   ;;  %v8543_v40 = vld [vmem:[#allocation2 + $0x132c] ss:$16 sps:$4 sm:$0xff]  }
 0x2df   :  { %5260 = vmatprep.subr.bf16.mxu0 %v8462_v39  ;;  %v8540_v39 = vld [vmem:[#allocation2 + $0x1724] ss:$16 sps:$4 sm:$0xff]  }
 0x2e1   :  { %5691 = vmatpush1.bf16.msra.mxu1 %v8463_v55  ;;  %v8541_v55 = vld [vmem:[#allocation2 + $0x1328] ss:$16 sps:$4 sm:$0xff]  }
 0x2e2   :  { %5261 = vmatpush1.bf16.msra.mxu0 %v8460_v41  ;;  %5692 = vmatprep.subr.bf16.mxu1 %v8471_v45  ;;  %v8538_v41 = vld [vmem:[#allocation2 + $0x1720] ss:$16 sps:$4 sm:$0xff]   ;;  %v8549_v45 = vld [vmem:[#allocation2 + $0x134c] ss:$16 sps:$4 sm:$0xff]  }
 0x2e3   :  { %5262 = vmatprep.subr.bf16.mxu0 %v8468_v43  ;;  %v8546_v43 = vld [vmem:[#allocation2 + $0x1744] ss:$16 sps:$4 sm:$0xff]  }
 0x2e5   :  { %5693 = vmatpush1.bf16.msra.mxu1 %v8469_v46  ;;  %v8547_v46 = vld [vmem:[#allocation2 + $0x1348] ss:$16 sps:$4 sm:$0xff]  }
 0x2e6   :  { %5263 = vmatpush1.bf16.msra.mxu0 %v8466_v15  ;;  %5694 = vmatprep.subr.bf16.mxu1 %v8477_v49  ;;  %v8544_v15 = vld [vmem:[#allocation2 + $0x1740] ss:$16 sps:$4 sm:$0xff]   ;;  %v8555_v49 = vld [vmem:[#allocation2 + $0x136c] ss:$16 sps:$4 sm:$0xff]  }
 0x2e7   :  { %5264 = vmatprep.subr.bf16.mxu0 %v8474_v6  ;;  %v8552_v6 = vld [vmem:[#allocation2 + $0x1764] ss:$16 sps:$4 sm:$0xff]  }
 0x2e9   :  { %5695 = vmatpush1.bf16.msra.mxu1 %v8475_v44  ;;  %v8553_v44 = vld [vmem:[#allocation2 + $0x1368] ss:$16 sps:$4 sm:$0xff]  }
 0x2ea   :  { %5265 = vmatpush1.bf16.msra.mxu0 %v8472_v50  ;;  %5696 = vmatprep.subr.bf16.mxu1 %v8483_v52  ;;  %v8550_v50 = vld [vmem:[#allocation2 + $0x1760] ss:$16 sps:$4 sm:$0xff]   ;;  %v8561_v52 = vld [vmem:[#allocation2 + $0x138c] ss:$16 sps:$4 sm:$0xff]  }
 0x2eb   :  { %5266 = vmatprep.subr.bf16.mxu0 %v8480_v51  ;;  %v8558_v51 = vld [vmem:[#allocation2 + $0x1784] ss:$16 sps:$4 sm:$0xff]  }
 0x2ed   :  { %5697 = vmatpush1.bf16.msra.mxu1 %v8481_v24  ;;  %v8559_v24 = vld [vmem:[#allocation2 + $0x1388] ss:$16 sps:$4 sm:$0xff]  }
 0x2ee   :  { %5267 = vmatpush1.bf16.msra.mxu0 %v8478_v53  ;;  %5709 = vmatprep.subr.bf16.mxu1 %v8489_v59  ;;  %v8556_v53 = vld [vmem:[#allocation2 + $0x1780] ss:$16 sps:$4 sm:$0xff]   ;;  %v8565_v59 = vld [vmem:[#allocation2 + $0x13a8] ss:$16 sps:$4 sm:$0xff]  }
 0x2ef   :  { %5279 = vmatprep.subr.bf16.mxu0 %v8486_v58  ;;  %v8562_v58 = vld [vmem:[#allocation2 + $0x17a0] ss:$16 sps:$4 sm:$0xff]  }
 0x2f0   :  { %5699 = vmatmul.mubr.bf16.vlgmr.msra.gmra.mrb[4].mxu1 %v9266_v35  ;;  %v8507_v35 = vld [vmem:[#allocation2 + $0x126c] ss:$16 sps:$4 sm:$0xff]  }
 0x2f1   :  { %5269 = vmatmul.mubr.bf16.vlgmr.msra.gmra.mrb[0].mxu0 %v9300_v60  ;;  %5710 = vmatpush1.bf16.msra.mxu1 %v8487_v63  ;;  %v8571_v63 = vld [vmem:[#allocation2 + $0x13c8] ss:$16 sps:$4 sm:$0xff]  }
 0x2f2   :  { %5280 = vmatpush1.bf16.msra.mxu0 %v8484_v62  ;;  %5711 = vmatprep.subr.bf16.mxu1 %v8495_v1  ;;  %v8568_v62 = vld [vmem:[#allocation2 + $0x17c0] ss:$16 sps:$4 sm:$0xff]   ;;  %v8579_v1 = vld [vmem:[#allocation2 + $0x13ec] ss:$16 sps:$4 sm:$0xff]  }
 0x2f3   :  { %5281 = vmatprep.subr.bf16.mxu0 %v8492_v0  ;;  %5311 = vmatprep.mubr.bf16.mxu0 %v9308_v47  ;;  %v8576_v0 = vld [vmem:[#allocation2 + $0x17e4] ss:$16 sps:$4 sm:$0xff]  }
 0x2f4   :  { %5741 = vmatprep.mubr.bf16.mxu1 %v9268_v33  ;;  %v8511_v33 = vld [vmem:[#allocation2 + $0x1288] ss:$16 sps:$4 sm:$0xff]  }
 0x2f5   :  { %5712 = vmatpush1.bf16.msra.mxu1 %v8493_v12  ;;  %v8577_v12 = vld [vmem:[#allocation2 + $0x13e8] ss:$16 sps:$4 sm:$0xff]  }
 0x2f6   :  { %5282 = vmatpush1.bf16.msra.mxu0 %v8490_v4  ;;  %5713 = vmatprep.subr.bf16.mxu1 %v8501_v9  ;;  %v8574_v4 = vld [vmem:[#allocation2 + $0x17e0] ss:$16 sps:$4 sm:$0xff]  }
 0x2f7   :  { %5283 = vmatprep.subr.bf16.mxu0 %v8498_v8  ;;  %v126_v8 = vld [vmem:[%s9367_s0 + $0xb0] sm:$0xff] }
 0x2f8   :  { %v150_v9 = vld [vmem:[%s9367_s0 + $0x170] sm:$0xff]  ;;  %s8964_s0 = smov [#allocation13]  }
 0x2f9   :  { %5714 = vmatpush1.bf16.msra.mxu1 %v8499_v11  ;;  %v9320_v11 = vpack.c.bf16 %v150_v9, %v126_v8  ;;  %v8624_v8 = vld [vmem:[#allocation2 + $0x15cc] ss:$16 sps:$4 sm:$0xff]   ;;  %s6521_s16 = sshll.u32 %s8964_s0, 4  ;;  %s6522_s16 = int_to_ptr.vmem [resolvable:$true] %s6521_s16 }
 0x2fa   :  { %5284 = vmatpush1.bf16.msra.mxu0 %v8496_v10  ;;  %5715 = vmatprep.subr.bf16.mxu1 %v8507_v35  ;;  %v8582_v10 = vld [vmem:[#allocation2 + $0x140c] ss:$16 sps:$4 sm:$0xff]   ;;  %s8920_s17 = scalar_lea.vmem %s6522_s16, 256  ;;  %p8925_p7 = scmp.lt.s32.totalorder %s6522_s16, %s6522_s16 }
 0x2fb   :  { %5285 = vmatprep.subr.bf16.mxu0 %v8504_v13  ;;  %v8580_v13 = vld [vmem:[#allocation2 + $0x1408] ss:$16 sps:$4 sm:$0xff]   ;;  %v8585_v35 = vld [vmem:[#allocation2 + $0x142c] ss:$16 sps:$4 sm:$0xff]   ;;  %p8921_p6 = scmp.ne.s32.totalorder %s6522_s16, %s8920_s17  ;;  %p8926_p8 = scmp.lt.s32.totalorder %s8920_s17, %s8920_s17 }
 0x2fc   :  { %v8715_v9 = vld [vmem:[#allocation7 + $0xd0] ss:$8 sps:$4 sm:$0xff]  }
 0x2fd   :  { %5716 = vmatpush1.bf16.msra.mxu1 %v8505_v16  ;;  %v8678_v16 = vld [vmem:[#allocation7 + $0x4] ss:$8 sps:$4 sm:$0xff]   ;;  %p8927_p9 = por %p8926_p8, %p8925_p7 }
 0x2fe   :  { %5286 = vmatpush1.bf16.msra.mxu0 %v8502_v14  ;;  %5717 = vmatprep.subr.bf16.mxu1 %v8513_v18  ;;  %v8676_v14 = vld [vmem:[#allocation7] ss:$8 sps:$4 sm:$0xff]   ;;  %v8681_v18 = vld [vmem:[#allocation7 + $0x14] ss:$8 sps:$4 sm:$0xff]  }
 0x2ff   :  { %5287 = vmatprep.subr.bf16.mxu0 %v8510_v17  ;;  %v8583_v17 = vld [vmem:[#allocation2 + $0x1428] ss:$16 sps:$4 sm:$0xff]   ;;  %p8928_p10 = pnand %p8927_p9, %p8921_p6 }
 0x301   :  { %5718 = vmatpush1.bf16.msra.mxu1 %v8511_v33  ;;  %v8679_v33 = vld [vmem:[#allocation7 + $0x10] ss:$8 sps:$4 sm:$0xff]  }
 0x302   :  { %5288 = vmatpush1.bf16.msra.mxu0 %v8508_v19  ;;  %5719 = vmatprep.subr.bf16.mxu1 %v8519_v42  ;;  %v8588_v19 = vld [vmem:[#allocation2 + $0x144c] ss:$16 sps:$4 sm:$0xff]   ;;  %v8586_v42 = vld [vmem:[#allocation2 + $0x1448] ss:$16 sps:$4 sm:$0xff]  }
 0x303   :  { %5289 = vmatprep.subr.bf16.mxu0 %v8516_v20  ;;  %v8684_v20 = vld [vmem:[#allocation7 + $0x24] ss:$8 sps:$4 sm:$0xff]  }
 0x305   :  { %5720 = vmatpush1.bf16.msra.mxu1 %v8517_v23  ;;  %v8687_v23 = vld [vmem:[#allocation7 + $0x34] ss:$8 sps:$4 sm:$0xff]  }
 0x306   :  { %5290 = vmatpush1.bf16.msra.mxu0 %v8514_v22  ;;  %5721 = vmatprep.subr.bf16.mxu1 %v8525_v26  ;;  %v8591_v22 = vld [vmem:[#allocation2 + $0x146c] ss:$16 sps:$4 sm:$0xff]  }
 0x307   :  { %5291 = vmatprep.subr.bf16.mxu0 %v8522_v25  ;;  %v8589_v25 = vld [vmem:[#allocation2 + $0x1468] ss:$16 sps:$4 sm:$0xff]   ;;  %v8685_v26 = vld [vmem:[#allocation7 + $0x30] ss:$8 sps:$4 sm:$0xff]  }
 0x309   :  { %5722 = vmatpush1.bf16.msra.mxu1 %v8523_v28  ;;  %v8592_v28 = vld [vmem:[#allocation2 + $0x1488] ss:$16 sps:$4 sm:$0xff]  }
 0x30a   :  { %5292 = vmatpush1.bf16.msra.mxu0 %v8520_v27  ;;  %5723 = vmatprep.subr.bf16.mxu1 %v8531_v30  ;;  %v8690_v27 = vld [vmem:[#allocation7 + $0x44] ss:$8 sps:$4 sm:$0xff]   ;;  %v8688_v30 = vld [vmem:[#allocation7 + $0x40] ss:$8 sps:$4 sm:$0xff]  }
 0x30b   :  { %5293 = vmatprep.subr.bf16.mxu0 %v8528_v29  ;;  %v8597_v29 = vld [vmem:[#allocation2 + $0x14ac] ss:$16 sps:$4 sm:$0xff]  }
 0x30d   :  { %5724 = vmatpush1.bf16.msra.mxu1 %v8529_v32  ;;  %v8595_v32 = vld [vmem:[#allocation2 + $0x14a8] ss:$16 sps:$4 sm:$0xff]  }
 0x30e   :  { %5294 = vmatpush1.bf16.msra.mxu0 %v8526_v31  ;;  %5725 = vmatprep.subr.bf16.mxu1 %v8537_v54  ;;  %v8693_v31 = vld [vmem:[#allocation7 + $0x54] ss:$8 sps:$4 sm:$0xff]   ;;  %v8691_v54 = vld [vmem:[#allocation7 + $0x50] ss:$8 sps:$4 sm:$0xff]  }
 0x30f   :  { %5295 = vmatprep.subr.bf16.mxu0 %v8534_v34  ;;  %v8600_v34 = vld [vmem:[#allocation2 + $0x14cc] ss:$16 sps:$4 sm:$0xff]  }
 0x311   :  { %5726 = vmatpush1.bf16.msra.mxu1 %v8535_v37  ;;  %v8598_v37 = vld [vmem:[#allocation2 + $0x14c8] ss:$16 sps:$4 sm:$0xff]  }
 0x312   :  { %5296 = vmatpush1.bf16.msra.mxu0 %v8532_v36  ;;  %5727 = vmatprep.subr.bf16.mxu1 %v8543_v40  ;;  %v8696_v36 = vld [vmem:[#allocation7 + $0x64] ss:$8 sps:$4 sm:$0xff]   ;;  %v8694_v40 = vld [vmem:[#allocation7 + $0x60] ss:$8 sps:$4 sm:$0xff]  }
 0x313   :  { %5297 = vmatprep.subr.bf16.mxu0 %v8540_v39  ;;  %v8603_v39 = vld [vmem:[#allocation2 + $0x14ec] ss:$16 sps:$4 sm:$0xff]  }
 0x315   :  { %5728 = vmatpush1.bf16.msra.mxu1 %v8541_v55  ;;  %v8601_v55 = vld [vmem:[#allocation2 + $0x14e8] ss:$16 sps:$4 sm:$0xff]  }
 0x316   :  { %5298 = vmatpush1.bf16.msra.mxu0 %v8538_v41  ;;  %5729 = vmatprep.subr.bf16.mxu1 %v8549_v45  ;;  %v8699_v41 = vld [vmem:[#allocation7 + $0x74] ss:$8 sps:$4 sm:$0xff]   ;;  %v8697_v45 = vld [vmem:[#allocation7 + $0x70] ss:$8 sps:$4 sm:$0xff]  }
 0x317   :  { %5299 = vmatprep.subr.bf16.mxu0 %v8546_v43  ;;  %v8606_v43 = vld [vmem:[#allocation2 + $0x150c] ss:$16 sps:$4 sm:$0xff]  }
 0x319   :  { %5730 = vmatpush1.bf16.msra.mxu1 %v8547_v46  ;;  %v8604_v46 = vld [vmem:[#allocation2 + $0x1508] ss:$16 sps:$4 sm:$0xff]  }
 0x31a   :  { %5300 = vmatpush1.bf16.msra.mxu0 %v8544_v15  ;;  %5731 = vmatprep.subr.bf16.mxu1 %v8555_v49  ;;  %v8702_v15 = vld [vmem:[#allocation7 + $0x84] ss:$8 sps:$4 sm:$0xff]   ;;  %v8700_v49 = vld [vmem:[#allocation7 + $0x80] ss:$8 sps:$4 sm:$0xff]  }
 0x31b   :  { %5301 = vmatprep.subr.bf16.mxu0 %v8552_v6  ;;  %v8609_v6 = vld [vmem:[#allocation2 + $0x152c] ss:$16 sps:$4 sm:$0xff]  }
 0x31d   :  { %5732 = vmatpush1.bf16.msra.mxu1 %v8553_v44  ;;  %v8607_v44 = vld [vmem:[#allocation2 + $0x1528] ss:$16 sps:$4 sm:$0xff]  }
 0x31e   :  { %5302 = vmatpush1.bf16.msra.mxu0 %v8550_v50  ;;  %5733 = vmatprep.subr.bf16.mxu1 %v8561_v52  ;;  %v8705_v50 = vld [vmem:[#allocation7 + $0x94] ss:$8 sps:$4 sm:$0xff]   ;;  %v8703_v52 = vld [vmem:[#allocation7 + $0x90] ss:$8 sps:$4 sm:$0xff]  }
 0x31f   :  { %5303 = vmatprep.subr.bf16.mxu0 %v8558_v51  ;;  %v8612_v51 = vld [vmem:[#allocation2 + $0x154c] ss:$16 sps:$4 sm:$0xff]  }
 0x321   :  { %5734 = vmatpush1.bf16.msra.mxu1 %v8559_v24  ;;  %v8610_v24 = vld [vmem:[#allocation2 + $0x1548] ss:$16 sps:$4 sm:$0xff]  }
 0x322   :  { %5304 = vmatpush1.bf16.msra.mxu0 %v8556_v53  ;;  %5735 = vmatprep.subr.bf16.mxu1 %v8567_v57  ;;  %v8708_v53 = vld [vmem:[#allocation7 + $0xa4] ss:$8 sps:$4 sm:$0xff]   ;;  %v8706_v57 = vld [vmem:[#allocation7 + $0xa0] ss:$8 sps:$4 sm:$0xff]  }
 0x323   :  { %5305 = vmatprep.subr.bf16.mxu0 %v8564_v56  ;;  %v8615_v56 = vld [vmem:[#allocation2 + $0x156c] ss:$16 sps:$4 sm:$0xff]  }
 0x325   :  { %5736 = vmatpush1.bf16.msra.mxu1 %v8565_v59  ;;  %v8613_v59 = vld [vmem:[#allocation2 + $0x1568] ss:$16 sps:$4 sm:$0xff]  }
 0x326   :  { %5306 = vmatpush1.bf16.msra.mxu0 %v8562_v58  ;;  %5737 = vmatprep.subr.bf16.mxu1 %v8573_v61  ;;  %v8711_v58 = vld [vmem:[#allocation7 + $0xb4] ss:$8 sps:$4 sm:$0xff]   ;;  %v8709_v61 = vld [vmem:[#allocation7 + $0xb0] ss:$8 sps:$4 sm:$0xff]  }
 0x327   :  { %5307 = vmatprep.subr.bf16.mxu0 %v8570_v21  ;;  %v8618_v21 = vld [vmem:[#allocation2 + $0x158c] ss:$16 sps:$4 sm:$0xff]  }
 0x329   :  { %5738 = vmatpush1.bf16.msra.mxu1 %v8571_v63  ;;  %v8616_v63 = vld [vmem:[#allocation2 + $0x1588] ss:$16 sps:$4 sm:$0xff]  }
 0x32a   :  { %5308 = vmatpush1.bf16.msra.mxu0 %v8568_v62  ;;  %5739 = vmatprep.subr.bf16.mxu1 %v8579_v1  ;;  %v8714_v62 = vld [vmem:[#allocation7 + $0xc4] ss:$8 sps:$4 sm:$0xff]   ;;  %v8712_v1 = vld [vmem:[#allocation7 + $0xc0] ss:$8 sps:$4 sm:$0xff]  }
 0x32b   :  { %5309 = vmatprep.subr.bf16.mxu0 %v8576_v0  ;;  %v8621_v0 = vld [vmem:[#allocation2 + $0x15ac] ss:$16 sps:$4 sm:$0xff]  }
 0x32d   :  { %5740 = vmatpush1.bf16.msra.mxu1 %v8577_v12  ;;  %v8619_v12 = vld [vmem:[#allocation2 + $0x15a8] ss:$16 sps:$4 sm:$0xff]  }
 0x32e   :  { %5310 = vmatpush1.bf16.msra.mxu0 %v8574_v4  ;;  %5752 = vmatprep.subr.bf16.mxu1 %v8582_v10  ;;  %v8717_v4 = vld [vmem:[#allocation7 + $0xd4] ss:$8 sps:$4 sm:$0xff]  }
 0x32f   :  { %6246 = vmatprep.subr.bf16.mxu0 %v8678_v16  ;;  %v8622_v10 = vld [vmem:[#allocation2 + $0x15c8] ss:$16 sps:$4 sm:$0xff]  }
 0x330   :  { %5742 = vmatmul.mubr.bf16.vlgmr.msra.gmra.mrb[4].mxu1 %v9280_v48  ;;  %v8682_v48 = vld [vmem:[#allocation7 + $0x20] ss:$8 sps:$4 sm:$0xff]   ;;  %v8628_v16 = vld [vmem:[#allocation2 + $0x1608] ss:$16 sps:$4 sm:$0xff]  }
 0x331   :  { %5312 = vmatmul.mubr.bf16.vlgmr.msra.gmra.mrb[0].mxu0 %v9320_v11  ;;  %5753 = vmatpush1.bf16.msra.mxu1 %v8580_v13  ;;  %v8627_v13 = vld [vmem:[#allocation2 + $0x15ec] ss:$16 sps:$4 sm:$0xff]  }
 0x332   :  { %5784 = vmatprep.mubr.bf16.mxu1 %v9288_v38  ;;  %5754 = vmatprep.subr.bf16.mxu1 %v8585_v35  ;;  %v8594_v38 = vld [vmem:[#allocation2 + $0x148c] ss:$16 sps:$4 sm:$0xff]   ;;  %v8625_v35 = vld [vmem:[#allocation2 + $0x15e8] ss:$16 sps:$4 sm:$0xff]  }
 0x333   :  { %6247 = vmatpush1.bf16.msra.mxu0 %v8676_v14  ;;  %v8630_v14 = vld [vmem:[#allocation2 + $0x160c] ss:$16 sps:$4 sm:$0xff]  }
 0x334   :  { %6248 = vmatprep.subr.bf16.mxu0 %v8681_v18  ;;  %v8631_v18 = vld [vmem:[#allocation2 + $0x1628] ss:$16 sps:$4 sm:$0xff]  }
 0x335   :  { %5755 = vmatpush1.bf16.msra.mxu1 %v8583_v17  ;;  %v8633_v17 = vld [vmem:[#allocation2 + $0x162c] ss:$16 sps:$4 sm:$0xff]  }
 0x336   :  { %5756 = vmatprep.subr.bf16.mxu1 %v8588_v19  ;;  %v8636_v19 = vld [vmem:[#allocation2 + $0x164c] ss:$16 sps:$4 sm:$0xff]  }
 0x337   :  { %6249 = vmatpush1.bf16.msra.mxu0 %v8679_v33  ;;  %v8634_v33 = vld [vmem:[#allocation2 + $0x1648] ss:$16 sps:$4 sm:$0xff]  }
 0x338   :  { %6250 = vmatprep.subr.bf16.mxu0 %v8684_v20  ;;  %v8639_v20 = vld [vmem:[#allocation2 + $0x166c] ss:$16 sps:$4 sm:$0xff]  }
 0x339   :  { %5757 = vmatpush1.bf16.msra.mxu1 %v8586_v42  ;;  %v8637_v42 = vld [vmem:[#allocation2 + $0x1668] ss:$16 sps:$4 sm:$0xff]  }
 0x33a   :  { %5758 = vmatprep.subr.bf16.mxu1 %v8591_v22  ;;  %v8642_v22 = vld [vmem:[#allocation2 + $0x168c] ss:$16 sps:$4 sm:$0xff]  }
 0x33b   :  { %6251 = vmatpush1.bf16.msra.mxu0 %v8682_v48  ;;  %v8640_v48 = vld [vmem:[#allocation2 + $0x1688] ss:$16 sps:$4 sm:$0xff]  }
 0x33c   :  { %6252 = vmatprep.subr.bf16.mxu0 %v8687_v23  ;;  %v8645_v23 = vld [vmem:[#allocation2 + $0x16ac] ss:$16 sps:$4 sm:$0xff]  }
 0x33d   :  { %5759 = vmatpush1.bf16.msra.mxu1 %v8589_v25  ;;  %v8648_v25 = vld [vmem:[#allocation2 + $0x16cc] ss:$16 sps:$4 sm:$0xff]  }
 0x33e   :  { %5760 = vmatprep.subr.bf16.mxu1 %v8594_v38  ;;  %v8720_v38 = vld [vmem:[#allocation7 + $0xe4] ss:$8 sps:$4 sm:$0xff]  }
 0x33f   :  { %6253 = vmatpush1.bf16.msra.mxu0 %v8685_v26  ;;  %v8718_v26 = vld [vmem:[#allocation7 + $0xe0] ss:$8 sps:$4 sm:$0xff]  }
 0x340   :  { %6254 = vmatprep.subr.bf16.mxu0 %v8690_v27  ;;  %v8651_v27 = vld [vmem:[#allocation2 + $0x16ec] ss:$16 sps:$4 sm:$0xff]  }
 0x341   :  { %5761 = vmatpush1.bf16.msra.mxu1 %v8592_v28  ;;  %v8723_v28 = vld [vmem:[#allocation7 + $0xf4] ss:$8 sps:$4 sm:$0xff]  }
 0x342   :  { %5762 = vmatprep.subr.bf16.mxu1 %v8597_v29  ;;  %v8649_v29 = vld [vmem:[#allocation2 + $0x16e8] ss:$16 sps:$4 sm:$0xff]  }
 0x343   :  { %6255 = vmatpush1.bf16.msra.mxu0 %v8688_v30  ;;  %v8721_v30 = vld [vmem:[#allocation7 + $0xf0] ss:$8 sps:$4 sm:$0xff]  }
 0x344   :  { %6256 = vmatprep.subr.bf16.mxu0 %v8693_v31  ;;  %v8654_v31 = vld [vmem:[#allocation2 + $0x170c] ss:$16 sps:$4 sm:$0xff]  }
 0x345   :  { %5763 = vmatpush1.bf16.msra.mxu1 %v8595_v32  ;;  %v8652_v32 = vld [vmem:[#allocation2 + $0x1708] ss:$16 sps:$4 sm:$0xff]  }
 0x346   :  { %5764 = vmatprep.subr.bf16.mxu1 %v8600_v34  ;;  %v8657_v34 = vld [vmem:[#allocation2 + $0x172c] ss:$16 sps:$4 sm:$0xff]  }
 0x347   :  { %6257 = vmatpush1.bf16.msra.mxu0 %v8691_v54  ;;  %v8726_v54 = vld [vmem:[#allocation7 + $0x104] ss:$8 sps:$4 sm:$0xff]  }
 0x348   :  { %6258 = vmatprep.subr.bf16.mxu0 %v8696_v36  ;;  %v8655_v36 = vld [vmem:[#allocation2 + $0x1728] ss:$16 sps:$4 sm:$0xff]  }
 0x349   :  { %5765 = vmatpush1.bf16.msra.mxu1 %v8598_v37  ;;  %v8660_v37 = vld [vmem:[#allocation2 + $0x174c] ss:$16 sps:$4 sm:$0xff]  }
 0x34a   :  { %5766 = vmatprep.subr.bf16.mxu1 %v8603_v39  ;;  %v8658_v39 = vld [vmem:[#allocation2 + $0x1748] ss:$16 sps:$4 sm:$0xff]  }
 0x34b   :  { %6259 = vmatpush1.bf16.msra.mxu0 %v8694_v40  ;;  %v8663_v40 = vld [vmem:[#allocation2 + $0x176c] ss:$16 sps:$4 sm:$0xff]  }
 0x34c   :  { %6260 = vmatprep.subr.bf16.mxu0 %v8699_v41  ;;  %v8661_v41 = vld [vmem:[#allocation2 + $0x1768] ss:$16 sps:$4 sm:$0xff]  }
 0x34d   :  { %5767 = vmatpush1.bf16.msra.mxu1 %v8601_v55  ;;  %v8666_v55 = vld [vmem:[#allocation2 + $0x178c] ss:$16 sps:$4 sm:$0xff]  }
 0x34e   :  { %5768 = vmatprep.subr.bf16.mxu1 %v8606_v43  ;;  %v8664_v43 = vld [vmem:[#allocation2 + $0x1788] ss:$16 sps:$4 sm:$0xff]  }
 0x34f   :  { %6261 = vmatpush1.bf16.msra.mxu0 %v8697_v45  ;;  %v8669_v45 = vld [vmem:[#allocation2 + $0x17ac] ss:$16 sps:$4 sm:$0xff]  }
 0x350   :  { %6262 = vmatprep.subr.bf16.mxu0 %v8702_v15  ;;  %v8667_v15 = vld [vmem:[#allocation2 + $0x17a8] ss:$16 sps:$4 sm:$0xff]  }
 0x351   :  { %5769 = vmatpush1.bf16.msra.mxu1 %v8604_v46  ;;  %v8672_v46 = vld [vmem:[#allocation2 + $0x17cc] ss:$16 sps:$4 sm:$0xff]  }
 0x352   :  { %5770 = vmatprep.subr.bf16.mxu1 %v8609_v6  ;;  %v8670_v6 = vld [vmem:[#allocation2 + $0x17c8] ss:$16 sps:$4 sm:$0xff]  }
 0x353   :  { %6263 = vmatpush1.bf16.msra.mxu0 %v8700_v49  ;;  %v8675_v49 = vld [vmem:[#allocation2 + $0x17ec] ss:$16 sps:$4 sm:$0xff]  }
 0x354   :  { %6264 = vmatprep.subr.bf16.mxu0 %v8705_v50  ;;  %v8673_v50 = vld [vmem:[#allocation2 + $0x17e8] ss:$16 sps:$4 sm:$0xff]  }
 0x355   :  { %5771 = vmatpush1.bf16.msra.mxu1 %v8607_v44  ;;  %v946_v44 = vlaneseq }
 0x356   :  { %5772 = vmatprep.subr.bf16.mxu1 %v8612_v51 }
 0x357   :  { %6265 = vmatpush1.bf16.msra.mxu0 %v8703_v52  ;;  %v9328_v51 = vshrl.u32 %v946_v44, 7  ;;  %v8766_v44 = vld [vmem:[#allocation7 + $0x1e0] ss:$8 sps:$4 sm:$0xff]  }
 0x358   :  { %6266 = vmatprep.subr.bf16.mxu0 %v8708_v53  ;;  %v9331_v53 = vld [vmem:[#allocation5] sm:$0xf] }
 0x359   :  { %5773 = vmatpush1.bf16.msra.mxu1 %v8610_v24  ;;  %v948_v52 = vsub.s32 0, %v9328_v51  ;;  %v952_v24 = vsub.s32 1, %v9328_v51 }
 0x35a   :  { %5774 = vmatprep.subr.bf16.mxu1 %v8615_v56 }
 0x35b   :  { %6267 = vmatpush1.bf16.msra.mxu0 %v8706_v57  ;;  %v949_v56 = vrot.slane %v9331_v53, %v948_v52  ;;  %v953_v57 = vrot.slane %v9331_v53, %v952_v24 }
 0x35c   :  { %6268 = vmatprep.subr.bf16.mxu0 %v8711_v58 }
 0x35d   :  { %5775 = vmatpush1.bf16.msra.mxu1 %v8613_v59  ;;  %v4841_v58 = vadd.f32 %v9186_v2, %v949_v56 }
 0x35e   :  { %5776 = vmatprep.subr.bf16.mxu1 %v8618_v21  ;;  %v4845_v21 = vadd.f32 %v9190_v5, %v949_v56  ;;  %v8772_v5 = vld [vmem:[#allocation10 + $0x40] sm:$0xff]   ;;  %v8771_v56 = vld [vmem:[#allocation7 + $0x1f4] ss:$8 sps:$4 sm:$0xff]  }
 0x35f   :  { %6269 = vmatpush1.bf16.msra.mxu0 %v8709_v61 }
 0x360   :  { %6270 = vmatprep.subr.bf16.mxu0 %v8714_v62 }
 0x361   :  { %5777 = vmatpush1.bf16.msra.mxu1 %v8616_v63  ;;  %v4847_v63 = vadd.f32 %v9192_v7, %v953_v57  ;;  %v8727_v7 = vld [vmem:[#allocation7 + $0x110] ss:$8 sps:$4 sm:$0xff]  }
 0x362   :  { %5778 = vmatprep.subr.bf16.mxu1 %v8621_v0 }
 0x363   :  { %6271 = vmatpush1.bf16.msra.mxu0 %v8712_v1 }
 0x364   :  { %6272 = vmatprep.subr.bf16.mxu0 %v8717_v4 }
 0x365   :  { %5779 = vmatpush1.bf16.msra.mxu1 %v8619_v12 }
 0x366   :  { %5780 = vmatprep.subr.bf16.mxu1 %v8624_v8 }
 0x367   :  { %6273 = vmatpush1.bf16.msra.mxu0 %v8715_v9 }
 0x368   :  { %6274 = vmatprep.subr.bf16.mxu0 %v8720_v38  ;;  %v8779_v38 = vld [vmem:[#allocation10 + $0x18] sm:$0xff]  }
 0x369   :  { %5781 = vmatpush1.bf16.msra.mxu1 %v8622_v10 }
 0x36a   :  { %5782 = vmatprep.subr.bf16.mxu1 %v8627_v13 }
 0x36b   :  { %6275 = vmatpush1.bf16.msra.mxu0 %v8718_v26  ;;  %v8736_v26 = vld [vmem:[#allocation7 + $0x140] ss:$8 sps:$4 sm:$0xff]  }
 0x36c   :  { %6276 = vmatprep.subr.bf16.mxu0 %v8723_v28  ;;  %v8781_v28 = vld [vmem:[#allocation10 + $0x20] sm:$0xff]  }
 0x36d   :  { %5783 = vmatpush1.bf16.msra.mxu1 %v8625_v35 }
 0x36e   :  { %5795 = vmatprep.subr.bf16.mxu1 %v8630_v14 }
 0x36f   :  { %6277 = vmatpush1.bf16.msra.mxu0 %v8721_v30  ;;  %v8739_v30 = vld [vmem:[#allocation7 + $0x150] ss:$8 sps:$4 sm:$0xff]  }
 0x370   :  { %5785 = vmatmul.mubr.bf16.vlgmr.msra.gmra.mrb[4].mxu1 %v9300_v60  ;;  %v8643_v60 = vld [vmem:[#allocation2 + $0x16a8] ss:$16 sps:$4 sm:$0xff]   ;;  %6289 = vmatprep.subr.bf16.mxu0 %v8726_v54  ;;  %v8745_v54 = vld [vmem:[#allocation7 + $0x170] ss:$8 sps:$4 sm:$0xff]  }
 0x371   :  { %5796 = vmatpush1.bf16.msra.mxu1 %v8628_v16  ;;  %5827 = vmatprep.mubr.bf16.mxu1 %v9308_v47  ;;  %v8646_v47 = vld [vmem:[#allocation2 + $0x16c8] ss:$16 sps:$4 sm:$0xff]   ;;  %v8724_v16 = vld [vmem:[#allocation7 + $0x100] ss:$8 sps:$4 sm:$0xff]  }
 0x372   :  { %5797 = vmatprep.subr.bf16.mxu1 %v8633_v17  ;;  %v8773_v17 = vld [vmem:[#allocation10] sm:$0xff]  }
 0x375   :  { %5798 = vmatpush1.bf16.msra.mxu1 %v8631_v18  ;;  %v8774_v18 = vld [vmem:[#allocation10 + $0x48] sm:$0xff]  }
 0x376   :  { %5799 = vmatprep.subr.bf16.mxu1 %v8636_v19  ;;  %v8732_v19 = vld [vmem:[#allocation7 + $0x124] ss:$8 sps:$4 sm:$0xff]  }
 0x379   :  { %5800 = vmatpush1.bf16.msra.mxu1 %v8634_v33  ;;  %v8775_v33 = vld [vmem:[#allocation10 + $0x8] sm:$0xff]  }
 0x37a   :  { %5801 = vmatprep.subr.bf16.mxu1 %v8639_v20  ;;  %v8776_v20 = vld [vmem:[#allocation10 + $0x50] sm:$0xff]  }
 0x37d   :  { %5802 = vmatpush1.bf16.msra.mxu1 %v8637_v42  ;;  %v8730_v42 = vld [vmem:[#allocation7 + $0x120] ss:$8 sps:$4 sm:$0xff]  }
 0x37e   :  { %5803 = vmatprep.subr.bf16.mxu1 %v8642_v22  ;;  %v8735_v22 = vld [vmem:[#allocation7 + $0x134] ss:$8 sps:$4 sm:$0xff]  }
 0x381   :  { %5804 = vmatpush1.bf16.msra.mxu1 %v8640_v48  ;;  %v8777_v48 = vld [vmem:[#allocation10 + $0x10] sm:$0xff]  }
 0x382   :  { %5805 = vmatprep.subr.bf16.mxu1 %v8645_v23  ;;  %v8778_v23 = vld [vmem:[#allocation10 + $0x58] sm:$0xff]  }
 0x385   :  { %5806 = vmatpush1.bf16.msra.mxu1 %v8643_v60  ;;  %v8733_v60 = vld [vmem:[#allocation7 + $0x130] ss:$8 sps:$4 sm:$0xff]  }
 0x386   :  { %5807 = vmatprep.subr.bf16.mxu1 %v8648_v25  ;;  %v8738_v25 = vld [vmem:[#allocation7 + $0x144] ss:$8 sps:$4 sm:$0xff]  }
 0x389   :  { %5808 = vmatpush1.bf16.msra.mxu1 %v8646_v47  ;;  %v8780_v47 = vld [vmem:[#allocation10 + $0x60] sm:$0xff]  }
 0x38a   :  { %5809 = vmatprep.subr.bf16.mxu1 %v8651_v27  ;;  %v8741_v27 = vld [vmem:[#allocation7 + $0x154] ss:$8 sps:$4 sm:$0xff]  }
 0x38d   :  { %5810 = vmatpush1.bf16.msra.mxu1 %v8649_v29  ;;  %v8782_v29 = vld [vmem:[#allocation10 + $0x68] sm:$0xff]  }
 0x38e   :  { %5811 = vmatprep.subr.bf16.mxu1 %v8654_v31  ;;  %v8744_v31 = vld [vmem:[#allocation7 + $0x164] ss:$8 sps:$4 sm:$0xff]  }
 0x391   :  { %5812 = vmatpush1.bf16.msra.mxu1 %v8652_v32  ;;  %v8742_v32 = vld [vmem:[#allocation7 + $0x160] ss:$8 sps:$4 sm:$0xff]  }
 0x392   :  { %5813 = vmatprep.subr.bf16.mxu1 %v8657_v34  ;;  %v8747_v34 = vld [vmem:[#allocation7 + $0x174] ss:$8 sps:$4 sm:$0xff]  }
 0x395   :  { %5814 = vmatpush1.bf16.msra.mxu1 %v8655_v36  ;;  %v8750_v36 = vld [vmem:[#allocation7 + $0x184] ss:$8 sps:$4 sm:$0xff]  }
 0x396   :  { %5815 = vmatprep.subr.bf16.mxu1 %v8660_v37  ;;  %v8748_v37 = vld [vmem:[#allocation7 + $0x180] ss:$8 sps:$4 sm:$0xff]  }
 0x399   :  { %5816 = vmatpush1.bf16.msra.mxu1 %v8658_v39  ;;  %v8753_v39 = vld [vmem:[#allocation7 + $0x194] ss:$8 sps:$4 sm:$0xff]  }
 0x39a   :  { %5817 = vmatprep.subr.bf16.mxu1 %v8663_v40  ;;  %v8751_v40 = vld [vmem:[#allocation7 + $0x190] ss:$8 sps:$4 sm:$0xff]  }
 0x39d   :  { %5818 = vmatpush1.bf16.msra.mxu1 %v8661_v41  ;;  %v8756_v41 = vld [vmem:[#allocation7 + $0x1a4] ss:$8 sps:$4 sm:$0xff]  }
 0x39e   :  { %5819 = vmatprep.subr.bf16.mxu1 %v8666_v55  ;;  %v8754_v55 = vld [vmem:[#allocation7 + $0x1a0] ss:$8 sps:$4 sm:$0xff]  }
 0x3a1   :  { %5820 = vmatpush1.bf16.msra.mxu1 %v8664_v43  ;;  %v8759_v43 = vld [vmem:[#allocation7 + $0x1b4] ss:$8 sps:$4 sm:$0xff]  }
 0x3a2   :  { %5821 = vmatprep.subr.bf16.mxu1 %v8669_v45  ;;  %v8757_v45 = vld [vmem:[#allocation7 + $0x1b0] ss:$8 sps:$4 sm:$0xff]  }
 0x3a5   :  { %5822 = vmatpush1.bf16.msra.mxu1 %v8667_v15  ;;  %v8762_v15 = vld [vmem:[#allocation7 + $0x1c4] ss:$8 sps:$4 sm:$0xff]  }
 0x3a6   :  { %5823 = vmatprep.subr.bf16.mxu1 %v8672_v46  ;;  %v8760_v46 = vld [vmem:[#allocation7 + $0x1c0] ss:$8 sps:$4 sm:$0xff]  }
 0x3a9   :  { %5824 = vmatpush1.bf16.msra.mxu1 %v8670_v6  ;;  %v8765_v6 = vld [vmem:[#allocation7 + $0x1d4] ss:$8 sps:$4 sm:$0xff]  }
 0x3aa   :  { %5825 = vmatprep.subr.bf16.mxu1 %v8675_v49  ;;  %v8763_v49 = vld [vmem:[#allocation7 + $0x1d0] ss:$8 sps:$4 sm:$0xff]  }
 0x3ad   :  { %5826 = vmatpush1.bf16.msra.mxu1 %v8673_v50  ;;  %v8768_v50 = vld [vmem:[#allocation7 + $0x1e4] ss:$8 sps:$4 sm:$0xff]  }
 0x3ae   :  { %7385 = vmatprep.subr.bf16.mxu1 %v8772_v5  ;;  %v8786_v5 = vld [vmem:[#allocation10 + $0x78] sm:$0xff]  }
 0x3b0   :  { %5828 = vmatmul.mubr.bf16.vlgmr.msra.gmra.mrb[4].mxu1 %v9320_v11  ;;  %v4843_v11 = vadd.f32 %v9188_v3, %v953_v57  ;;  %v8729_v3 = vld [vmem:[#allocation7 + $0x114] ss:$8 sps:$4 sm:$0xff]   ;;  %v8769_v57 = vld [vmem:[#allocation7 + $0x1f0] ss:$8 sps:$4 sm:$0xff]  }
 0x3b1   :  { %7386 = vmatpush3.bf16.msra.mxu1 %v8773_v17  ;;  %v8787_v17 = vld [vmem:[#allocation10 + $0x38] sm:$0xff]  }
 0x3b2   :  { %7387 = vmatprep.subr.bf16.mxu1 %v8774_v18  ;;  %v5914_v18 = vld [vmem:[#allocation8] sm:$0x3] }
 0x3b5   :  { %7388 = vmatpush3.bf16.msra.mxu1 %v8775_v33 }
 0x3b6   :  { %7389 = vmatprep.subr.bf16.mxu1 %v8776_v20 }
 0x3b9   :  { %7390 = vmatpush3.bf16.msra.mxu1 %v8777_v48 }
 0x3ba   :  { %7391 = vmatprep.subr.bf16.mxu1 %v8778_v23 }
 0x3bd   :  { %7392 = vmatpush3.bf16.msra.mxu1 %v8779_v38 }
 0x3be   :  { %7393 = vmatprep.subr.bf16.mxu1 %v8780_v47 }
 0x3c1   :  { %7394 = vmatpush3.bf16.msra.mxu1 %v8781_v28 }
 0x3c2   :  { %7395 = vmatprep.subr.bf16.mxu1 %v8782_v29 }
 0x404   :  { %v5313_v59 = vpop.f32.mrb[0].mxu0 }
 0x405   :  { %v7408_v61 = vadd.f32 %v5313_v59, %v4841_v58  ;;  %v5315_v62 = vpop.f32.mrb[1].mxu0  ;;  %v956_v58 = vsub.s32 2, %v9328_v51 }
 0x406   :  { %v7410_v0 = vadd.f32 %v5315_v62, %v4843_v11  ;;  %v5317_v1 = vpop.f32.mrb[2].mxu0  ;;  %v960_v11 = vsub.s32 3, %v9328_v51 }
 0x407   :  { %v7412_v4 = vadd.f32 %v5317_v1, %v4845_v21  ;;  %v5319_v12 = vpop.f32.mrb[3].mxu0  ;;  %v5838_v9 = vmax.f32 %v7408_v61, 0.0  ;;  %v957_v59 = vrot.slane %v9331_v53, %v956_v58 }
 0x408   :  { %v7414_v8 = vadd.f32 %v5319_v12, %v4847_v63  ;;  %v5839_v13 = vmax.f32 %v7410_v0, 0.0  ;;  %v961_v21 = vrot.slane %v9331_v53, %v960_v11  ;;  %v8785_v53 = vld [vmem:[#allocation10 + $0x30] sm:$0xff]  }
 0x409   :  { %v5842_v10 = vmax.f32 %v7412_v4, 0.0 }
 0x40a   :  { %v5843_v35 = vmax.f32 %v7414_v8, 0.0 }
 0x40b   :  { %v5846_v14 = vpack.c.bf16 %v5842_v10, %v5838_v9 }
 0x40c   :  { %v5847_v2 = vpack.c.bf16 %v5843_v35, %v5839_v13 }
 0x40e   :  { %6278 = vmatprep.mubr.bf16.mxu0 %v5847_v2 }
 0x40f   :  { %6279 = vmatmul.mubr.bf16.vlgmr.msra.gmra.mrb[4].mxu0 %v5846_v14 }
 0x410   :  { %6290 = vmatpush1.bf16.msra.mxu0 %v8724_v16  ;;  %v8783_v16 = vld [vmem:[#allocation10 + $0x28] sm:$0xff]  }
 0x411   :  { %6291 = vmatprep.subr.bf16.mxu0 %v8729_v3  ;;  %7396 = vmatpush3.bf16.msra.mxu1 %v8783_v16  ;;  %v8784_v3 = vld [vmem:[#allocation10 + $0x70] sm:$0xff]  }
 0x412   :  { %7397 = vmatprep.subr.bf16.mxu1 %v8784_v3 }
 0x414   :  { %6292 = vmatpush1.bf16.msra.mxu0 %v8727_v7  ;;  %v5919_v7 = vrot.slane %v5914_v18, %v948_v52 }
 0x415   :  { %6293 = vmatprep.subr.bf16.mxu0 %v8732_v19  ;;  %7398 = vmatpush3.bf16.msra.mxu1 %v8785_v53  ;;  %v5923_v19 = vrot.slane %v5914_v18, %v952_v24 }
 0x416   :  { %7399 = vmatprep.subr.bf16.mxu1 %v8786_v5 }
 0x418   :  { %6294 = vmatpush1.bf16.msra.mxu0 %v8730_v42 }
 0x419   :  { %6295 = vmatprep.subr.bf16.mxu0 %v8735_v22  ;;  %7400 = vmatpush3.bf16.msra.mxu1 %v8787_v17 }
 0x41c   :  { %6296 = vmatpush1.bf16.msra.mxu0 %v8733_v60 }
 0x41d   :  { %6297 = vmatprep.subr.bf16.mxu0 %v8738_v25 }
 0x420   :  { %6298 = vmatpush1.bf16.msra.mxu0 %v8736_v26 }
 0x421   :  { %6299 = vmatprep.subr.bf16.mxu0 %v8741_v27 }
 0x424   :  { %6300 = vmatpush1.bf16.msra.mxu0 %v8739_v30  ;;  %v7368_v30 = vld [vmem:[#allocation11] ss:$0 sm:$0xff] }
 0x425   :  { %6301 = vmatprep.subr.bf16.mxu0 %v8744_v31 }
 0x428   :  { %6302 = vmatpush1.bf16.msra.mxu0 %v8742_v32 }
 0x429   :  { %6303 = vmatprep.subr.bf16.mxu0 %v8747_v34 }
 0x42c   :  { %6304 = vmatpush1.bf16.msra.mxu0 %v8745_v54 }
 0x42d   :  { %6305 = vmatprep.subr.bf16.mxu0 %v8750_v36 }
 0x430   :  { %6306 = vmatpush1.bf16.msra.mxu0 %v8748_v37 }
 0x431   :  { %6307 = vmatprep.subr.bf16.mxu0 %v8753_v39 }
 0x434   :  { %6308 = vmatpush1.bf16.msra.mxu0 %v8751_v40 }
 0x435   :  { %6309 = vmatprep.subr.bf16.mxu0 %v8756_v41 }
 0x438   :  { %6310 = vmatpush1.bf16.msra.mxu0 %v8754_v55 }
 0x439   :  { %6311 = vmatprep.subr.bf16.mxu0 %v8759_v43 }
 0x43c   :  { %6312 = vmatpush1.bf16.msra.mxu0 %v8757_v45 }
 0x43d   :  { %6313 = vmatprep.subr.bf16.mxu0 %v8762_v15 }
 0x440   :  { %6314 = vmatpush1.bf16.msra.mxu0 %v8760_v46 }
 0x441   :  { %6315 = vmatprep.subr.bf16.mxu0 %v8765_v6 }
 0x444   :  { %6316 = vmatpush1.bf16.msra.mxu0 %v8763_v49 }
 0x445   :  { %6317 = vmatprep.subr.bf16.mxu0 %v8768_v50 }
 0x448   :  { %6318 = vmatpush1.bf16.msra.mxu0 %v8766_v44 }
 0x449   :  { %6319 = vmatprep.subr.bf16.mxu0 %v8771_v56 }
 0x44c   :  { %6320 = vmatpush1.bf16.msra.mxu0 %v8769_v57 }
 0x483   :  { %v5829_v61 = vpop.f32.mrb[4].mxu1 }
 0x484   :  { %v7415_v62 = vadd.f32 %v5829_v61, %v957_v59  ;;  %v5831_v63 = vpop.f32.mrb[5].mxu1 }
 0x485   :  { %v7416_v0 = vadd.f32 %v5831_v63, %v961_v21  ;;  %v5833_v1 = vpop.f32.mrb[6].mxu1 }
 0x486   :  { %v7417_v4 = vadd.f32 %v5833_v1, %v957_v59  ;;  %v5835_v12 = vpop.f32.mrb[7].mxu1  ;;  %v5840_v9 = vmax.f32 %v7415_v62, 0.0 }
 0x487   :  { %v7418_v8 = vadd.f32 %v5835_v12, %v961_v21  ;;  %v5841_v13 = vmax.f32 %v7416_v0, 0.0 }
 0x488   :  { %v5844_v10 = vmax.f32 %v7417_v4, 0.0 }
 0x489   :  { %v5845_v35 = vmax.f32 %v7418_v8, 0.0 }
 0x48a   :  { %v5848_v14 = vpack.c.bf16 %v5844_v10, %v5840_v9 }
 0x48b   :  { %v5849_v2 = vpack.c.bf16 %v5845_v35, %v5841_v13 }
 0x48d   :  { %6321 = vmatprep.mubr.bf16.mxu0 %v5849_v2 }
 0x48e   :  { %6322 = vmatmul.mubr.bf16.vlgmr.msra.gmra.mrb[4].mxu0 %v5848_v14 }
 0x561   :  { %v6323_v33 = vpop.f32.mrb[4].mxu0 }
 0x562   :  { %v7419_v20 = vadd.f32 %v6323_v33, %v5919_v7  ;;  %v6325_v42 = vpop.f32.mrb[5].mxu0 }
 0x563   :  { %v7420_v22 = vadd.f32 %v6325_v42, %v5923_v19  ;;  %v6327_v48 = vpop.f32.mrb[6].mxu0 }
 0x564   :  { %v7421_v23 = vadd.f32 %v6327_v48, %v5919_v7  ;;  %v6329_v60 = vpop.f32.mrb[7].mxu0  ;;  %v6332_v38 = vmax.f32 %v7419_v20, 0.0 }
 0x565   :  { %v7422_v25 = vadd.f32 %v6329_v60, %v5923_v19  ;;  %v6333_v26 = vmax.f32 %v7420_v22, 0.0 }
 0x566   :  { %v6334_v47 = vmax.f32 %v7421_v23, 0.0 }
 0x567   :  { %v6335_v27 = vmax.f32 %v7422_v25, 0.0 }
 0x568   :  { %v6336_v28 = vpack.c.bf16 %v6334_v47, %v6332_v38 }
 0x569   :  { %v6337_v29 = vpack.c.bf16 %v6335_v27, %v6333_v26 }
 0x56b   :  { %6505 = vmatprep.mubr.bf16.mxu1 %v6337_v29 }
 0x56c   :  { %6506 = vmatmul.mubr.bf16.vlgmr.msra.gmra.mrb[8].mxu1 %v6336_v28 }
 0x63f   :  { %v7401_v52 = vpop.f32.mrb[8].mxu1 }
 0x640   :  { %v7402_v51 = vpop.f32.mrb[9].mxu1 }
 0x641   :  { %v7403_v24 = vadd.f32 %v7402_v51, %v7401_v52  ;;  %v7404_v31 = vpop.f32.mrb[10].mxu1 }
 0x642   :  { %v7405_v32 = vpop.f32.mrb[11].mxu1 }
 0x643   :  { %v6508_v34 = vadd.f32 %v7403_v24, %v7368_v30  ;;  %v7406_v54 = vadd.f32 %v7405_v32, %v7404_v31 }
 0x645   :  { %6514 = vst [vmem:[#allocation13] sm:$0xff] %v6508_v34  ;;  %v6511_v36 = vadd.f32 %v7406_v54, %v7368_v30 }
 0x647   :  { %6515 = vst [vmem:[#allocation13 + $0x8] sm:$0xff] %v6511_v36 }
 0x648   :  { %8931 = shalt.err (!%p8928_p10)
}
 0x649   :  { %s8932_s20 = scalar_lea.hbm %s9374_s7, 256 }
 0x64a   :  { %p8933_p11 = scmp.ne.s32.totalorder %s9374_s7, %s8932_s20  ;;  %p8936_p12 = scmp.lt.u32.totalorder %s8932_s20, %s9374_s7 }
 0x64c   :  { %p8938_p13 = pnand %p8936_p12, %p8933_p11 }
 0x64e   :  { %8941 = shalt.err (!%p8938_p13)
}
 0x64f   :  { %6527 = dma.vmem_to_hbm [thread:$0]  %s6522_s16, 256, %s9374_s7, [#allocation4], %s8958_s1, %s8958_s1, %s8959_s23  }
 0x650   :  { %8950 = dma.done.wait [#allocation4], 256  }
 0x651   :  { %8951 = vsyncadd [#allocation4], 4294967040 }
 0x652   :  { %6531 = vsyncpa [#allocation3], 1 }
 0x653   :  { %6532 = vsyncpa [#allocation6], 1 }
 0x654   :  { %6533 = vsyncpa [#allocation9], 1 }
 0x655   :  { %6534 = vsyncpa [#allocation12], 1 }
 0x656   :  { %6535 = vsyncpa [#allocation4], 1 }

</bundles_post_ra>
